<compile_context>
chip_gen: v5e
topology: v5e:2x2
jax: 0.10.0
libtpu: 0.0.40
codegen_flags: <defaults>
</compile_context>

<pallas_src>
import jax
import jax.numpy as jnp
from jax import lax
from jax.experimental import pallas as pl
from jax.experimental.pallas import tpu as pltpu


# ----------------------------------------------------------------------------
# Pallas kernel
# ----------------------------------------------------------------------------
def _lstm2_fc_kernel(x_ref, wx0_ref, b0_ref, wh0_ref, w1_ref, b1_ref,
                     wfc_ref, bfc_ref, out_ref):
    """2-layer LSTM over the full sequence + FC on the last hidden state.

    x_ref   : (T, Bt, 1)     time-major input tile (IN == 1)
    wx0_ref : (1, 4Hp)  f32  layer-0 input->hidden fused weights (i,f,o,g; i/f/o pre-scaled 0.5)
    b0_ref  : (1, 4Hp)  f32  layer-0 fused bias (b_ih + b_hh, i/f/o pre-scaled)
    wh0_ref : (Hp, 4Hp) bf16 layer-0 hidden->hidden fused weights
    w1_ref  : (2Hp,4Hp) bf16 layer-1 stacked [Wx1; Wh1] fused weights
    b1_ref  : (1, 4Hp)  f32  layer-1 fused bias
    wfc_ref : (1, Hp)   f32  FC weight row (O == 1)
    bfc_ref : (1, 1)    f32  FC bias
    out_ref : (Bt, 1)   f32
    """
    T, Bt, _ = x_ref.shape
    Hp = wh0_ref.shape[0]
    G = 4 * Hp
    f32 = jnp.float32
    mxu_dt = wh0_ref.dtype

    # Hoist all weight/bias loads and the sublane bias broadcasts out of the
    # recurrence so nothing is re-materialized per iteration.
    wx0 = wx0_ref[...]                                    # (1, 4Hp)
    b0 = jnp.broadcast_to(b0_ref[...], (Bt, G))           # (Bt, 4Hp)
    wh0 = wh0_ref[...]                                    # (Hp, 4Hp) bf16
    w1 = w1_ref[...]                                      # (2Hp, 4Hp) bf16
    b1 = jnp.broadcast_to(b1_ref[...], (Bt, G))
    wfc = wfc_ref[...]
    bfc = bfc_ref[...]

    def gates(z, c):
        # Packed gate order is [i, f, o, g]; the 0.5 sigmoid pre-scale was
        # folded into the i/f/o weight columns at pack time, so
        #   sigmoid(a) = 0.5 * tanh(a/2) + 0.5   with a/2 == z slice.
        sfo = 0.5 * jnp.tanh(z[:, 0:3 * Hp]) + 0.5        # i, f, o in one EUP burst
        g = jnp.tanh(z[:, 3 * Hp:4 * Hp])
        i = sfo[:, 0 * Hp:1 * Hp]
        f = sfo[:, 1 * Hp:2 * Hp]
        o = sfo[:, 2 * Hp:3 * Hp]
        c_new = f * c + i * g                             # f32 cell state
        h_new = o * jnp.tanh(c_new)
        return h_new, c_new

    def step(t, carry):
        h0, c0, h1, c1 = carry
        # Layer 0: IN == 1, so x_t @ Wx0 is a broadcast multiply (VPU), done
        # per step (not materialized over T) and overlapping the MXU dot.
        x_t = x_ref[t]                                    # (Bt, 1)
        z0 = (x_t * wx0 + b0
              + jnp.dot(h0.astype(mxu_dt), wh0, preferred_element_type=f32))
        h0, c0 = gates(z0, c0)
        # Layer 1: single fused K = 2*Hp matmul against stacked [Wx1; Wh1].
        h01 = jnp.concatenate([h0, h1], axis=-1).astype(mxu_dt)   # (Bt, 2Hp)
        z1 = jnp.dot(h01, w1, preferred_element_type=f32) + b1
        h1, c1 = gates(z1, c1)
        return (h0, c0, h1, c1)

    zeros = jnp.zeros((Bt, Hp), f32)
    _, _, h1, _ = lax.fori_loop(0, T, step, (zeros, zeros, zeros, zeros),
                                unroll=True)

    # Final FC (O == 1): VPU multiply + lane reduction (no tiny MXU dot).
    out_ref[...] = jnp.sum(h1 * wfc, axis=-1, keepdims=True) + bfc


# ----------------------------------------------------------------------------
# Parameter construction / packing
# ----------------------------------------------------------------------------
def make_params(key, input_size, hidden_size, output_size):
    """Deterministic init matching nn.LSTM / nn.Linear shapes (PyTorch layout)."""
    H = hidden_size
    bound = 1.0 / jnp.sqrt(jnp.float32(H))
    keys = jax.random.split(key, 10)

    def u(k_, shape):
        return jax.random.uniform(k_, shape, jnp.float32, -bound, bound)

    return dict(
        w_ih_l0=u(keys[0], (4 * H, input_size)),
        w_hh_l0=u(keys[1], (4 * H, H)),
        b_ih_l0=u(keys[2], (4 * H,)),
        b_hh_l0=u(keys[3], (4 * H,)),
        w_ih_l1=u(keys[4], (4 * H, H)),
        w_hh_l1=u(keys[5], (4 * H, H)),
        b_ih_l1=u(keys[6], (4 * H,)),
        b_hh_l1=u(keys[7], (4 * H,)),
        w_fc=u(keys[8], (output_size, H)),
        b_fc=u(keys[9], (output_size,)),
    )


# PyTorch gate blocks are [i, f, g, o]; we pack as [i, f, o, g] so the three
# sigmoid gates form one contiguous lane slice, and fold the 0.5 sigmoid
# pre-scale into the i/f/o columns.
_GATE_SRC = (0, 1, 3, 2)
_GATE_SCALE = (0.5, 0.5, 0.5, 1.0)


def _pack_gate_matrix(w, Hp, Kp, dtype):
    """(4H, K) PyTorch gate-stacked weight -> (Kp, 4Hp) fused, transposed,
    gate-reordered, sigmoid-prescaled, zero-padded."""
    H4, K = w.shape
    H = H4 // 4
    out = jnp.zeros((Kp, 4 * Hp), jnp.float32)
    for dst in range(4):
        src, s = _GATE_SRC[dst], _GATE_SCALE[dst]
        blk = (s * w[src * H:(src + 1) * H, :]).T          # (K, H)
        out = out.at[:K, dst * Hp:dst * Hp + H].set(blk)
    return out.astype(dtype)


def _pack_gate_bias(b_ih, b_hh, Hp):
    H = b_ih.shape[0] // 4
    b = b_ih + b_hh
    out = jnp.zeros((1, 4 * Hp), jnp.float32)
    for dst in range(4):
        src, s = _GATE_SRC[dst], _GATE_SCALE[dst]
        out = out.at[0, dst * Hp:dst * Hp + H].set(s * b[src * H:(src + 1) * H])
    return out


def pack_params(p, Hp, mxu_dtype=jnp.bfloat16):
    H = p['w_hh_l0'].shape[1]
    IN = p['w_ih_l0'].shape[1]
    # Layer-0 input weights / biases stay f32 (used on the VPU, IN == 1).
    wx0 = _pack_gate_matrix(p['w_ih_l0'], Hp, Kp=IN, dtype=jnp.float32)     # (1, 4Hp)
    b0 = _pack_gate_bias(p['b_ih_l0'], p['b_hh_l0'], Hp)
    # Recurrent weights feed the MXU -> bf16 for single-pass issue.
    wh0 = _pack_gate_matrix(p['w_hh_l0'], Hp, Kp=Hp, dtype=jnp.float32)     # (Hp, 4Hp)
    wx1 = _pack_gate_matrix(p['w_ih_l1'], Hp, Kp=Hp, dtype=jnp.float32)
    wh1 = _pack_gate_matrix(p['w_hh_l1'], Hp, Kp=Hp, dtype=jnp.float32)
    w1 = jnp.concatenate([wx1, wh1], axis=0)                                # (2Hp, 4Hp)
    b1 = _pack_gate_bias(p['b_ih_l1'], p['b_hh_l1'], Hp)
    wfc = jnp.zeros((1, Hp), jnp.float32).at[0, :H].set(p['w_fc'][0])
    bfc = p['b_fc'].reshape(1, 1).astype(jnp.float32)
    return (wx0, b0, wh0.astype(mxu_dtype), w1.astype(mxu_dtype), b1, wfc, bfc)


# ----------------------------------------------------------------------------
# Wrapper
# ----------------------------------------------------------------------------
def _full_spec(shape):
    """BlockSpec for a weight that is identical for every grid point."""
    return pl.BlockSpec(shape, lambda *_: (0,) * len(shape))


def lstm_model_forward(x_btI, params, *, hidden_pad=128, batch_tile=256):
    """x_btI: (B, T, 1) batch-first like PyTorch. Returns (B, 1)."""
    B, T, IN = x_btI.shape
    assert IN == 1, "kernel is specialized to input_size == 1"
    assert params['w_fc'].shape[0] == 1, "kernel is specialized to output_size == 1"

    Hp = hidden_pad                        # 50 -> 128: 4Hp = 512, lane-aligned gates
    G = 4 * Hp

    # Batch padding / tiling: fill the 8 sublanes; for large batches shard
    # independent recurrences across grid points (parallel across v7x cores).
    B8 = max(8, ((B + 7) // 8) * 8)
    if B8 <= batch_tile:
        bt, Bp = B8, B8
    else:
        bt = batch_tile
        Bp = ((B8 + bt - 1) // bt) * bt
    nb = Bp // bt

    packed = pack_params(params, Hp)

    # time-major, batch padded with zeros (padded rows are discarded at the end)
    x_tb = jnp.transpose(x_btI, (1, 0, 2)).astype(jnp.float32)   # (T, B, 1)
    x_tb = jnp.pad(x_tb, ((0, 0), (0, Bp - B), (0, 0)))          # (T, Bp, 1)

    out = pl.pallas_call(
        _lstm2_fc_kernel,
        out_shape=jax.ShapeDtypeStruct((Bp, 1), jnp.float32),
        grid=(nb,),
        in_specs=[
            pl.BlockSpec((T, bt, 1), lambda b: (0, b, 0)),   # x tile
            _full_spec((1, G)),                              # wx0
            _full_spec((1, G)),                              # b0
            _full_spec((Hp, G)),                             # wh0 (bf16)
            _full_spec((2 * Hp, G)),                         # stacked [Wx1;Wh1] (bf16)
            _full_spec((1, G)),                              # b1
            _full_spec((1, Hp)),                             # wfc
            _full_spec((1, 1)),                              # bfc
        ],
        out_specs=pl.BlockSpec((bt, 1), lambda b: (b, 0)),
        compiler_params=pltpu.CompilerParams(
            dimension_semantics=("parallel",),
            vmem_limit_bytes=32 * 1024 * 1024,
        ),
    )(x_tb, *packed)
    return out[:B]


# ----------------------------------------------------------------------------
# Pure-JAX f32 reference of the PyTorch forward (for the sanity check)
# ----------------------------------------------------------------------------
def reference_forward(x, p):
    B, T, _ = x.shape
    H = p['w_hh_l0'].shape[1]
    hi = lax.Precision.HIGHEST

    def cell(x_t, h, c, w_ih, w_hh, b_ih, b_hh):
        z = (jnp.dot(x_t, w_ih.T, precision=hi)
             + jnp.dot(h, w_hh.T, precision=hi) + b_ih + b_hh)   # gates i,f,g,o
        i = jax.nn.sigmoid(z[:, 0:H])
        f = jax.nn.sigmoid(z[:, H:2 * H])
        g = jnp.tanh(z[:, 2 * H:3 * H])
        o = jax.nn.sigmoid(z[:, 3 * H:4 * H])
        c = f * c + i * g
        h = o * jnp.tanh(c)
        return h, c

    h0 = c0 = h1 = c1 = jnp.zeros((B, H), jnp.float32)
    for t in range(T):
        h0, c0 = cell(x[:, t, :], h0, c0,
                      p['w_ih_l0'], p['w_hh_l0'], p['b_ih_l0'], p['b_hh_l0'])
        h1, c1 = cell(h0, h1, c1,
                      p['w_ih_l1'], p['w_hh_l1'], p['b_ih_l1'], p['b_hh_l1'])
    return jnp.dot(h1, p['w_fc'].T, precision=hi) + p['b_fc']


if __name__ == "__main__":
    input_size = 1
    hidden_size = 50
    output_size = 1
    batch = 4
    seq = 8

    key = jax.random.PRNGKey(0)
    k_x, k_p = jax.random.split(key)
    x = jax.random.normal(k_x, (batch, seq, input_size), jnp.float32)
    params = make_params(k_p, input_size, hidden_size, output_size)

    out = jax.block_until_ready(lstm_model_forward(x, params))
    ref = jax.block_until_ready(reference_forward(x, params))

    assert out.shape == (batch, output_size), out.shape
    # Tolerance is set for the bf16 MXU operands (weights + hidden states cast
    # to bf16, f32 accumulation / f32 cell & gate math); observed drift vs the
    # f32 reference is ~1e-3-level, well inside 2e-2.
    assert jnp.allclose(out, ref, rtol=2e-2, atol=2e-2), (out, ref)
    print("KERNEL_OK")
</pallas_src>

<mosaic_0001>
module attributes {stable_mosaic.version = 11 : i64} {
  func.func @_lstm2_fc_kernel(%arg0: i32, %arg1: memref<8x8x1xf32, #tpu.memory_space<vmem>>, %arg2: memref<1x512xf32, #tpu.memory_space<vmem>>, %arg3: memref<1x512xf32, #tpu.memory_space<vmem>>, %arg4: memref<128x512xbf16, #tpu.memory_space<vmem>>, %arg5: memref<256x512xbf16, #tpu.memory_space<vmem>>, %arg6: memref<1x512xf32, #tpu.memory_space<vmem>>, %arg7: memref<1x128xf32, #tpu.memory_space<vmem>>, %arg8: memref<1x1xf32, #tpu.memory_space<vmem>>, %arg9: memref<8x1xf32, #tpu.memory_space<vmem>>) attributes {dimension_semantics = [#tpu.dimension_semantics<parallel>], iteration_bounds = array<i64: 1>, scalar_prefetch = 0 : i64, scratch_operands = 0 : i64, tpu.core_type = #tpu.core_type<tc>, window_params = [{transform_indices = @transform_0, window_bounds = array<i64: 8, 8, 1>}, {pipeline_mode = #tpu.pipeline_mode<synchronous>, transform_indices = @transform_1, window_bounds = array<i64: 1, 512>}, {pipeline_mode = #tpu.pipeline_mode<synchronous>, transform_indices = @transform_2, window_bounds = array<i64: 1, 512>}, {pipeline_mode = #tpu.pipeline_mode<synchronous>, transform_indices = @transform_3, window_bounds = array<i64: 128, 512>}, {pipeline_mode = #tpu.pipeline_mode<synchronous>, transform_indices = @transform_4, window_bounds = array<i64: 256, 512>}, {pipeline_mode = #tpu.pipeline_mode<synchronous>, transform_indices = @transform_5, window_bounds = array<i64: 1, 512>}, {pipeline_mode = #tpu.pipeline_mode<synchronous>, transform_indices = @transform_6, window_bounds = array<i64: 1, 128>}, {pipeline_mode = #tpu.pipeline_mode<synchronous>, transform_indices = @transform_7, window_bounds = array<i64: 1, 1>}, {transform_indices = @transform_8, window_bounds = array<i64: 8, 1>}]} {
    %c0 = arith.constant 0 : index
    %c0_0 = arith.constant 0 : index
    %0 = vector.load %arg2[%c0, %c0_0] : memref<1x512xf32, #tpu.memory_space<vmem>>, vector<1x512xf32>
    %c0_1 = arith.constant 0 : index
    %c0_2 = arith.constant 0 : index
    %1 = vector.load %arg3[%c0_1, %c0_2] : memref<1x512xf32, #tpu.memory_space<vmem>>, vector<1x512xf32>
    %2 = vector.shape_cast %1 : vector<1x512xf32> to vector<1x512xf32>
    %3 = vector.broadcast %2 : vector<1x512xf32> to vector<8x512xf32>
    %c0_3 = arith.constant 0 : index
    %c0_4 = arith.constant 0 : index
    %4 = vector.load %arg4[%c0_3, %c0_4] : memref<128x512xbf16, #tpu.memory_space<vmem>>, vector<128x512xbf16>
    %c0_5 = arith.constant 0 : index
    %c0_6 = arith.constant 0 : index
    %5 = vector.load %arg5[%c0_5, %c0_6] : memref<256x512xbf16, #tpu.memory_space<vmem>>, vector<256x512xbf16>
    %c0_7 = arith.constant 0 : index
    %c0_8 = arith.constant 0 : index
    %6 = vector.load %arg6[%c0_7, %c0_8] : memref<1x512xf32, #tpu.memory_space<vmem>>, vector<1x512xf32>
    %7 = vector.shape_cast %6 : vector<1x512xf32> to vector<1x512xf32>
    %8 = vector.broadcast %7 : vector<1x512xf32> to vector<8x512xf32>
    %c0_9 = arith.constant 0 : index
    %c0_10 = arith.constant 0 : index
    %9 = vector.load %arg7[%c0_9, %c0_10] : memref<1x128xf32, #tpu.memory_space<vmem>>, vector<1x128xf32>
    %c0_11 = arith.constant 0 : index
    %c0_12 = arith.constant 0 : index
    %10 = vector.load %arg8[%c0_11, %c0_12] : memref<1x1xf32, #tpu.memory_space<vmem>>, vector<1x1xf32>
    %cst = arith.constant 0.000000e+00 : f32
    %11 = vector.broadcast %cst : f32 to vector<8x128xf32>
    %c0_i32 = arith.constant 0 : i32
    %12 = arith.index_cast %c0_i32 : i32 to index
    %c0_13 = arith.constant 0 : index
    %c0_14 = arith.constant 0 : index
    %13 = vector.load %arg1[%12, %c0_13, %c0_14] : memref<8x8x1xf32, #tpu.memory_space<vmem>>, vector<1x8x1xf32>
    %14 = vector.shape_cast %13 : vector<1x8x1xf32> to vector<8x1xf32>
    %15 = vector.broadcast %14 : vector<8x1xf32> to vector<8x512xf32>
    %16 = vector.broadcast %0 : vector<1x512xf32> to vector<8x512xf32>
    %17 = arith.mulf %15, %16 : vector<8x512xf32>
    %18 = arith.addf %17, %3 : vector<8x512xf32>
    %19 = arith.truncf %11 : vector<8x128xf32> to vector<8x128xbf16>
    %cst_15 = arith.constant dense<0.000000e+00> : vector<8x512xf32>
    %20 = tpu.matmul %19, %4, %cst_15 {dimension_numbers = #tpu.dot_dimension_numbers<[1], [0], [0], [1], [0, 0, 1, 1], [], []>} : vector<8x128xbf16>, vector<128x512xbf16>, vector<8x512xf32> -> vector<8x512xf32>
    %21 = arith.addf %18, %20 : vector<8x512xf32>
    %22 = vector.extract_strided_slice %21 {offsets = [0, 0], sizes = [8, 384], strides = [1, 1]} : vector<8x512xf32> to vector<8x384xf32>
    %23 = math.tanh %22 : vector<8x384xf32>
    %cst_16 = arith.constant 5.000000e-01 : f32
    %24 = vector.broadcast %cst_16 : f32 to vector<8x384xf32>
    %25 = arith.mulf %24, %23 : vector<8x384xf32>
    %cst_17 = arith.constant 5.000000e-01 : f32
    %26 = vector.broadcast %cst_17 : f32 to vector<8x384xf32>
    %27 = arith.addf %25, %26 : vector<8x384xf32>
    %28 = vector.extract_strided_slice %21 {offsets = [0, 384], sizes = [8, 128], strides = [1, 1]} : vector<8x512xf32> to vector<8x128xf32>
    %29 = math.tanh %28 : vector<8x128xf32>
    %30 = vector.extract_strided_slice %27 {offsets = [0, 0], sizes = [8, 128], strides = [1, 1]} : vector<8x384xf32> to vector<8x128xf32>
    %31 = vector.extract_strided_slice %27 {offsets = [0, 128], sizes = [8, 128], strides = [1, 1]} : vector<8x384xf32> to vector<8x128xf32>
    %32 = vector.extract_strided_slice %27 {offsets = [0, 256], sizes = [8, 128], strides = [1, 1]} : vector<8x384xf32> to vector<8x128xf32>
    %33 = arith.mulf %31, %11 : vector<8x128xf32>
    %34 = arith.mulf %30, %29 : vector<8x128xf32>
    %35 = arith.addf %33, %34 : vector<8x128xf32>
    %36 = math.tanh %35 : vector<8x128xf32>
    %37 = arith.mulf %32, %36 : vector<8x128xf32>
    %38 = tpu.concatenate %37, %11 in 1 : vector<8x128xf32>, vector<8x128xf32> -> vector<8x256xf32>
    %39 = arith.truncf %38 : vector<8x256xf32> to vector<8x256xbf16>
    %cst_18 = arith.constant dense<0.000000e+00> : vector<8x512xf32>
    %40 = tpu.matmul %39, %5, %cst_18 {dimension_numbers = #tpu.dot_dimension_numbers<[1], [0], [0], [1], [0, 0, 1, 1], [], []>} : vector<8x256xbf16>, vector<256x512xbf16>, vector<8x512xf32> -> vector<8x512xf32>
    %41 = arith.addf %40, %8 : vector<8x512xf32>
    %42 = vector.extract_strided_slice %41 {offsets = [0, 0], sizes = [8, 384], strides = [1, 1]} : vector<8x512xf32> to vector<8x384xf32>
    %43 = math.tanh %42 : vector<8x384xf32>
    %cst_19 = arith.constant 5.000000e-01 : f32
    %44 = vector.broadcast %cst_19 : f32 to vector<8x384xf32>
    %45 = arith.mulf %44, %43 : vector<8x384xf32>
    %cst_20 = arith.constant 5.000000e-01 : f32
    %46 = vector.broadcast %cst_20 : f32 to vector<8x384xf32>
    %47 = arith.addf %45, %46 : vector<8x384xf32>
    %48 = vector.extract_strided_slice %41 {offsets = [0, 384], sizes = [8, 128], strides = [1, 1]} : vector<8x512xf32> to vector<8x128xf32>
    %49 = math.tanh %48 : vector<8x128xf32>
    %50 = vector.extract_strided_slice %47 {offsets = [0, 0], sizes = [8, 128], strides = [1, 1]} : vector<8x384xf32> to vector<8x128xf32>
    %51 = vector.extract_strided_slice %47 {offsets = [0, 128], sizes = [8, 128], strides = [1, 1]} : vector<8x384xf32> to vector<8x128xf32>
    %52 = vector.extract_strided_slice %47 {offsets = [0, 256], sizes = [8, 128], strides = [1, 1]} : vector<8x384xf32> to vector<8x128xf32>
    %53 = arith.mulf %51, %11 : vector<8x128xf32>
    %54 = arith.mulf %50, %49 : vector<8x128xf32>
    %55 = arith.addf %53, %54 : vector<8x128xf32>
    %56 = math.tanh %55 : vector<8x128xf32>
    %57 = arith.mulf %52, %56 : vector<8x128xf32>
    %c1_i32 = arith.constant 1 : i32
    %58 = arith.index_cast %c1_i32 : i32 to index
    %c0_21 = arith.constant 0 : index
    %c0_22 = arith.constant 0 : index
    %59 = vector.load %arg1[%58, %c0_21, %c0_22] : memref<8x8x1xf32, #tpu.memory_space<vmem>>, vector<1x8x1xf32>
    %60 = vector.shape_cast %59 : vector<1x8x1xf32> to vector<8x1xf32>
    %61 = vector.broadcast %60 : vector<8x1xf32> to vector<8x512xf32>
    %62 = vector.broadcast %0 : vector<1x512xf32> to vector<8x512xf32>
    %63 = arith.mulf %61, %62 : vector<8x512xf32>
    %64 = arith.addf %63, %3 : vector<8x512xf32>
    %65 = arith.truncf %37 : vector<8x128xf32> to vector<8x128xbf16>
    %cst_23 = arith.constant dense<0.000000e+00> : vector<8x512xf32>
    %66 = tpu.matmul %65, %4, %cst_23 {dimension_numbers = #tpu.dot_dimension_numbers<[1], [0], [0], [1], [0, 0, 1, 1], [], []>} : vector<8x128xbf16>, vector<128x512xbf16>, vector<8x512xf32> -> vector<8x512xf32>
    %67 = arith.addf %64, %66 : vector<8x512xf32>
    %68 = vector.extract_strided_slice %67 {offsets = [0, 0], sizes = [8, 384], strides = [1, 1]} : vector<8x512xf32> to vector<8x384xf32>
    %69 = math.tanh %68 : vector<8x384xf32>
    %cst_24 = arith.constant 5.000000e-01 : f32
    %70 = vector.broadcast %cst_24 : f32 to vector<8x384xf32>
    %71 = arith.mulf %70, %69 : vector<8x384xf32>
    %cst_25 = arith.constant 5.000000e-01 : f32
    %72 = vector.broadcast %cst_25 : f32 to vector<8x384xf32>
    %73 = arith.addf %71, %72 : vector<8x384xf32>
    %74 = vector.extract_strided_slice %67 {offsets = [0, 384], sizes = [8, 128], strides = [1, 1]} : vector<8x512xf32> to vector<8x128xf32>
    %75 = math.tanh %74 : vector<8x128xf32>
    %76 = vector.extract_strided_slice %73 {offsets = [0, 0], sizes = [8, 128], strides = [1, 1]} : vector<8x384xf32> to vector<8x128xf32>
    %77 = vector.extract_strided_slice %73 {offsets = [0, 128], sizes = [8, 128], strides = [1, 1]} : vector<8x384xf32> to vector<8x128xf32>
    %78 = vector.extract_strided_slice %73 {offsets = [0, 256], sizes = [8, 128], strides = [1, 1]} : vector<8x384xf32> to vector<8x128xf32>
    %79 = arith.mulf %77, %35 : vector<8x128xf32>
    %80 = arith.mulf %76, %75 : vector<8x128xf32>
    %81 = arith.addf %79, %80 : vector<8x128xf32>
    %82 = math.tanh %81 : vector<8x128xf32>
    %83 = arith.mulf %78, %82 : vector<8x128xf32>
    %84 = tpu.concatenate %83, %57 in 1 : vector<8x128xf32>, vector<8x128xf32> -> vector<8x256xf32>
    %85 = arith.truncf %84 : vector<8x256xf32> to vector<8x256xbf16>
    %cst_26 = arith.constant dense<0.000000e+00> : vector<8x512xf32>
    %86 = tpu.matmul %85, %5, %cst_26 {dimension_numbers = #tpu.dot_dimension_numbers<[1], [0], [0], [1], [0, 0, 1, 1], [], []>} : vector<8x256xbf16>, vector<256x512xbf16>, vector<8x512xf32> -> vector<8x512xf32>
    %87 = arith.addf %86, %8 : vector<8x512xf32>
    %88 = vector.extract_strided_slice %87 {offsets = [0, 0], sizes = [8, 384], strides = [1, 1]} : vector<8x512xf32> to vector<8x384xf32>
    %89 = math.tanh %88 : vector<8x384xf32>
    %cst_27 = arith.constant 5.000000e-01 : f32
    %90 = vector.broadcast %cst_27 : f32 to vector<8x384xf32>
    %91 = arith.mulf %90, %89 : vector<8x384xf32>
    %cst_28 = arith.constant 5.000000e-01 : f32
    %92 = vector.broadcast %cst_28 : f32 to vector<8x384xf32>
    %93 = arith.addf %91, %92 : vector<8x384xf32>
    %94 = vector.extract_strided_slice %87 {offsets = [0, 384], sizes = [8, 128], strides = [1, 1]} : vector<8x512xf32> to vector<8x128xf32>
    %95 = math.tanh %94 : vector<8x128xf32>
    %96 = vector.extract_strided_slice %93 {offsets = [0, 0], sizes = [8, 128], strides = [1, 1]} : vector<8x384xf32> to vector<8x128xf32>
    %97 = vector.extract_strided_slice %93 {offsets = [0, 128], sizes = [8, 128], strides = [1, 1]} : vector<8x384xf32> to vector<8x128xf32>
    %98 = vector.extract_strided_slice %93 {offsets = [0, 256], sizes = [8, 128], strides = [1, 1]} : vector<8x384xf32> to vector<8x128xf32>
    %99 = arith.mulf %97, %55 : vector<8x128xf32>
    %100 = arith.mulf %96, %95 : vector<8x128xf32>
    %101 = arith.addf %99, %100 : vector<8x128xf32>
    %102 = math.tanh %101 : vector<8x128xf32>
    %103 = arith.mulf %98, %102 : vector<8x128xf32>
    %c2_i32 = arith.constant 2 : i32
    %104 = arith.index_cast %c2_i32 : i32 to index
    %c0_29 = arith.constant 0 : index
    %c0_30 = arith.constant 0 : index
    %105 = vector.load %arg1[%104, %c0_29, %c0_30] : memref<8x8x1xf32, #tpu.memory_space<vmem>>, vector<1x8x1xf32>
    %106 = vector.shape_cast %105 : vector<1x8x1xf32> to vector<8x1xf32>
    %107 = vector.broadcast %106 : vector<8x1xf32> to vector<8x512xf32>
    %108 = vector.broadcast %0 : vector<1x512xf32> to vector<8x512xf32>
    %109 = arith.mulf %107, %108 : vector<8x512xf32>
    %110 = arith.addf %109, %3 : vector<8x512xf32>
    %111 = arith.truncf %83 : vector<8x128xf32> to vector<8x128xbf16>
    %cst_31 = arith.constant dense<0.000000e+00> : vector<8x512xf32>
    %112 = tpu.matmul %111, %4, %cst_31 {dimension_numbers = #tpu.dot_dimension_numbers<[1], [0], [0], [1], [0, 0, 1, 1], [], []>} : vector<8x128xbf16>, vector<128x512xbf16>, vector<8x512xf32> -> vector<8x512xf32>
    %113 = arith.addf %110, %112 : vector<8x512xf32>
    %114 = vector.extract_strided_slice %113 {offsets = [0, 0], sizes = [8, 384], strides = [1, 1]} : vector<8x512xf32> to vector<8x384xf32>
    %115 = math.tanh %114 : vector<8x384xf32>
    %cst_32 = arith.constant 5.000000e-01 : f32
    %116 = vector.broadcast %cst_32 : f32 to vector<8x384xf32>
    %117 = arith.mulf %116, %115 : vector<8x384xf32>
    %cst_33 = arith.constant 5.000000e-01 : f32
    %118 = vector.broadcast %cst_33 : f32 to vector<8x384xf32>
    %119 = arith.addf %117, %118 : vector<8x384xf32>
    %120 = vector.extract_strided_slice %113 {offsets = [0, 384], sizes = [8, 128], strides = [1, 1]} : vector<8x512xf32> to vector<8x128xf32>
    %121 = math.tanh %120 : vector<8x128xf32>
    %122 = vector.extract_strided_slice %119 {offsets = [0, 0], sizes = [8, 128], strides = [1, 1]} : vector<8x384xf32> to vector<8x128xf32>
    %123 = vector.extract_strided_slice %119 {offsets = [0, 128], sizes = [8, 128], strides = [1, 1]} : vector<8x384xf32> to vector<8x128xf32>
    %124 = vector.extract_strided_slice %119 {offsets = [0, 256], sizes = [8, 128], strides = [1, 1]} : vector<8x384xf32> to vector<8x128xf32>
    %125 = arith.mulf %123, %81 : vector<8x128xf32>
    %126 = arith.mulf %122, %121 : vector<8x128xf32>
    %127 = arith.addf %125, %126 : vector<8x128xf32>
    %128 = math.tanh %127 : vector<8x128xf32>
    %129 = arith.mulf %124, %128 : vector<8x128xf32>
    %130 = tpu.concatenate %129, %103 in 1 : vector<8x128xf32>, vector<8x128xf32> -> vector<8x256xf32>
    %131 = arith.truncf %130 : vector<8x256xf32> to vector<8x256xbf16>
    %cst_34 = arith.constant dense<0.000000e+00> : vector<8x512xf32>
    %132 = tpu.matmul %131, %5, %cst_34 {dimension_numbers = #tpu.dot_dimension_numbers<[1], [0], [0], [1], [0, 0, 1, 1], [], []>} : vector<8x256xbf16>, vector<256x512xbf16>, vector<8x512xf32> -> vector<8x512xf32>
    %133 = arith.addf %132, %8 : vector<8x512xf32>
    %134 = vector.extract_strided_slice %133 {offsets = [0, 0], sizes = [8, 384], strides = [1, 1]} : vector<8x512xf32> to vector<8x384xf32>
    %135 = math.tanh %134 : vector<8x384xf32>
    %cst_35 = arith.constant 5.000000e-01 : f32
    %136 = vector.broadcast %cst_35 : f32 to vector<8x384xf32>
    %137 = arith.mulf %136, %135 : vector<8x384xf32>
    %cst_36 = arith.constant 5.000000e-01 : f32
    %138 = vector.broadcast %cst_36 : f32 to vector<8x384xf32>
    %139 = arith.addf %137, %138 : vector<8x384xf32>
    %140 = vector.extract_strided_slice %133 {offsets = [0, 384], sizes = [8, 128], strides = [1, 1]} : vector<8x512xf32> to vector<8x128xf32>
    %141 = math.tanh %140 : vector<8x128xf32>
    %142 = vector.extract_strided_slice %139 {offsets = [0, 0], sizes = [8, 128], strides = [1, 1]} : vector<8x384xf32> to vector<8x128xf32>
    %143 = vector.extract_strided_slice %139 {offsets = [0, 128], sizes = [8, 128], strides = [1, 1]} : vector<8x384xf32> to vector<8x128xf32>
    %144 = vector.extract_strided_slice %139 {offsets = [0, 256], sizes = [8, 128], strides = [1, 1]} : vector<8x384xf32> to vector<8x128xf32>
    %145 = arith.mulf %143, %101 : vector<8x128xf32>
    %146 = arith.mulf %142, %141 : vector<8x128xf32>
    %147 = arith.addf %145, %146 : vector<8x128xf32>
    %148 = math.tanh %147 : vector<8x128xf32>
    %149 = arith.mulf %144, %148 : vector<8x128xf32>
    %c3_i32 = arith.constant 3 : i32
    %150 = arith.index_cast %c3_i32 : i32 to index
    %c0_37 = arith.constant 0 : index
    %c0_38 = arith.constant 0 : index
    %151 = vector.load %arg1[%150, %c0_37, %c0_38] : memref<8x8x1xf32, #tpu.memory_space<vmem>>, vector<1x8x1xf32>
    %152 = vector.shape_cast %151 : vector<1x8x1xf32> to vector<8x1xf32>
    %153 = vector.broadcast %152 : vector<8x1xf32> to vector<8x512xf32>
    %154 = vector.broadcast %0 : vector<1x512xf32> to vector<8x512xf32>
    %155 = arith.mulf %153, %154 : vector<8x512xf32>
    %156 = arith.addf %155, %3 : vector<8x512xf32>
    %157 = arith.truncf %129 : vector<8x128xf32> to vector<8x128xbf16>
    %cst_39 = arith.constant dense<0.000000e+00> : vector<8x512xf32>
    %158 = tpu.matmul %157, %4, %cst_39 {dimension_numbers = #tpu.dot_dimension_numbers<[1], [0], [0], [1], [0, 0, 1, 1], [], []>} : vector<8x128xbf16>, vector<128x512xbf16>, vector<8x512xf32> -> vector<8x512xf32>
    %159 = arith.addf %156, %158 : vector<8x512xf32>
    %160 = vector.extract_strided_slice %159 {offsets = [0, 0], sizes = [8, 384], strides = [1, 1]} : vector<8x512xf32> to vector<8x384xf32>
    %161 = math.tanh %160 : vector<8x384xf32>
    %cst_40 = arith.constant 5.000000e-01 : f32
    %162 = vector.broadcast %cst_40 : f32 to vector<8x384xf32>
    %163 = arith.mulf %162, %161 : vector<8x384xf32>
    %cst_41 = arith.constant 5.000000e-01 : f32
    %164 = vector.broadcast %cst_41 : f32 to vector<8x384xf32>
    %165 = arith.addf %163, %164 : vector<8x384xf32>
    %166 = vector.extract_strided_slice %159 {offsets = [0, 384], sizes = [8, 128], strides = [1, 1]} : vector<8x512xf32> to vector<8x128xf32>
    %167 = math.tanh %166 : vector<8x128xf32>
    %168 = vector.extract_strided_slice %165 {offsets = [0, 0], sizes = [8, 128], strides = [1, 1]} : vector<8x384xf32> to vector<8x128xf32>
    %169 = vector.extract_strided_slice %165 {offsets = [0, 128], sizes = [8, 128], strides = [1, 1]} : vector<8x384xf32> to vector<8x128xf32>
    %170 = vector.extract_strided_slice %165 {offsets = [0, 256], sizes = [8, 128], strides = [1, 1]} : vector<8x384xf32> to vector<8x128xf32>
    %171 = arith.mulf %169, %127 : vector<8x128xf32>
    %172 = arith.mulf %168, %167 : vector<8x128xf32>
    %173 = arith.addf %171, %172 : vector<8x128xf32>
    %174 = math.tanh %173 : vector<8x128xf32>
    %175 = arith.mulf %170, %174 : vector<8x128xf32>
    %176 = tpu.concatenate %175, %149 in 1 : vector<8x128xf32>, vector<8x128xf32> -> vector<8x256xf32>
    %177 = arith.truncf %176 : vector<8x256xf32> to vector<8x256xbf16>
    %cst_42 = arith.constant dense<0.000000e+00> : vector<8x512xf32>
    %178 = tpu.matmul %177, %5, %cst_42 {dimension_numbers = #tpu.dot_dimension_numbers<[1], [0], [0], [1], [0, 0, 1, 1], [], []>} : vector<8x256xbf16>, vector<256x512xbf16>, vector<8x512xf32> -> vector<8x512xf32>
    %179 = arith.addf %178, %8 : vector<8x512xf32>
    %180 = vector.extract_strided_slice %179 {offsets = [0, 0], sizes = [8, 384], strides = [1, 1]} : vector<8x512xf32> to vector<8x384xf32>
    %181 = math.tanh %180 : vector<8x384xf32>
    %cst_43 = arith.constant 5.000000e-01 : f32
    %182 = vector.broadcast %cst_43 : f32 to vector<8x384xf32>
    %183 = arith.mulf %182, %181 : vector<8x384xf32>
    %cst_44 = arith.constant 5.000000e-01 : f32
    %184 = vector.broadcast %cst_44 : f32 to vector<8x384xf32>
    %185 = arith.addf %183, %184 : vector<8x384xf32>
    %186 = vector.extract_strided_slice %179 {offsets = [0, 384], sizes = [8, 128], strides = [1, 1]} : vector<8x512xf32> to vector<8x128xf32>
    %187 = math.tanh %186 : vector<8x128xf32>
    %188 = vector.extract_strided_slice %185 {offsets = [0, 0], sizes = [8, 128], strides = [1, 1]} : vector<8x384xf32> to vector<8x128xf32>
    %189 = vector.extract_strided_slice %185 {offsets = [0, 128], sizes = [8, 128], strides = [1, 1]} : vector<8x384xf32> to vector<8x128xf32>
    %190 = vector.extract_strided_slice %185 {offsets = [0, 256], sizes = [8, 128], strides = [1, 1]} : vector<8x384xf32> to vector<8x128xf32>
    %191 = arith.mulf %189, %147 : vector<8x128xf32>
    %192 = arith.mulf %188, %187 : vector<8x128xf32>
    %193 = arith.addf %191, %192 : vector<8x128xf32>
    %194 = math.tanh %193 : vector<8x128xf32>
    %195 = arith.mulf %190, %194 : vector<8x128xf32>
    %c4_i32 = arith.constant 4 : i32
    %196 = arith.index_cast %c4_i32 : i32 to index
    %c0_45 = arith.constant 0 : index
    %c0_46 = arith.constant 0 : index
    %197 = vector.load %arg1[%196, %c0_45, %c0_46] : memref<8x8x1xf32, #tpu.memory_space<vmem>>, vector<1x8x1xf32>
    %198 = vector.shape_cast %197 : vector<1x8x1xf32> to vector<8x1xf32>
    %199 = vector.broadcast %198 : vector<8x1xf32> to vector<8x512xf32>
    %200 = vector.broadcast %0 : vector<1x512xf32> to vector<8x512xf32>
    %201 = arith.mulf %199, %200 : vector<8x512xf32>
    %202 = arith.addf %201, %3 : vector<8x512xf32>
    %203 = arith.truncf %175 : vector<8x128xf32> to vector<8x128xbf16>
    %cst_47 = arith.constant dense<0.000000e+00> : vector<8x512xf32>
    %204 = tpu.matmul %203, %4, %cst_47 {dimension_numbers = #tpu.dot_dimension_numbers<[1], [0], [0], [1], [0, 0, 1, 1], [], []>} : vector<8x128xbf16>, vector<128x512xbf16>, vector<8x512xf32> -> vector<8x512xf32>
    %205 = arith.addf %202, %204 : vector<8x512xf32>
    %206 = vector.extract_strided_slice %205 {offsets = [0, 0], sizes = [8, 384], strides = [1, 1]} : vector<8x512xf32> to vector<8x384xf32>
    %207 = math.tanh %206 : vector<8x384xf32>
    %cst_48 = arith.constant 5.000000e-01 : f32
    %208 = vector.broadcast %cst_48 : f32 to vector<8x384xf32>
    %209 = arith.mulf %208, %207 : vector<8x384xf32>
    %cst_49 = arith.constant 5.000000e-01 : f32
    %210 = vector.broadcast %cst_49 : f32 to vector<8x384xf32>
    %211 = arith.addf %209, %210 : vector<8x384xf32>
    %212 = vector.extract_strided_slice %205 {offsets = [0, 384], sizes = [8, 128], strides = [1, 1]} : vector<8x512xf32> to vector<8x128xf32>
    %213 = math.tanh %212 : vector<8x128xf32>
    %214 = vector.extract_strided_slice %211 {offsets = [0, 0], sizes = [8, 128], strides = [1, 1]} : vector<8x384xf32> to vector<8x128xf32>
    %215 = vector.extract_strided_slice %211 {offsets = [0, 128], sizes = [8, 128], strides = [1, 1]} : vector<8x384xf32> to vector<8x128xf32>
    %216 = vector.extract_strided_slice %211 {offsets = [0, 256], sizes = [8, 128], strides = [1, 1]} : vector<8x384xf32> to vector<8x128xf32>
    %217 = arith.mulf %215, %173 : vector<8x128xf32>
    %218 = arith.mulf %214, %213 : vector<8x128xf32>
    %219 = arith.addf %217, %218 : vector<8x128xf32>
    %220 = math.tanh %219 : vector<8x128xf32>
    %221 = arith.mulf %216, %220 : vector<8x128xf32>
    %222 = tpu.concatenate %221, %195 in 1 : vector<8x128xf32>, vector<8x128xf32> -> vector<8x256xf32>
    %223 = arith.truncf %222 : vector<8x256xf32> to vector<8x256xbf16>
    %cst_50 = arith.constant dense<0.000000e+00> : vector<8x512xf32>
    %224 = tpu.matmul %223, %5, %cst_50 {dimension_numbers = #tpu.dot_dimension_numbers<[1], [0], [0], [1], [0, 0, 1, 1], [], []>} : vector<8x256xbf16>, vector<256x512xbf16>, vector<8x512xf32> -> vector<8x512xf32>
    %225 = arith.addf %224, %8 : vector<8x512xf32>
    %226 = vector.extract_strided_slice %225 {offsets = [0, 0], sizes = [8, 384], strides = [1, 1]} : vector<8x512xf32> to vector<8x384xf32>
    %227 = math.tanh %226 : vector<8x384xf32>
    %cst_51 = arith.constant 5.000000e-01 : f32
    %228 = vector.broadcast %cst_51 : f32 to vector<8x384xf32>
    %229 = arith.mulf %228, %227 : vector<8x384xf32>
    %cst_52 = arith.constant 5.000000e-01 : f32
    %230 = vector.broadcast %cst_52 : f32 to vector<8x384xf32>
    %231 = arith.addf %229, %230 : vector<8x384xf32>
    %232 = vector.extract_strided_slice %225 {offsets = [0, 384], sizes = [8, 128], strides = [1, 1]} : vector<8x512xf32> to vector<8x128xf32>
    %233 = math.tanh %232 : vector<8x128xf32>
    %234 = vector.extract_strided_slice %231 {offsets = [0, 0], sizes = [8, 128], strides = [1, 1]} : vector<8x384xf32> to vector<8x128xf32>
    %235 = vector.extract_strided_slice %231 {offsets = [0, 128], sizes = [8, 128], strides = [1, 1]} : vector<8x384xf32> to vector<8x128xf32>
    %236 = vector.extract_strided_slice %231 {offsets = [0, 256], sizes = [8, 128], strides = [1, 1]} : vector<8x384xf32> to vector<8x128xf32>
    %237 = arith.mulf %235, %193 : vector<8x128xf32>
    %238 = arith.mulf %234, %233 : vector<8x128xf32>
    %239 = arith.addf %237, %238 : vector<8x128xf32>
    %240 = math.tanh %239 : vector<8x128xf32>
    %241 = arith.mulf %236, %240 : vector<8x128xf32>
    %c5_i32 = arith.constant 5 : i32
    %242 = arith.index_cast %c5_i32 : i32 to index
    %c0_53 = arith.constant 0 : index
    %c0_54 = arith.constant 0 : index
    %243 = vector.load %arg1[%242, %c0_53, %c0_54] : memref<8x8x1xf32, #tpu.memory_space<vmem>>, vector<1x8x1xf32>
    %244 = vector.shape_cast %243 : vector<1x8x1xf32> to vector<8x1xf32>
    %245 = vector.broadcast %244 : vector<8x1xf32> to vector<8x512xf32>
    %246 = vector.broadcast %0 : vector<1x512xf32> to vector<8x512xf32>
    %247 = arith.mulf %245, %246 : vector<8x512xf32>
    %248 = arith.addf %247, %3 : vector<8x512xf32>
    %249 = arith.truncf %221 : vector<8x128xf32> to vector<8x128xbf16>
    %cst_55 = arith.constant dense<0.000000e+00> : vector<8x512xf32>
    %250 = tpu.matmul %249, %4, %cst_55 {dimension_numbers = #tpu.dot_dimension_numbers<[1], [0], [0], [1], [0, 0, 1, 1], [], []>} : vector<8x128xbf16>, vector<128x512xbf16>, vector<8x512xf32> -> vector<8x512xf32>
    %251 = arith.addf %248, %250 : vector<8x512xf32>
    %252 = vector.extract_strided_slice %251 {offsets = [0, 0], sizes = [8, 384], strides = [1, 1]} : vector<8x512xf32> to vector<8x384xf32>
    %253 = math.tanh %252 : vector<8x384xf32>
    %cst_56 = arith.constant 5.000000e-01 : f32
    %254 = vector.broadcast %cst_56 : f32 to vector<8x384xf32>
    %255 = arith.mulf %254, %253 : vector<8x384xf32>
    %cst_57 = arith.constant 5.000000e-01 : f32
    %256 = vector.broadcast %cst_57 : f32 to vector<8x384xf32>
    %257 = arith.addf %255, %256 : vector<8x384xf32>
    %258 = vector.extract_strided_slice %251 {offsets = [0, 384], sizes = [8, 128], strides = [1, 1]} : vector<8x512xf32> to vector<8x128xf32>
    %259 = math.tanh %258 : vector<8x128xf32>
    %260 = vector.extract_strided_slice %257 {offsets = [0, 0], sizes = [8, 128], strides = [1, 1]} : vector<8x384xf32> to vector<8x128xf32>
    %261 = vector.extract_strided_slice %257 {offsets = [0, 128], sizes = [8, 128], strides = [1, 1]} : vector<8x384xf32> to vector<8x128xf32>
    %262 = vector.extract_strided_slice %257 {offsets = [0, 256], sizes = [8, 128], strides = [1, 1]} : vector<8x384xf32> to vector<8x128xf32>
    %263 = arith.mulf %261, %219 : vector<8x128xf32>
    %264 = arith.mulf %260, %259 : vector<8x128xf32>
    %265 = arith.addf %263, %264 : vector<8x128xf32>
    %266 = math.tanh %265 : vector<8x128xf32>
    %267 = arith.mulf %262, %266 : vector<8x128xf32>
    %268 = tpu.concatenate %267, %241 in 1 : vector<8x128xf32>, vector<8x128xf32> -> vector<8x256xf32>
    %269 = arith.truncf %268 : vector<8x256xf32> to vector<8x256xbf16>
    %cst_58 = arith.constant dense<0.000000e+00> : vector<8x512xf32>
    %270 = tpu.matmul %269, %5, %cst_58 {dimension_numbers = #tpu.dot_dimension_numbers<[1], [0], [0], [1], [0, 0, 1, 1], [], []>} : vector<8x256xbf16>, vector<256x512xbf16>, vector<8x512xf32> -> vector<8x512xf32>
    %271 = arith.addf %270, %8 : vector<8x512xf32>
    %272 = vector.extract_strided_slice %271 {offsets = [0, 0], sizes = [8, 384], strides = [1, 1]} : vector<8x512xf32> to vector<8x384xf32>
    %273 = math.tanh %272 : vector<8x384xf32>
    %cst_59 = arith.constant 5.000000e-01 : f32
    %274 = vector.broadcast %cst_59 : f32 to vector<8x384xf32>
    %275 = arith.mulf %274, %273 : vector<8x384xf32>
    %cst_60 = arith.constant 5.000000e-01 : f32
    %276 = vector.broadcast %cst_60 : f32 to vector<8x384xf32>
    %277 = arith.addf %275, %276 : vector<8x384xf32>
    %278 = vector.extract_strided_slice %271 {offsets = [0, 384], sizes = [8, 128], strides = [1, 1]} : vector<8x512xf32> to vector<8x128xf32>
    %279 = math.tanh %278 : vector<8x128xf32>
    %280 = vector.extract_strided_slice %277 {offsets = [0, 0], sizes = [8, 128], strides = [1, 1]} : vector<8x384xf32> to vector<8x128xf32>
    %281 = vector.extract_strided_slice %277 {offsets = [0, 128], sizes = [8, 128], strides = [1, 1]} : vector<8x384xf32> to vector<8x128xf32>
    %282 = vector.extract_strided_slice %277 {offsets = [0, 256], sizes = [8, 128], strides = [1, 1]} : vector<8x384xf32> to vector<8x128xf32>
    %283 = arith.mulf %281, %239 : vector<8x128xf32>
    %284 = arith.mulf %280, %279 : vector<8x128xf32>
    %285 = arith.addf %283, %284 : vector<8x128xf32>
    %286 = math.tanh %285 : vector<8x128xf32>
    %287 = arith.mulf %282, %286 : vector<8x128xf32>
    %c6_i32 = arith.constant 6 : i32
    %288 = arith.index_cast %c6_i32 : i32 to index
    %c0_61 = arith.constant 0 : index
    %c0_62 = arith.constant 0 : index
    %289 = vector.load %arg1[%288, %c0_61, %c0_62] : memref<8x8x1xf32, #tpu.memory_space<vmem>>, vector<1x8x1xf32>
    %290 = vector.shape_cast %289 : vector<1x8x1xf32> to vector<8x1xf32>
    %291 = vector.broadcast %290 : vector<8x1xf32> to vector<8x512xf32>
    %292 = vector.broadcast %0 : vector<1x512xf32> to vector<8x512xf32>
    %293 = arith.mulf %291, %292 : vector<8x512xf32>
    %294 = arith.addf %293, %3 : vector<8x512xf32>
    %295 = arith.truncf %267 : vector<8x128xf32> to vector<8x128xbf16>
    %cst_63 = arith.constant dense<0.000000e+00> : vector<8x512xf32>
    %296 = tpu.matmul %295, %4, %cst_63 {dimension_numbers = #tpu.dot_dimension_numbers<[1], [0], [0], [1], [0, 0, 1, 1], [], []>} : vector<8x128xbf16>, vector<128x512xbf16>, vector<8x512xf32> -> vector<8x512xf32>
    %297 = arith.addf %294, %296 : vector<8x512xf32>
    %298 = vector.extract_strided_slice %297 {offsets = [0, 0], sizes = [8, 384], strides = [1, 1]} : vector<8x512xf32> to vector<8x384xf32>
    %299 = math.tanh %298 : vector<8x384xf32>
    %cst_64 = arith.constant 5.000000e-01 : f32
    %300 = vector.broadcast %cst_64 : f32 to vector<8x384xf32>
    %301 = arith.mulf %300, %299 : vector<8x384xf32>
    %cst_65 = arith.constant 5.000000e-01 : f32
    %302 = vector.broadcast %cst_65 : f32 to vector<8x384xf32>
    %303 = arith.addf %301, %302 : vector<8x384xf32>
    %304 = vector.extract_strided_slice %297 {offsets = [0, 384], sizes = [8, 128], strides = [1, 1]} : vector<8x512xf32> to vector<8x128xf32>
    %305 = math.tanh %304 : vector<8x128xf32>
    %306 = vector.extract_strided_slice %303 {offsets = [0, 0], sizes = [8, 128], strides = [1, 1]} : vector<8x384xf32> to vector<8x128xf32>
    %307 = vector.extract_strided_slice %303 {offsets = [0, 128], sizes = [8, 128], strides = [1, 1]} : vector<8x384xf32> to vector<8x128xf32>
    %308 = vector.extract_strided_slice %303 {offsets = [0, 256], sizes = [8, 128], strides = [1, 1]} : vector<8x384xf32> to vector<8x128xf32>
    %309 = arith.mulf %307, %265 : vector<8x128xf32>
    %310 = arith.mulf %306, %305 : vector<8x128xf32>
    %311 = arith.addf %309, %310 : vector<8x128xf32>
    %312 = math.tanh %311 : vector<8x128xf32>
    %313 = arith.mulf %308, %312 : vector<8x128xf32>
    %314 = tpu.concatenate %313, %287 in 1 : vector<8x128xf32>, vector<8x128xf32> -> vector<8x256xf32>
    %315 = arith.truncf %314 : vector<8x256xf32> to vector<8x256xbf16>
    %cst_66 = arith.constant dense<0.000000e+00> : vector<8x512xf32>
    %316 = tpu.matmul %315, %5, %cst_66 {dimension_numbers = #tpu.dot_dimension_numbers<[1], [0], [0], [1], [0, 0, 1, 1], [], []>} : vector<8x256xbf16>, vector<256x512xbf16>, vector<8x512xf32> -> vector<8x512xf32>
    %317 = arith.addf %316, %8 : vector<8x512xf32>
    %318 = vector.extract_strided_slice %317 {offsets = [0, 0], sizes = [8, 384], strides = [1, 1]} : vector<8x512xf32> to vector<8x384xf32>
    %319 = math.tanh %318 : vector<8x384xf32>
    %cst_67 = arith.constant 5.000000e-01 : f32
    %320 = vector.broadcast %cst_67 : f32 to vector<8x384xf32>
    %321 = arith.mulf %320, %319 : vector<8x384xf32>
    %cst_68 = arith.constant 5.000000e-01 : f32
    %322 = vector.broadcast %cst_68 : f32 to vector<8x384xf32>
    %323 = arith.addf %321, %322 : vector<8x384xf32>
    %324 = vector.extract_strided_slice %317 {offsets = [0, 384], sizes = [8, 128], strides = [1, 1]} : vector<8x512xf32> to vector<8x128xf32>
    %325 = math.tanh %324 : vector<8x128xf32>
    %326 = vector.extract_strided_slice %323 {offsets = [0, 0], sizes = [8, 128], strides = [1, 1]} : vector<8x384xf32> to vector<8x128xf32>
    %327 = vector.extract_strided_slice %323 {offsets = [0, 128], sizes = [8, 128], strides = [1, 1]} : vector<8x384xf32> to vector<8x128xf32>
    %328 = vector.extract_strided_slice %323 {offsets = [0, 256], sizes = [8, 128], strides = [1, 1]} : vector<8x384xf32> to vector<8x128xf32>
    %329 = arith.mulf %327, %285 : vector<8x128xf32>
    %330 = arith.mulf %326, %325 : vector<8x128xf32>
    %331 = arith.addf %329, %330 : vector<8x128xf32>
    %332 = math.tanh %331 : vector<8x128xf32>
    %333 = arith.mulf %328, %332 : vector<8x128xf32>
    %c7_i32 = arith.constant 7 : i32
    %334 = arith.index_cast %c7_i32 : i32 to index
    %c0_69 = arith.constant 0 : index
    %c0_70 = arith.constant 0 : index
    %335 = vector.load %arg1[%334, %c0_69, %c0_70] : memref<8x8x1xf32, #tpu.memory_space<vmem>>, vector<1x8x1xf32>
    %336 = vector.shape_cast %335 : vector<1x8x1xf32> to vector<8x1xf32>
    %337 = vector.broadcast %336 : vector<8x1xf32> to vector<8x512xf32>
    %338 = vector.broadcast %0 : vector<1x512xf32> to vector<8x512xf32>
    %339 = arith.mulf %337, %338 : vector<8x512xf32>
    %340 = arith.addf %339, %3 : vector<8x512xf32>
    %341 = arith.truncf %313 : vector<8x128xf32> to vector<8x128xbf16>
    %cst_71 = arith.constant dense<0.000000e+00> : vector<8x512xf32>
    %342 = tpu.matmul %341, %4, %cst_71 {dimension_numbers = #tpu.dot_dimension_numbers<[1], [0], [0], [1], [0, 0, 1, 1], [], []>} : vector<8x128xbf16>, vector<128x512xbf16>, vector<8x512xf32> -> vector<8x512xf32>
    %343 = arith.addf %340, %342 : vector<8x512xf32>
    %344 = vector.extract_strided_slice %343 {offsets = [0, 0], sizes = [8, 384], strides = [1, 1]} : vector<8x512xf32> to vector<8x384xf32>
    %345 = math.tanh %344 : vector<8x384xf32>
    %cst_72 = arith.constant 5.000000e-01 : f32
    %346 = vector.broadcast %cst_72 : f32 to vector<8x384xf32>
    %347 = arith.mulf %346, %345 : vector<8x384xf32>
    %cst_73 = arith.constant 5.000000e-01 : f32
    %348 = vector.broadcast %cst_73 : f32 to vector<8x384xf32>
    %349 = arith.addf %347, %348 : vector<8x384xf32>
    %350 = vector.extract_strided_slice %343 {offsets = [0, 384], sizes = [8, 128], strides = [1, 1]} : vector<8x512xf32> to vector<8x128xf32>
    %351 = math.tanh %350 : vector<8x128xf32>
    %352 = vector.extract_strided_slice %349 {offsets = [0, 0], sizes = [8, 128], strides = [1, 1]} : vector<8x384xf32> to vector<8x128xf32>
    %353 = vector.extract_strided_slice %349 {offsets = [0, 128], sizes = [8, 128], strides = [1, 1]} : vector<8x384xf32> to vector<8x128xf32>
    %354 = vector.extract_strided_slice %349 {offsets = [0, 256], sizes = [8, 128], strides = [1, 1]} : vector<8x384xf32> to vector<8x128xf32>
    %355 = arith.mulf %353, %311 : vector<8x128xf32>
    %356 = arith.mulf %352, %351 : vector<8x128xf32>
    %357 = arith.addf %355, %356 : vector<8x128xf32>
    %358 = math.tanh %357 : vector<8x128xf32>
    %359 = arith.mulf %354, %358 : vector<8x128xf32>
    %360 = tpu.concatenate %359, %333 in 1 : vector<8x128xf32>, vector<8x128xf32> -> vector<8x256xf32>
    %361 = arith.truncf %360 : vector<8x256xf32> to vector<8x256xbf16>
    %cst_74 = arith.constant dense<0.000000e+00> : vector<8x512xf32>
    %362 = tpu.matmul %361, %5, %cst_74 {dimension_numbers = #tpu.dot_dimension_numbers<[1], [0], [0], [1], [0, 0, 1, 1], [], []>} : vector<8x256xbf16>, vector<256x512xbf16>, vector<8x512xf32> -> vector<8x512xf32>
    %363 = arith.addf %362, %8 : vector<8x512xf32>
    %364 = vector.extract_strided_slice %363 {offsets = [0, 0], sizes = [8, 384], strides = [1, 1]} : vector<8x512xf32> to vector<8x384xf32>
    %365 = math.tanh %364 : vector<8x384xf32>
    %cst_75 = arith.constant 5.000000e-01 : f32
    %366 = vector.broadcast %cst_75 : f32 to vector<8x384xf32>
    %367 = arith.mulf %366, %365 : vector<8x384xf32>
    %cst_76 = arith.constant 5.000000e-01 : f32
    %368 = vector.broadcast %cst_76 : f32 to vector<8x384xf32>
    %369 = arith.addf %367, %368 : vector<8x384xf32>
    %370 = vector.extract_strided_slice %363 {offsets = [0, 384], sizes = [8, 128], strides = [1, 1]} : vector<8x512xf32> to vector<8x128xf32>
    %371 = math.tanh %370 : vector<8x128xf32>
    %372 = vector.extract_strided_slice %369 {offsets = [0, 0], sizes = [8, 128], strides = [1, 1]} : vector<8x384xf32> to vector<8x128xf32>
    %373 = vector.extract_strided_slice %369 {offsets = [0, 128], sizes = [8, 128], strides = [1, 1]} : vector<8x384xf32> to vector<8x128xf32>
    %374 = vector.extract_strided_slice %369 {offsets = [0, 256], sizes = [8, 128], strides = [1, 1]} : vector<8x384xf32> to vector<8x128xf32>
    %375 = arith.mulf %373, %331 : vector<8x128xf32>
    %376 = arith.mulf %372, %371 : vector<8x128xf32>
    %377 = arith.addf %375, %376 : vector<8x128xf32>
    %378 = math.tanh %377 : vector<8x128xf32>
    %379 = arith.mulf %374, %378 : vector<8x128xf32>
    %c8_i32 = arith.constant 8 : i32
    %380 = vector.broadcast %9 : vector<1x128xf32> to vector<8x128xf32>
    %381 = arith.mulf %379, %380 : vector<8x128xf32>
    %cst_77 = arith.constant dense<0.000000e+00> : vector<8xf32>
    %382 = vector.multi_reduction <add>, %381, %cst_77 [1] : vector<8x128xf32> to vector<8xf32>
    %383 = vector.shape_cast %382 : vector<8xf32> to vector<8x1xf32>
    %384 = vector.broadcast %10 : vector<1x1xf32> to vector<8x1xf32>
    %385 = arith.addf %383, %384 : vector<8x1xf32>
    %c0_78 = arith.constant 0 : index
    %c0_79 = arith.constant 0 : index
    %386 = vector.load %arg9[%c0_78, %c0_79] : memref<8x1xf32, #tpu.memory_space<vmem>>, vector<8x1xf32>
    tpu.vector_store %arg9[%c0_78, %c0_79], %385 {strides = array<i32>} : memref<8x1xf32, #tpu.memory_space<vmem>>, vector<8x1xf32>,
    return
  }
  func.func @transform_0(%arg0: i32) -> (i32, i32, i32) {
    %c0_i32 = arith.constant 0 : i32
    %c0_i32_0 = arith.constant 0 : i32
    %c0_i32_1 = arith.constant 0 : i32
    return %c0_i32, %arg0, %c0_i32_0 : i32, i32, i32
  }
  func.func @transform_1(%arg0: i32) -> (i32, i32) {
    %c0_i32 = arith.constant 0 : i32
    %c0_i32_0 = arith.constant 0 : i32
    %c0_i32_1 = arith.constant 0 : i32
    return %c0_i32, %c0_i32_0 : i32, i32
  }
  func.func @transform_2(%arg0: i32) -> (i32, i32) {
    %c0_i32 = arith.constant 0 : i32
    %c0_i32_0 = arith.constant 0 : i32
    %c0_i32_1 = arith.constant 0 : i32
    return %c0_i32, %c0_i32_0 : i32, i32
  }
  func.func @transform_3(%arg0: i32) -> (i32, i32) {
    %c0_i32 = arith.constant 0 : i32
    %c0_i32_0 = arith.constant 0 : i32
    %c0_i32_1 = arith.constant 0 : i32
    return %c0_i32, %c0_i32_0 : i32, i32
  }
  func.func @transform_4(%arg0: i32) -> (i32, i32) {
    %c0_i32 = arith.constant 0 : i32
    %c0_i32_0 = arith.constant 0 : i32
    %c0_i32_1 = arith.constant 0 : i32
    return %c0_i32, %c0_i32_0 : i32, i32
  }
  func.func @transform_5(%arg0: i32) -> (i32, i32) {
    %c0_i32 = arith.constant 0 : i32
    %c0_i32_0 = arith.constant 0 : i32
    %c0_i32_1 = arith.constant 0 : i32
    return %c0_i32, %c0_i32_0 : i32, i32
  }
  func.func @transform_6(%arg0: i32) -> (i32, i32) {
    %c0_i32 = arith.constant 0 : i32
    %c0_i32_0 = arith.constant 0 : i32
    %c0_i32_1 = arith.constant 0 : i32
    return %c0_i32, %c0_i32_0 : i32, i32
  }
  func.func @transform_7(%arg0: i32) -> (i32, i32) {
    %c0_i32 = arith.constant 0 : i32
    %c0_i32_0 = arith.constant 0 : i32
    %c0_i32_1 = arith.constant 0 : i32
    return %c0_i32, %c0_i32_0 : i32, i32
  }
  func.func @transform_8(%arg0: i32) -> (i32, i32) {
    %c0_i32 = arith.constant 0 : i32
    %c0_i32_0 = arith.constant 0 : i32
    return %arg0, %c0_i32 : i32, i32
  }
}

</mosaic_0001>

<bundles_post_ra>
// kernel: tpu_custom_call.1
= control target key start
LH: loop header
LB: loop body
LE: loop exit
PB: predicated region body
PF: predicated region fallthrough
CT: control target
= control target key end

     0   :  { %s4297_s0 = inlined_call_operand.vmem [shape: f32[8,8,1], index: 0, kind: input, shape index: {}]   ;;  %s4298_s1 = inlined_call_operand.vmem [shape: f32[1,512], index: 1, kind: input, shape index: {}]   ;;  %s4299_s2 = inlined_call_operand.vmem [shape: f32[1,512], index: 2, kind: input, shape index: {}]   ;;  %s4300_s3 = inlined_call_operand.hbm [shape: bf16[128,512], index: 3, kind: input, shape index: {}]   ;;  %s4301_s4 = inlined_call_operand.hbm [shape: bf16[256,512], index: 4, kind: input, shape index: {}]   ;;  %s4302_s5 = inlined_call_operand.vmem [shape: f32[1,512], index: 5, kind: input, shape index: {}]   ;;  %s4303_s6 = inlined_call_operand.vmem [shape: f32[1,128], index: 6, kind: input, shape index: {}]   ;;  %s4304_s7 = inlined_call_operand.<no memory space> [shape: f32[1,1], index: 7, kind: input, shape index: {}]   ;;  %s4305_s8 = inlined_call_operand.vmem [shape: f32[8,1], index: 8, kind: output, shape index: {}]  }
   0x1   :  { %v13_v0 = vstv %s4304_s7 }
   0x2   :  { %14 = vst [vmem:[#allocation2] sm:$0x1] %v13_v0 }
   0x3   :  { %15 = vsyncpa [#allocation4], 0  ;;  %s27_s9 = sshll.u32 %s4300_s3, 4  ;;  %s28_s9 = int_to_ptr.hbm [resolvable:$true] %s27_s9 }
   0x4   :  { %16 = vsyncpa [#allocation6], 0  ;;  %s3055_s10 = smov [#allocation3]   ;;  %s40_s14 = sshll.u32 %s4301_s4, 4  ;;  %s41_s14 = int_to_ptr.hbm [resolvable:$true] %s40_s14 }
   0x5   :  { %s29_s11 = sshll.u32 %s3055_s10, 4  ;;  %s3056_s15 = smov 256   ;;  %s30_s11 = int_to_ptr.vmem [resolvable:$true] %s29_s11 }
   0x6   :  { %s3057_s16 = smov 16   ;;  %s3058_s7 = smov [#allocation5]  }
   0x7   :  { %35 = dma.hbm_to_vmem [thread:$0]  %s28_s9, 4096, %s30_s11, [#allocation4], %s3056_s15, %s3056_s15, %s3057_s16  }
   0x8   :  { %s42_s17 = sshll.u32 %s3058_s7, 4  ;;  %s43_s17 = int_to_ptr.vmem [resolvable:$true] %s42_s17 }
   0x9   :  { %48 = dma.hbm_to_vmem [thread:$0]  %s41_s14, 8192, %s43_s17, [#allocation6], %s3056_s15, %s3056_s15, %s3057_s16  }
   0xa   :  { %3051 = dma.done.wait [#allocation4], 4096  }
   0xb   :  { %3052 = vsyncadd [#allocation4], 4294963200 }
   0xc   :  { %3053 = dma.done.wait [#allocation6], 8192  }
   0xd   :  { %3054 = vsyncadd [#allocation6], 4294959104  ;;  %v3059_v1 = vmov 0   ;;  %v2459_v2 = vld [vmem:[#allocation3 + $0xe0] sm:$0xf]  ;;  %vm2337_vm0 = vcmask 7168  }
   0xe   :  { %2838 = vset.pattern.permute.xlu0 %v3059_v1  ;;  %2839 = vset.pattern.permute.xlu1 %v3059_v1  ;;  %v2766_v3 = vld [vmem:[#allocation3 + $0xec] sm:$0xf0]  ;;  %v2764_v4 = vld [vmem:[#allocation3 + $0xe4] sm:$0xf]  ;;  %v2461_v6 = vld [vmem:[#allocation3 + $0xf0] sm:$0xf0] }
   0xf   :  { %2840 = vset.pattern.permute.xlu2 %v3059_v1  ;;  %v3118_v5 = vor.u32 %v2766_v3, %v2459_v2  ;;  %v2467_v7 = vld [vmem:[#allocation3 + $0xe8] sm:$0xf]  ;;  %v2767_v8 = vld [vmem:[#allocation3 + $0xf4] sm:$0xf0]  ;;  %v3120_v9 = vor.u32 %v2764_v4, %v2461_v6  ;;  %v2765_v11 = vld [vmem:[#allocation3 + $0xec] sm:$0xf] }
  0x10   :  { %v3122_v10 = vor.u32 %v2767_v8, %v2467_v7  ;;  %v2469_v12 = vld [vmem:[#allocation3 + $0xf8] sm:$0xf0]  ;;  %v2443_v13 = vld [vmem:[#allocation3 + $0xc0] sm:$0xf]  ;;  %v2762_v15 = vld [vmem:[#allocation3 + $0xcc] sm:$0xf0] }
  0x11   :  { %4518 = vst [vmem:[#allocation9_spill] sm:$0xff] %v3120_v9  ;;  %366 = vmatpush.bf16.msra.mxu0 %v3118_v5  ;;  %v3125_v14 = vor.u32 %v2765_v11, %v2469_v12  ;;  %v2760_v16 = vld [vmem:[#allocation3 + $0xc4] sm:$0xf]  ;;  %v2445_v17 = vld [vmem:[#allocation3 + $0xd0] sm:$0xf0]  ;;  %379 = vmatpush.bf16.msra.mxu1 %v3120_v9  ;;  %v3129_v18 = vor.u32 %v2762_v15, %v2443_v13 }
  0x12   :  { %392 = vmatpush.bf16.msra.mxu2 %v3122_v10  ;;  %v3131_v19 = vor.u32 %v2760_v16, %v2445_v17  ;;  %v2451_v20 = vld [vmem:[#allocation3 + $0xc8] sm:$0xf]  ;;  %v2763_v21 = vld [vmem:[#allocation3 + $0xd4] sm:$0xf0]  ;;  %v2761_v22 = vld [vmem:[#allocation3 + $0xcc] sm:$0xf] }
  0x13   :  { %4519 = vst [vmem:[#allocation10_spill] sm:$0xff] %v3125_v14  ;;  %405 = vmatpush.bf16.msra.mxu3 %v3125_v14  ;;  %v3134_v23 = vor.u32 %v2763_v21, %v2451_v20  ;;  %v2453_v24 = vld [vmem:[#allocation3 + $0xd8] sm:$0xf0]  ;;  %v2427_v25 = vld [vmem:[#allocation3 + $0xa0] sm:$0xf] }
  0x14   :  { %4520 = vst [vmem:[#allocation11_spill] sm:$0xff] %v3131_v19  ;;  %v2758_v26 = vld [vmem:[#allocation3 + $0xac] sm:$0xf0]  ;;  %v3136_v27 = vor.u32 %v2761_v22, %v2453_v24  ;;  %v2756_v28 = vld [vmem:[#allocation3 + $0xa4] sm:$0xf] }
  0x15   :  { %v2429_v29 = vld [vmem:[#allocation3 + $0xb0] sm:$0xf0]  ;;  %v2435_v30 = vld [vmem:[#allocation3 + $0xa8] sm:$0xf]  ;;  %367 = vmatpush.bf16.msra.mxu0 %v3129_v18  ;;  %v3139_v31 = vor.u32 %v2758_v26, %v2427_v25  ;;  %v2759_v32 = vld [vmem:[#allocation3 + $0xb4] sm:$0xf0]  ;;  %380 = vmatpush.bf16.msra.mxu1 %v3131_v19 }
  0x16   :  { %4521 = vst [vmem:[#allocation12_spill] sm:$0xff] %v3136_v27  ;;  %v2757_v33 = vld [vmem:[#allocation3 + $0xac] sm:$0xf]  ;;  %v2437_v34 = vld [vmem:[#allocation3 + $0xb8] sm:$0xf0]  ;;  %393 = vmatpush.bf16.msra.mxu2 %v3134_v23  ;;  %v3143_v35 = vor.u32 %v2756_v28, %v2429_v29  ;;  %v3145_v36 = vor.u32 %v2759_v32, %v2435_v30 }
  0x17   :  { %v2411_v37 = vld [vmem:[#allocation3 + $0x80] sm:$0xf]  ;;  %v2754_v38 = vld [vmem:[#allocation3 + $0x8c] sm:$0xf0]  ;;  %v2752_v39 = vld [vmem:[#allocation3 + $0x84] sm:$0xf]  ;;  %406 = vmatpush.bf16.msra.mxu3 %v3136_v27  ;;  %v3148_v40 = vor.u32 %v2757_v33, %v2437_v34 }
  0x18   :  { %4522 = vst [vmem:[#allocation13_spill] sm:$0xff] %v3143_v35  ;;  %v2413_v41 = vld [vmem:[#allocation3 + $0x90] sm:$0xf0]  ;;  %v2419_v42 = vld [vmem:[#allocation3 + $0x88] sm:$0xf]  ;;  %v3151_v46 = vor.u32 %v2754_v38, %v2411_v37  ;;  %v183_v0 = vld [vmem:[%s4297_s0] sm:$0xff] }
  0x19   :  { %4523 = vst [vmem:[#allocation14_spill] sm:$0xff] %v3148_v40  ;;  %v2755_v43 = vld [vmem:[#allocation3 + $0x94] sm:$0xf0]  ;;  %v2753_v44 = vld [vmem:[#allocation3 + $0x8c] sm:$0xf]  ;;  %368 = vmatpush.bf16.msra.mxu0 %v3139_v31  ;;  %381 = vmatpush.bf16.msra.mxu1 %v3143_v35  ;;  %v3155_v47 = vor.u32 %v2752_v39, %v2413_v41 }
  0x1a   :  { %v2421_v45 = vld [vmem:[#allocation3 + $0x98] sm:$0xf0]  ;;  %394 = vmatpush.bf16.msra.mxu2 %v3145_v36  ;;  %v3157_v48 = vor.u32 %v2755_v43, %v2419_v42  ;;  %v2395_v49 = vld [vmem:[#allocation3 + $0x60] sm:$0xf]  ;;  %v2750_v50 = vld [vmem:[#allocation3 + $0x6c] sm:$0xf0]  ;;  %186 = vperm.xlu0 %2838, %v183_v0  }
  0x1b   :  { %4524 = vst [vmem:[#allocation15_spill] sm:$0xff] %v3155_v47  ;;  %v2748_v51 = vld [vmem:[#allocation3 + $0x64] sm:$0xf]  ;;  %407 = vmatpush.bf16.msra.mxu3 %v3148_v40  ;;  %v3160_v52 = vor.u32 %v2753_v44, %v2421_v45  ;;  %v2397_v53 = vld [vmem:[#allocation3 + $0x70] sm:$0xf0]  ;;  %v3163_v58 = vor.u32 %v2750_v50, %v2395_v49 }
  0x1c   :  { %v2403_v54 = vld [vmem:[#allocation3 + $0x68] sm:$0xf]  ;;  %v2751_v55 = vld [vmem:[#allocation3 + $0x74] sm:$0xf0]  ;;  %v2749_v56 = vld [vmem:[#allocation3 + $0x6c] sm:$0xf]  ;;  %v3167_v60 = vor.u32 %v2748_v51, %v2397_v53 }
  0x1d   :  { %4525 = vst [vmem:[#allocation16_spill] sm:$0xff] %v3160_v52  ;;  %v2405_v57 = vld [vmem:[#allocation3 + $0x78] sm:$0xf0]  ;;  %369 = vmatpush.bf16.msra.mxu0 %v3151_v46  ;;  %v2379_v59 = vld [vmem:[#allocation3 + $0x40] sm:$0xf]  ;;  %382 = vmatpush.bf16.msra.mxu1 %v3155_v47  ;;  %v3169_v61 = vor.u32 %v2751_v55, %v2403_v54  ;;  %v2729_v28 = vld [vmem:[%s4297_s0 + $0x8] sm:$0xff] }
  0x1e   :  { %4526 = vst [vmem:[#allocation17_spill] sm:$0xff] %v3163_v58  ;;  %395 = vmatpush.bf16.msra.mxu2 %v3157_v48  ;;  %v2746_v62 = vld [vmem:[#allocation3 + $0x4c] sm:$0xf0]  ;;  %v2744_v63 = vld [vmem:[#allocation3 + $0x44] sm:$0xf]  ;;  %v3175_v2 = vor.u32 %v2749_v56, %v2405_v57 }
  0x1f   :  { %4527 = vst [vmem:[#allocation18_spill] sm:$0xff] %v3167_v60  ;;  %408 = vmatpush.bf16.msra.mxu3 %v3160_v52  ;;  %v2381_v3 = vld [vmem:[#allocation3 + $0x50] sm:$0xf0]  ;;  %v2387_v4 = vld [vmem:[#allocation3 + $0x48] sm:$0xf]  ;;  %v3178_v11 = vor.u32 %v2746_v62, %v2379_v59 }
  0x20   :  { %4528 = vst [vmem:[#allocation19_spill] sm:$0xff] %v3169_v61  ;;  %v2747_v6 = vld [vmem:[#allocation3 + $0x54] sm:$0xf0]  ;;  %v2745_v7 = vld [vmem:[#allocation3 + $0x4c] sm:$0xf]  ;;  %v3182_v12 = vor.u32 %v2744_v63, %v2381_v3 }
  0x21   :  { %4529 = vst [vmem:[#allocation20_spill] sm:$0xff] %v3175_v2  ;;  %v2389_v8 = vld [vmem:[#allocation3 + $0x58] sm:$0xf0]  ;;  %370 = vmatpush.bf16.msra.mxu0 %v3163_v58  ;;  %383 = vmatpush.bf16.msra.mxu1 %v3167_v60  ;;  %v3184_v13 = vor.u32 %v2747_v6, %v2387_v4  ;;  %v2363_v15 = vld [vmem:[#allocation3 + $0x20] sm:$0xf]  ;;  %v2734_v55 = vld [vmem:[%s4297_s0 + $0x30] sm:$0xff] }
  0x22   :  { %4530 = vst [vmem:[#allocation21_spill] sm:$0xff] %v3178_v11  ;;  %396 = vmatpush.bf16.msra.mxu2 %v3169_v61  ;;  %v2742_v16 = vld [vmem:[#allocation3 + $0x2c] sm:$0xf0]  ;;  %v2740_v17 = vld [vmem:[#allocation3 + $0x24] sm:$0xf]  ;;  %v3187_v20 = vor.u32 %v2745_v7, %v2389_v8  ;;  %882 = vperm.xlu0 %2838, %v2729_v28  }
  0x23   :  { %4531 = vst [vmem:[#allocation22_spill] sm:$0xff] %v3182_v12  ;;  %409 = vmatpush.bf16.msra.mxu3 %v3175_v2  ;;  %v2365_v21 = vld [vmem:[#allocation3 + $0x30] sm:$0xf0]  ;;  %v2371_v22 = vld [vmem:[#allocation3 + $0x28] sm:$0xf]  ;;  %v3193_v29 = vor.u32 %v2742_v16, %v2363_v15 }
  0x24   :  { %4532 = vst [vmem:[#allocation23_spill] sm:$0xff] %v3184_v13  ;;  %v2743_v24 = vld [vmem:[#allocation3 + $0x34] sm:$0xf0]  ;;  %v2741_v25 = vld [vmem:[#allocation3 + $0x2c] sm:$0xf]  ;;  %v3197_v30 = vor.u32 %v2740_v17, %v2365_v21 }
  0x25   :  { %4533 = vst [vmem:[#allocation24_spill] sm:$0xff] %v3187_v20  ;;  %v2373_v26 = vld [vmem:[#allocation3 + $0x38] sm:$0xf0]  ;;  %371 = vmatpush.bf16.msra.mxu0 %v3178_v11  ;;  %384 = vmatpush.bf16.msra.mxu1 %v3182_v12  ;;  %v3199_v32 = vor.u32 %v2743_v24, %v2371_v22  ;;  %v2347_v33 = vld [vmem:[#allocation3] sm:$0xf] }
  0x26   :  { %4534 = vst [vmem:[#allocation25_spill] sm:$0xff] %v3193_v29  ;;  %397 = vmatpush.bf16.msra.mxu2 %v3184_v13  ;;  %v2738_v34 = vld [vmem:[#allocation3 + $0xc] sm:$0xf0]  ;;  %v2736_v37 = vld [vmem:[#allocation3 + $0x4] sm:$0xf]  ;;  %v3202_v38 = vor.u32 %v2741_v25, %v2373_v26 }
  0x27   :  { %4535 = vst [vmem:[#allocation26_spill] sm:$0xff] %v3197_v30  ;;  %410 = vmatpush.bf16.msra.mxu3 %v3187_v20  ;;  %v2349_v39 = vld [vmem:[#allocation3 + $0x10] sm:$0xf0]  ;;  %v2355_v41 = vld [vmem:[#allocation3 + $0x8] sm:$0xf]  ;;  %v3205_v45 = vor.u32 %v2738_v34, %v2347_v33 }
  0x28   :  { %4536 = vst [vmem:[#allocation27_spill] sm:$0xff] %v3199_v32  ;;  %v2739_v42 = vld [vmem:[#allocation3 + $0x14] sm:$0xf0]  ;;  %v2737_v43 = vld [vmem:[#allocation3 + $0xc] sm:$0xf]  ;;  %v3209_v51 = vor.u32 %v2736_v37, %v2349_v39 }
  0x29   :  { %4537 = vst [vmem:[#allocation28_spill] sm:$0xff] %v3202_v38  ;;  %v2357_v44 = vld [vmem:[#allocation3 + $0x18] sm:$0xf0]  ;;  %372 = vmatpush.bf16.msra.mxu0 %v3193_v29  ;;  %v2715_v49 = vld [vmem:[#allocation5 + $0x1e0] sm:$0xf]  ;;  %385 = vmatpush.bf16.msra.mxu1 %v3197_v30  ;;  %v3211_v53 = vor.u32 %v2739_v42, %v2355_v41 }
  0x2a   :  { %4538 = vst [vmem:[#allocation29_spill] sm:$0xff] %v3205_v45  ;;  %v2830_v50 = vld [vmem:[#allocation5 + $0x1ec] sm:$0xf0]  ;;  %398 = vmatpush.bf16.msra.mxu2 %v3199_v32  ;;  %v3214_v54 = vor.u32 %v2737_v43, %v2357_v44  ;;  %v2828_v57 = vld [vmem:[#allocation5 + $0x1e4] sm:$0xf]  ;;  %1917 = vperm.xlu0 %2838, %v2734_v55  }
  0x2b   :  { %4539 = vst [vmem:[#allocation30_spill] sm:$0xff] %v3209_v51  ;;  %411 = vmatpush.bf16.msra.mxu3 %v3202_v38  ;;  %v3219_v56 = vor.u32 %v2830_v50, %v2715_v49  ;;  %v2717_v59 = vld [vmem:[#allocation5 + $0x1f0] sm:$0xf0]  ;;  %v2699_v62 = vld [vmem:[#allocation5 + $0x1c0] sm:$0xf] }
  0x2c   :  { %4540 = vst [vmem:[#allocation31_spill] sm:$0xff] %v3211_v53  ;;  %v2826_v63 = vld [vmem:[#allocation5 + $0x1cc] sm:$0xf0]  ;;  %v3225_v0 = vor.u32 %v2828_v57, %v2717_v59  ;;  %v2824_v3 = vld [vmem:[#allocation5 + $0x1c4] sm:$0xf] }
  0x2d   :  { %4541 = vst [vmem:[#allocation32_spill] sm:$0xff] %v3214_v54  ;;  %373 = vmatpush.bf16.msra.mxu0 %v3205_v45  ;;  %386 = vmatpush.bf16.msra.mxu1 %v3209_v51  ;;  %v2701_v4 = vld [vmem:[#allocation5 + $0x1d0] sm:$0xf0]  ;;  %v3229_v6 = vor.u32 %v2826_v63, %v2699_v62  ;;  %v2683_v7 = vld [vmem:[#allocation5 + $0x1a0] sm:$0xf] }
  0x2e   :  { %4542 = vst [vmem:[#allocation33_spill] sm:$0xff] %v3219_v56  ;;  %399 = vmatpush.bf16.msra.mxu2 %v3211_v53  ;;  %v2587_v8 = vld [vmem:[#allocation5 + $0xe0] sm:$0xf]  ;;  %v2798_v15 = vld [vmem:[#allocation5 + $0xec] sm:$0xf0]  ;;  %v3239_v26 = vor.u32 %v2824_v3, %v2701_v4 }
  0x2f   :  { %412 = vmatpush.bf16.msra.mxu3 %v3214_v54  ;;  %4543 = vst [vmem:[#allocation34_spill] sm:$0xff] %v3225_v0  ;;  %v2822_v16 = vld [vmem:[#allocation5 + $0x1ac] sm:$0xf0]  ;;  %v3233_v17 = vor.u32 %v2798_v15, %v2587_v8  ;;  %v2796_v21 = vld [vmem:[#allocation5 + $0xe4] sm:$0xf] }
  0x30   :  { %374 = vmatmul.bf16.vlgmr.msra.gmra.mxu0 %v3059_v1  ;;  %4544 = vst [vmem:[#allocation35_spill] sm:$0xff] %v3229_v6  ;;  %387 = vmatmul.bf16.vlgmr.msra.gmra.mxu1 %v3059_v1  ;;  %v2589_v22 = vld [vmem:[#allocation5 + $0xf0] sm:$0xf0]  ;;  %v2820_v24 = vld [vmem:[#allocation5 + $0x1a4] sm:$0xf]  ;;  %v3243_v33 = vor.u32 %v2822_v16, %v2683_v7 }
  0x31   :  { %772 = vmatpush.bf16.msrb.mxu1 %v3219_v56  ;;  %400 = vmatmul.bf16.vlgmr.msra.gmra.mxu2 %v3059_v1  ;;  %4545 = vst [vmem:[#allocation36_spill] sm:$0xff] %v3233_v17  ;;  %v3236_v25 = vor.u32 %v2796_v21, %v2589_v22  ;;  %v2685_v28 = vld [vmem:[#allocation5 + $0x1b0] sm:$0xf0]  ;;  %v2571_v34 = vld [vmem:[#allocation5 + $0xc0] sm:$0xf] }
  0x32   :  { %413 = vmatmul.bf16.vlgmr.msra.gmra.mxu3 %v3059_v1  ;;  %4547 = vst [vmem:[#allocation38_spill] sm:$0xff] %v3239_v26  ;;  %759 = vmatpush.bf16.msrb.mxu0 %v3233_v17  ;;  %v2794_v37 = vld [vmem:[#allocation5 + $0xcc] sm:$0xf0]  ;;  %v2792_v39 = vld [vmem:[#allocation5 + $0xc4] sm:$0xf]  ;;  %v3251_v49 = vor.u32 %v2820_v24, %v2685_v28 }
  0x33   :  { %4546 = vst [vmem:[#allocation37_spill] sm:$0xff] %v3236_v25  ;;  %798 = vmatpush.bf16.msrb.mxu3 %v3225_v0  ;;  %785 = vmatpush.bf16.msrb.mxu2 %v3236_v25  ;;  %v2667_v1 = vld [vmem:[#allocation5 + $0x180] sm:$0xf]  ;;  %v2818_v41 = vld [vmem:[#allocation5 + $0x18c] sm:$0xf0]  ;;  %v3246_v42 = vor.u32 %v2794_v37, %v2571_v34 }
  0x34   :  { %4548 = vst [vmem:[#allocation39_spill] sm:$0xff] %v3243_v33  ;;  %v2573_v43 = vld [vmem:[#allocation5 + $0xd0] sm:$0xf0]  ;;  %v3255_v50 = vor.u32 %v2818_v41, %v2667_v1  ;;  %v2816_v55 = vld [vmem:[#allocation5 + $0x184] sm:$0xf] }
  0x35   :  { %773 = vmatpush.bf16.msrb.mxu1 %v3229_v6  ;;  %4549 = vst [vmem:[#allocation40_spill] sm:$0xff] %v3246_v42  ;;  %v3248_v44 = vor.u32 %v2792_v39, %v2573_v43  ;;  %v2669_v57 = vld [vmem:[#allocation5 + $0x190] sm:$0xf0]  ;;  %v2651_v59 = vld [vmem:[#allocation5 + $0x160] sm:$0xf] }
  0x36   :  { %4551 = vst [vmem:[#allocation42_spill] sm:$0xff] %v3251_v49  ;;  %760 = vmatpush.bf16.msrb.mxu0 %v3246_v42  ;;  %v2814_v62 = vld [vmem:[#allocation5 + $0x16c] sm:$0xf0]  ;;  %v3259_v63 = vor.u32 %v2816_v55, %v2669_v57  ;;  %v2812_v4 = vld [vmem:[#allocation5 + $0x164] sm:$0xf] }
  0x37   :  { %4550 = vst [vmem:[#allocation41_spill] sm:$0xff] %v3248_v44  ;;  %799 = vmatpush.bf16.msrb.mxu3 %v3239_v26  ;;  %786 = vmatpush.bf16.msrb.mxu2 %v3248_v44  ;;  %v3262_v3 = vor.u32 %v2814_v62, %v2651_v59  ;;  %v2653_v7 = vld [vmem:[#allocation5 + $0x170] sm:$0xf0]  ;;  %v2635_v8 = vld [vmem:[#allocation5 + $0x140] sm:$0xf] }
  0x38   :  { %4552 = vst [vmem:[#allocation43_spill] sm:$0xff] %v3255_v50  ;;  %v2810_v15 = vld [vmem:[#allocation5 + $0x14c] sm:$0xf0]  ;;  %v3265_v16 = vor.u32 %v2812_v4, %v2653_v7  ;;  %v2808_v22 = vld [vmem:[#allocation5 + $0x144] sm:$0xf] }
  0x39   :  { %774 = vmatpush.bf16.msrb.mxu1 %v3243_v33  ;;  %4553 = vst [vmem:[#allocation44_spill] sm:$0xff] %v3259_v63  ;;  %v3268_v21 = vor.u32 %v2810_v15, %v2635_v8  ;;  %v2637_v24 = vld [vmem:[#allocation5 + $0x150] sm:$0xf0]  ;;  %v2619_v28 = vld [vmem:[#allocation5 + $0x120] sm:$0xf] }
  0x3a   :  { %4554 = vst [vmem:[#allocation45_spill] sm:$0xff] %v3262_v3  ;;  %v2806_v34 = vld [vmem:[#allocation5 + $0x12c] sm:$0xf0]  ;;  %v3271_v37 = vor.u32 %v2808_v22, %v2637_v24  ;;  %v2804_v1 = vld [vmem:[#allocation5 + $0x124] sm:$0xf] }
  0x3b   :  { %800 = vmatpush.bf16.msrb.mxu3 %v3251_v49  ;;  %4555 = vst [vmem:[#allocation46_spill] sm:$0xff] %v3265_v16  ;;  %v3274_v39 = vor.u32 %v2806_v34, %v2619_v28  ;;  %v2621_v41 = vld [vmem:[#allocation5 + $0x130] sm:$0xf0]  ;;  %v2603_v43 = vld [vmem:[#allocation5 + $0x100] sm:$0xf] }
  0x3c   :  { %4556 = vst [vmem:[#allocation47_spill] sm:$0xff] %v3268_v21  ;;  %v2802_v55 = vld [vmem:[#allocation5 + $0x10c] sm:$0xf0]  ;;  %v2723_v57 = vld [vmem:[#allocation5 + $0x1e8] sm:$0xf]  ;;  %v3277_v62 = vor.u32 %v2804_v1, %v2621_v41 }
  0x3d   :  { %775 = vmatpush.bf16.msrb.mxu1 %v3255_v50  ;;  %4557 = vst [vmem:[#allocation48_spill] sm:$0xff] %v3271_v37  ;;  %v2831_v59 = vld [vmem:[#allocation5 + $0x1f4] sm:$0xf0]  ;;  %v3280_v4 = vor.u32 %v2802_v55, %v2603_v43  ;;  %v2800_v7 = vld [vmem:[#allocation5 + $0x104] sm:$0xf] }
  0x3e   :  { %4558 = vst [vmem:[#allocation49_spill] sm:$0xff] %v3274_v39  ;;  %v2605_v8 = vld [vmem:[#allocation5 + $0x110] sm:$0xf0]  ;;  %v3282_v15 = vor.u32 %v2831_v59, %v2723_v57  ;;  %v2829_v22 = vld [vmem:[#allocation5 + $0x1ec] sm:$0xf] }
  0x3f   :  { %801 = vmatpush.bf16.msrb.mxu3 %v3259_v63  ;;  %4559 = vst [vmem:[#allocation50_spill] sm:$0xff] %v3277_v62  ;;  %v2725_v24 = vld [vmem:[#allocation5 + $0x1f8] sm:$0xf0]  ;;  %v2707_v28 = vld [vmem:[#allocation5 + $0x1c8] sm:$0xf]  ;;  %v3285_v44 = vor.u32 %v2800_v7, %v2605_v8 }
  0x40   :  { %4560 = vst [vmem:[#allocation51_spill] sm:$0xff] %v3280_v4  ;;  %v2827_v34 = vld [vmem:[#allocation5 + $0x1d4] sm:$0xf0]  ;;  %v3288_v1 = vor.u32 %v2829_v22, %v2725_v24  ;;  %v2825_v43 = vld [vmem:[#allocation5 + $0x1cc] sm:$0xf] }
  0x41   :  { %776 = vmatpush.bf16.msrb.mxu1 %v3262_v3  ;;  %4561 = vst [vmem:[#allocation52_spill] sm:$0xff] %v3282_v15  ;;  %v3291_v41 = vor.u32 %v2827_v34, %v2707_v28  ;;  %v2709_v55 = vld [vmem:[#allocation5 + $0x1d8] sm:$0xf0]  ;;  %v2691_v57 = vld [vmem:[#allocation5 + $0x1a8] sm:$0xf] }
  0x42   :  { %4562 = vst [vmem:[#allocation53_spill] sm:$0xff] %v3285_v44  ;;  %v2823_v59 = vld [vmem:[#allocation5 + $0x1b4] sm:$0xf0]  ;;  %v3295_v42 = vor.u32 %v2825_v43, %v2709_v55  ;;  %v2821_v8 = vld [vmem:[#allocation5 + $0x1ac] sm:$0xf] }
  0x43   :  { %802 = vmatpush.bf16.msrb.mxu3 %v3265_v16  ;;  %4563 = vst [vmem:[#allocation54_spill] sm:$0xff] %v3288_v1  ;;  %v3298_v7 = vor.u32 %v2823_v59, %v2691_v57  ;;  %v2693_v22 = vld [vmem:[#allocation5 + $0x1b8] sm:$0xf0]  ;;  %v2555_v28 = vld [vmem:[#allocation5 + $0xa0] sm:$0xf] }
  0x44   :  { %4564 = vst [vmem:[#allocation55_spill] sm:$0xff] %v3291_v41  ;;  %v3301_v24 = vor.u32 %v2821_v8, %v2693_v22  ;;  %v2790_v34 = vld [vmem:[#allocation5 + $0xac] sm:$0xf0]  ;;  %v2788_v25 = vld [vmem:[#allocation5 + $0xa4] sm:$0xf] }
  0x45   :  { %777 = vmatpush.bf16.msrb.mxu1 %v3268_v21  ;;  %4565 = vst [vmem:[#allocation56_spill] sm:$0xff] %v3295_v42  ;;  %v3305_v17 = vor.u32 %v2790_v34, %v2555_v28  ;;  %v2557_v43 = vld [vmem:[#allocation5 + $0xb0] sm:$0xf0]  ;;  %v2675_v55 = vld [vmem:[#allocation5 + $0x188] sm:$0xf] }
  0x46   :  { %4566 = vst [vmem:[#allocation57_spill] sm:$0xff] %v3298_v7  ;;  %v2819_v53 = vld [vmem:[#allocation5 + $0x194] sm:$0xf0]  ;;  %v3307_v57 = vor.u32 %v2788_v25, %v2557_v43  ;;  %v2817_v45 = vld [vmem:[#allocation5 + $0x18c] sm:$0xf] }
  0x47   :  { %803 = vmatpush.bf16.msrb.mxu3 %v3271_v37  ;;  %4567 = vst [vmem:[#allocation58_spill] sm:$0xff] %v3301_v24  ;;  %v3309_v59 = vor.u32 %v2819_v53, %v2675_v55  ;;  %v2677_v32 = vld [vmem:[#allocation5 + $0x198] sm:$0xf0]  ;;  %v2539_v8 = vld [vmem:[#allocation5 + $0x80] sm:$0xf]  ;;  %761 = vmatpush.bf16.msrb.mxu0 %v3305_v17 }
  0x48   :  { %4568 = vst [vmem:[#allocation59_spill] sm:$0xff] %v3305_v17  ;;  %v3312_v22 = vor.u32 %v2817_v45, %v2677_v32  ;;  %v2786_v29 = vld [vmem:[#allocation5 + $0x8c] sm:$0xf0]  ;;  %v2784_v13 = vld [vmem:[#allocation5 + $0x84] sm:$0xf]  ;;  %787 = vmatpush.bf16.msrb.mxu2 %v3307_v57 }
  0x49   :  { %778 = vmatpush.bf16.msrb.mxu1 %v3274_v39  ;;  %4569 = vst [vmem:[#allocation60_spill] sm:$0xff] %v3307_v57  ;;  %v2541_v11 = vld [vmem:[#allocation5 + $0x90] sm:$0xf0]  ;;  %v3316_v28 = vor.u32 %v2786_v29, %v2539_v8  ;;  %v2659_v53 = vld [vmem:[#allocation5 + $0x168] sm:$0xf] }
  0x4a   :  { %4570 = vst [vmem:[#allocation61_spill] sm:$0xff] %v3309_v59  ;;  %v3318_v25 = vor.u32 %v2784_v13, %v2541_v11  ;;  %v2815_v34 = vld [vmem:[#allocation5 + $0x174] sm:$0xf0]  ;;  %v2813_v43 = vld [vmem:[#allocation5 + $0x16c] sm:$0xf] }
  0x4b   :  { %804 = vmatpush.bf16.msrb.mxu3 %v3277_v62  ;;  %4571 = vst [vmem:[#allocation62_spill] sm:$0xff] %v3312_v22  ;;  %v3321_v55 = vor.u32 %v2815_v34, %v2659_v53  ;;  %v2661_v32 = vld [vmem:[#allocation5 + $0x178] sm:$0xf0]  ;;  %762 = vmatpush.bf16.msrb.mxu0 %v3316_v28  ;;  %v2523_v29 = vld [vmem:[#allocation5 + $0x60] sm:$0xf] }
  0x4c   :  { %4572 = vst [vmem:[#allocation63_spill] sm:$0xff] %v3316_v28  ;;  %v3323_v45 = vor.u32 %v2813_v43, %v2661_v32  ;;  %788 = vmatpush.bf16.msrb.mxu2 %v3318_v25  ;;  %v2782_v8 = vld [vmem:[#allocation5 + $0x6c] sm:$0xf0]  ;;  %v2780_v11 = vld [vmem:[#allocation5 + $0x64] sm:$0xf] }
  0x4d   :  { %779 = vmatpush.bf16.msrb.mxu1 %v3280_v4  ;;  %4573 = vst [vmem:[#allocation64_spill] sm:$0xff] %v3318_v25  ;;  %v3329_v13 = vor.u32 %v2782_v8, %v2523_v29  ;;  %v2525_v57 = vld [vmem:[#allocation5 + $0x70] sm:$0xf0]  ;;  %v2643_v17 = vld [vmem:[#allocation5 + $0x148] sm:$0xf] }
  0x4e   :  { %4574 = vst [vmem:[#allocation65_spill] sm:$0xff] %v3321_v55  ;;  %v2811_v53 = vld [vmem:[#allocation5 + $0x154] sm:$0xf0]  ;;  %v3331_v34 = vor.u32 %v2780_v11, %v2525_v57  ;;  %v2809_v32 = vld [vmem:[#allocation5 + $0x14c] sm:$0xf] }
  0x4f   :  { %805 = vmatpush.bf16.msrb.mxu3 %v3285_v44  ;;  %4575 = vst [vmem:[#allocation66_spill] sm:$0xff] %v3323_v45  ;;  %v3333_v43 = vor.u32 %v2811_v53, %v2643_v17  ;;  %v2645_v28 = vld [vmem:[#allocation5 + $0x158] sm:$0xf0]  ;;  %v2507_v61 = vld [vmem:[#allocation5 + $0x40] sm:$0xf]  ;;  %763 = vmatpush.bf16.msrb.mxu0 %v3329_v13 }
  0x50   :  { %4576 = vst [vmem:[#allocation67_spill] sm:$0xff] %v3329_v13  ;;  %v3336_v25 = vor.u32 %v2809_v32, %v2645_v28  ;;  %v2776_v58 = vld [vmem:[#allocation5 + $0x44] sm:$0xf]  ;;  %789 = vmatpush.bf16.msrb.mxu2 %v3331_v34  ;;  %v2627_v17 = vld [vmem:[#allocation5 + $0x128] sm:$0xf] }
  0x51   :  { %824 = vmatpush.bf16.msra.mxu1 %v3282_v15  ;;  %4577 = vst [vmem:[#allocation68_spill] sm:$0xff] %v3331_v34  ;;  %v2807_v8 = vld [vmem:[#allocation5 + $0x134] sm:$0xf0]  ;;  %v2805_v11 = vld [vmem:[#allocation5 + $0x12c] sm:$0xf] }
  0x52   :  { %4578 = vst [vmem:[#allocation69_spill] sm:$0xff] %v3333_v43  ;;  %v3345_v53 = vor.u32 %v2807_v8, %v2627_v17  ;;  %v2629_v28 = vld [vmem:[#allocation5 + $0x138] sm:$0xf0]  ;;  %v2611_v17 = vld [vmem:[#allocation5 + $0x108] sm:$0xf] }
  0x53   :  { %850 = vmatpush.bf16.msra.mxu3 %v3288_v1  ;;  %4579 = vst [vmem:[#allocation70_spill] sm:$0xff] %v3336_v25  ;;  %v3347_v32 = vor.u32 %v2805_v11, %v2629_v28  ;;  %v2803_v8 = vld [vmem:[#allocation5 + $0x114] sm:$0xf0]  ;;  %v3060_v11 = vmov 0.0|0.0  }
  0x54   :  { %4582 = vst [vmem:[#allocation73_spill] sm:$0xff] %v3345_v53  ;;  %780 = vmatmul.bf16.vlgmr.msrb.gmra.mxu1 %v3060_v11  ;;  %806 = vmatmul.bf16.vlgmr.msrb.gmra.mxu3 %v3060_v11  ;;  %v3357_v28 = vor.u32 %v2803_v8, %v2611_v17  ;;  %v2477_v17 = vld [vmem:[#allocation5 + $0x10] sm:$0xf0]  ;;  %v2799_v8 = vld [vmem:[#allocation5 + $0xf4] sm:$0xf0] }
  0x55   :  { %825 = vmatpush.bf16.msra.mxu1 %v3291_v41  ;;  %4583 = vst [vmem:[#allocation74_spill] sm:$0xff] %v3347_v32 }
  0x56   :  { %4586 = vst [vmem:[#allocation77_spill] sm:$0xff] %v3357_v28 }
  0x57   :  { %851 = vmatpush.bf16.msra.mxu3 %v3295_v42 }
  0x59   :  { %826 = vmatpush.bf16.msra.mxu1 %v3298_v7 }
  0x5b   :  { %852 = vmatpush.bf16.msra.mxu3 %v3301_v24 }
  0x5d   :  { %827 = vmatpush.bf16.msra.mxu1 %v3309_v59 }
  0x5f   :  { %853 = vmatpush.bf16.msra.mxu3 %v3312_v22  ;;  %v2509_v22 = vld [vmem:[#allocation5 + $0x50] sm:$0xf0] }
  0x60   :  { %v3342_v57 = vor.u32 %v2776_v58, %v2509_v22  ;;  %v2491_v58 = vld [vmem:[#allocation5 + $0x20] sm:$0xf]  ;;  %v2772_v22 = vld [vmem:[#allocation5 + $0x24] sm:$0xf] }
  0x61   :  { %828 = vmatpush.bf16.msra.mxu1 %v3321_v55  ;;  %v2778_v55 = vld [vmem:[#allocation5 + $0x4c] sm:$0xf0] }
  0x62   :  { %v3340_v29 = vor.u32 %v2778_v55, %v2507_v61  ;;  %4581 = vst [vmem:[#allocation72_spill] sm:$0xff] %v3342_v57  ;;  %790 = vmatpush.bf16.msrb.mxu2 %v3342_v57  ;;  %v2774_v61 = vld [vmem:[#allocation5 + $0x2c] sm:$0xf0]  ;;  %v2493_v55 = vld [vmem:[#allocation5 + $0x30] sm:$0xf0] }
  0x63   :  { %854 = vmatpush.bf16.msra.mxu3 %v3323_v45  ;;  %v3353_v34 = vor.u32 %v2774_v61, %v2491_v58  ;;  %v3355_v13 = vor.u32 %v2772_v22, %v2493_v55  ;;  %v2801_v57 = vld [vmem:[#allocation5 + $0x10c] sm:$0xf]  ;;  %v2475_v58 = vld [vmem:[#allocation5] sm:$0xf]  ;;  %v2770_v61 = vld [vmem:[#allocation5 + $0xc] sm:$0xf0] }
  0x64   :  { %4580 = vst [vmem:[#allocation71_spill] sm:$0xff] %v3340_v29  ;;  %764 = vmatpush.bf16.msrb.mxu0 %v3340_v29  ;;  %v2613_v29 = vld [vmem:[#allocation5 + $0x118] sm:$0xf0]  ;;  %v3369_v22 = vor.u32 %v2770_v61, %v2475_v58  ;;  %v2768_v55 = vld [vmem:[#allocation5 + $0x4] sm:$0xf] }
  0x65   :  { %829 = vmatpush.bf16.msra.mxu1 %v3333_v43  ;;  %4584 = vst [vmem:[#allocation75_spill] sm:$0xff] %v3353_v34  ;;  %v2579_v58 = vld [vmem:[#allocation5 + $0xc8] sm:$0xf]  ;;  %v2795_v61 = vld [vmem:[#allocation5 + $0xd4] sm:$0xf0] }
  0x66   :  { %4585 = vst [vmem:[#allocation76_spill] sm:$0xff] %v3355_v13  ;;  %791 = vmatpush.bf16.msrb.mxu2 %v3355_v13  ;;  %v2797_v13 = vld [vmem:[#allocation5 + $0xec] sm:$0xf] }
  0x67   :  { %855 = vmatpush.bf16.msra.mxu3 %v3336_v25  ;;  %4588 = vst [vmem:[#allocation79_spill] sm:$0xff] %v3369_v22 }
  0x68   :  { %765 = vmatpush.bf16.msrb.mxu0 %v3353_v34  ;;  %v2597_v34 = vld [vmem:[#allocation5 + $0xf8] sm:$0xf0] }
  0x69   :  { %830 = vmatpush.bf16.msra.mxu1 %v3345_v53 }
  0x6b   :  { %856 = vmatpush.bf16.msra.mxu3 %v3347_v32  ;;  %v3361_v32 = vor.u32 %v2801_v57, %v2613_v29  ;;  %v2595_v29 = vld [vmem:[#allocation5 + $0xe8] sm:$0xf]  ;;  %v3371_v57 = vor.u32 %v2768_v55, %v2477_v17  ;;  %v2793_v55 = vld [vmem:[#allocation5 + $0xcc] sm:$0xf]  ;;  %v2581_v17 = vld [vmem:[#allocation5 + $0xd8] sm:$0xf0] }
  0x6c   :  { %766 = vmatpush.bf16.msrb.mxu0 %v3369_v22 }
  0x6d   :  { %4587 = vst [vmem:[#allocation78_spill] sm:$0xff] %v3361_v32  ;;  %831 = vmatpush.bf16.msra.mxu1 %v3357_v28  ;;  %792 = vmatpush.bf16.msrb.mxu2 %v3371_v57 }
  0x6e   :  { %4589 = vst [vmem:[#allocation80_spill] sm:$0xff] %v3371_v57 }
  0x6f   :  { %857 = vmatpush.bf16.msra.mxu3 %v3361_v32 }
  0x70   :  { %832 = vmatmul.bf16.vlgmr.msra.gmra.mxu1 %v3060_v11 }
  0x71   :  { %906 = vmatpush.bf16.msrb.mxu1 %v3120_v9 }
  0x72   :  { %858 = vmatmul.bf16.vlgmr.msra.gmra.mxu3 %v3060_v11  ;;  %v2547_v11 = vld [vmem:[#allocation5 + $0x88] sm:$0xf] }
  0x73   :  { %932 = vmatpush.bf16.msrb.mxu3 %v3125_v14  ;;  %v3375_v14 = vor.u32 %v2799_v8, %v2595_v29  ;;  %v3386_v29 = vor.u32 %v2793_v55, %v2581_v17  ;;  %v2789_v8 = vld [vmem:[#allocation5 + $0xac] sm:$0xf] }
  0x74   :  { %v2785_v55 = vld [vmem:[#allocation5 + $0x8c] sm:$0xf] }
  0x75   :  { %907 = vmatpush.bf16.msrb.mxu1 %v3131_v19  ;;  %4590 = vst [vmem:[#allocation81_spill] sm:$0xff] %v3375_v14  ;;  %v3377_v19 = vor.u32 %v2797_v13, %v2597_v34  ;;  %811 = vmatpush.bf16.msra.mxu0 %v3375_v14  ;;  %v2563_v13 = vld [vmem:[#allocation5 + $0xa8] sm:$0xf]  ;;  %v2791_v34 = vld [vmem:[#allocation5 + $0xb4] sm:$0xf0] }
  0x76   :  { %4593 = vst [vmem:[#allocation84_spill] sm:$0xff] %v3386_v29 }
  0x77   :  { %933 = vmatpush.bf16.msrb.mxu3 %v3136_v27  ;;  %4591 = vst [vmem:[#allocation82_spill] sm:$0xff] %v3377_v19  ;;  %837 = vmatpush.bf16.msra.mxu2 %v3377_v19  ;;  %v2565_v27 = vld [vmem:[#allocation5 + $0xb8] sm:$0xf0] }
  0x79   :  { %908 = vmatpush.bf16.msrb.mxu1 %v3143_v35  ;;  %v3384_v35 = vor.u32 %v2795_v61, %v2579_v58  ;;  %v3394_v58 = vor.u32 %v2789_v8, %v2565_v27  ;;  %v2787_v61 = vld [vmem:[#allocation5 + $0x94] sm:$0xf0]  ;;  %v64_v27 = vld [vmem:[%s4298_s1] sm:$0xf] }
  0x7a   :  { %v3399_v17 = vor.u32 %v2787_v61, %v2547_v11  ;;  %v2783_v8 = vld [vmem:[#allocation5 + $0x74] sm:$0xf0]  ;;  %v2533_v61 = vld [vmem:[#allocation5 + $0x78] sm:$0xf0] }
  0x7b   :  { %934 = vmatpush.bf16.msrb.mxu3 %v3148_v40  ;;  %4592 = vst [vmem:[#allocation83_spill] sm:$0xff] %v3384_v35  ;;  %812 = vmatpush.bf16.msra.mxu0 %v3384_v35  ;;  %v3391_v40 = vor.u32 %v2791_v34, %v2563_v13  ;;  %v2531_v34 = vld [vmem:[#allocation5 + $0x68] sm:$0xf] }
  0x7c   :  { %838 = vmatpush.bf16.msra.mxu2 %v3386_v29  ;;  %4595 = vst [vmem:[#allocation86_spill] sm:$0xff] %v3394_v58  ;;  %v3410_v11 = vor.u32 %v2783_v8, %v2531_v34  ;;  %v2515_v34 = vld [vmem:[#allocation5 + $0x48] sm:$0xf]  ;;  %v2779_v8 = vld [vmem:[#allocation5 + $0x54] sm:$0xf0] }
  0x7d   :  { %909 = vmatpush.bf16.msrb.mxu1 %v3155_v47  ;;  %4594 = vst [vmem:[#allocation85_spill] sm:$0xff] %v3391_v40 }
  0x7e   :  { %4596 = vst [vmem:[#allocation87_spill] sm:$0xff] %v3399_v17 }
  0x7f   :  { %935 = vmatpush.bf16.msrb.mxu3 %v3160_v52  ;;  %813 = vmatpush.bf16.msra.mxu0 %v3391_v40  ;;  %v2549_v52 = vld [vmem:[#allocation5 + $0x98] sm:$0xf0]  ;;  %4598 = vst [vmem:[#allocation89_spill] sm:$0xff] %v3410_v11 }
  0x80   :  { %839 = vmatpush.bf16.msra.mxu2 %v3394_v58  ;;  %v3402_v13 = vor.u32 %v2785_v55, %v2549_v52  ;;  %v3416_v55 = vperm.slane %v64_v27, 0 }
  0x81   :  { %910 = vmatpush.bf16.msrb.mxu1 %v3167_v60  ;;  %v2777_v60 = vld [vmem:[#allocation5 + $0x4c] sm:$0xf] }
  0x82   :  { %4597 = vst [vmem:[#allocation88_spill] sm:$0xff] %v3402_v13 }
  0x83   :  { %936 = vmatpush.bf16.msrb.mxu3 %v3175_v2  ;;  %814 = vmatpush.bf16.msra.mxu0 %v3399_v17  ;;  %v2781_v2 = vld [vmem:[#allocation5 + $0x6c] sm:$0xf]  ;;  %4600 = vst [vmem:[#allocation91_spill] sm:$0xff] %v3416_v55 }
  0x84   :  { %840 = vmatpush.bf16.msra.mxu2 %v3402_v13  ;;  %v3413_v52 = vor.u32 %v2781_v2, %v2533_v61  ;;  %v2517_v2 = vld [vmem:[#allocation5 + $0x58] sm:$0xf0] }
  0x85   :  { %911 = vmatpush.bf16.msrb.mxu1 %v3182_v12  ;;  %v65_v12 = vld [vmem:[%s4299_s2] sm:$0xf] }
  0x86   :  { %4599 = vst [vmem:[#allocation90_spill] sm:$0xff] %v3413_v52  ;;  %v3432_v47 = vperm.slane %v65_v12, 0 }
  0x87   :  { %937 = vmatpush.bf16.msrb.mxu3 %v3187_v20  ;;  %v3418_v20 = vperm.slane %v64_v27, 1  ;;  %815 = vmatpush.bf16.msra.mxu0 %v3410_v11 }
  0x88   :  { %841 = vmatpush.bf16.msra.mxu2 %v3413_v52  ;;  %4604 = vst [vmem:[#allocation95_spill] sm:$0xff] %v3432_v47  ;;  %v3435_v52 = vperm.slane %v65_v12, 1 }
  0x89   :  { %912 = vmatpush.bf16.msrb.mxu1 %v3197_v30  ;;  %4601 = vst [vmem:[#allocation92_spill] sm:$0xff] %v3418_v20  ;;  %v3425_v30 = vor.u32 %v2779_v8, %v2515_v34  ;;  %v2775_v8 = vld [vmem:[#allocation5 + $0x34] sm:$0xf0] }
  0x8a   :  { %4605 = vst [vmem:[#allocation96_spill] sm:$0xff] %v3435_v52 }
  0x8b   :  { %938 = vmatpush.bf16.msrb.mxu3 %v3202_v38  ;;  %4602 = vst [vmem:[#allocation93_spill] sm:$0xff] %v3425_v30  ;;  %v3428_v38 = vor.u32 %v2777_v60, %v2517_v2  ;;  %816 = vmatpush.bf16.msra.mxu0 %v3425_v30  ;;  %v2499_v60 = vld [vmem:[#allocation5 + $0x28] sm:$0xf]  ;;  %v2773_v2 = vld [vmem:[#allocation5 + $0x2c] sm:$0xf] }
  0x8c   :  { %v187_v61 = vpop.permute.xlu0 %186  ;;  %v2769_v30 = vld [vmem:[#allocation5 + $0xc] sm:$0xf] }
  0x8d   :  { %913 = vmatpush.bf16.msrb.mxu1 %v3209_v51  ;;  %4603 = vst [vmem:[#allocation94_spill] sm:$0xff] %v3428_v38  ;;  %v198_v9 = vmul.f32 %v3416_v55, %v187_v61  ;;  %v199_v34 = vmul.f32 %v3418_v20, %v187_v61  ;;  %842 = vmatpush.bf16.msra.mxu2 %v3428_v38  ;;  %v2483_v20 = vld [vmem:[#allocation5 + $0x8] sm:$0xf]  ;;  %v2771_v38 = vld [vmem:[#allocation5 + $0x14] sm:$0xf0] }
  0x8f   :  { %939 = vmatpush.bf16.msrb.mxu3 %v3214_v54  ;;  %v3441_v54 = vor.u32 %v2775_v8, %v2499_v60  ;;  %v202_v55 = vadd.f32 %v198_v9, %v3432_v47  ;;  %v3451_v60 = vperm.slane %v64_v27, 3  ;;  %v3453_v8 = vor.u32 %v2771_v38, %v2483_v20 }
  0x90   :  { %v3463_v20 = vperm.slane %v65_v12, 3 }
  0x91   :  { %979 = vmatpush.bf16.msra.mxu1 %v3219_v56  ;;  %4606 = vst [vmem:[#allocation97_spill] sm:$0xff] %v3441_v54  ;;  %v2501_v56 = vld [vmem:[#allocation5 + $0x38] sm:$0xf0]  ;;  %817 = vmatpush.bf16.msra.mxu0 %v3441_v54  ;;  %v201_v38 = vmul.f32 %v3451_v60, %v187_v61 }
  0x92   :  { %v3443_v51 = vor.u32 %v2773_v2, %v2501_v56  ;;  %4608 = vst [vmem:[#allocation99_spill] sm:$0xff] %v3453_v8  ;;  %v2485_v56 = vld [vmem:[#allocation5 + $0x18] sm:$0xf0]  ;;  %v3455_v2 = vperm.slane %v64_v27, 2  ;;  %v3466_v27 = vperm.slane %v65_v12, 2 }
  0x93   :  { %1005 = vmatpush.bf16.msra.mxu3 %v3225_v0  ;;  %v203_v0 = vadd.f32 %v199_v34, %v3435_v52  ;;  %v3457_v9 = vor.u32 %v2769_v30, %v2485_v56 }
  0x94   :  { %4607 = vst [vmem:[#allocation98_spill] sm:$0xff] %v3443_v51  ;;  %843 = vmatpush.bf16.msra.mxu2 %v3443_v51  ;;  %v200_v30 = vmul.f32 %v3455_v2, %v187_v61 }
  0x95   :  { %980 = vmatpush.bf16.msra.mxu1 %v3229_v6  ;;  %4609 = vst [vmem:[#allocation100_spill] sm:$0xff] %v3457_v9  ;;  %818 = vmatpush.bf16.msra.mxu0 %v3453_v8 }
  0x97   :  { %1006 = vmatpush.bf16.msra.mxu3 %v3239_v26 }
  0x98   :  { %844 = vmatpush.bf16.msra.mxu2 %v3457_v9 }
  0x99   :  { %981 = vmatpush.bf16.msra.mxu1 %v3243_v33 }
  0x9b   :  { %1007 = vmatpush.bf16.msra.mxu3 %v3251_v49 }
  0x9d   :  { %982 = vmatpush.bf16.msra.mxu1 %v3255_v50 }
  0x9f   :  { %1008 = vmatpush.bf16.msra.mxu3 %v3259_v63 }
  0xa1   :  { %983 = vmatpush.bf16.msra.mxu1 %v3262_v3 }
  0xa3   :  { %1009 = vmatpush.bf16.msra.mxu3 %v3265_v16 }
  0xa5   :  { %984 = vmatpush.bf16.msra.mxu1 %v3268_v21 }
  0xa7   :  { %1010 = vmatpush.bf16.msra.mxu3 %v3271_v37 }
  0xa9   :  { %985 = vmatpush.bf16.msra.mxu1 %v3274_v39 }
  0xab   :  { %1011 = vmatpush.bf16.msra.mxu3 %v3277_v62 }
  0xad   :  { %v375_v6 = vpop.f32.mrf.mxu0  ;;  %v388_v26 = vpop.f32.mrf.mxu1  ;;  %986 = vmatpush.bf16.msra.mxu1 %v3280_v4 }
  0xae   :  { %v418_v34 = vadd.f32 %v375_v6, %v202_v55  ;;  %v419_v47 = vadd.f32 %v388_v26, %v203_v0  ;;  %v205_v0 = vadd.f32 %v201_v38, %v3463_v20  ;;  %v204_v26 = vadd.f32 %v200_v30, %v3466_v27 }
  0xaf   :  { %1012 = vmatpush.bf16.msra.mxu3 %v3285_v44 }
  0xb0   :  { %2843 = vtanh.f32 %v418_v34 }
  0xb1   :  { %2845 = vtanh.f32 %v419_v47 }
  0xb4   :  { %v401_v6 = vpop.f32.mrf.mxu2 }
  0xb5   :  { %v414_v55 = vpop.f32.mrf.mxu3  ;;  %v377_v56 = vpop.f32.mrf.mxu0  ;;  %v420_v33 = vadd.f32 %v401_v6, %v204_v26  ;;  %v4610_v26 = vld [vmem:[#allocation62_spill] sm:$0xff] }
  0xb6   :  { %v2844_v34 = vpop.eup %2843  ;;  %v421_v49 = vadd.f32 %v414_v55, %v205_v0  ;;  %v390_v47 = vpop.f32.mrf.mxu1 }
  0xb7   :  { %v2846_v12 = vpop.eup %2845  ;;  %v425_v61 = vmul.f32 0.5, %v2844_v34  ;;  %v4611_v47 = vld [vmem:[#allocation17_spill] sm:$0xff] }
  0xb8   :  { %v426_v50 = vmul.f32 0.5, %v2846_v12  ;;  %2847 = vtanh.f32 %v421_v49  ;;  %v4612_v12 = vld [vmem:[#allocation19_spill] sm:$0xff] }
  0xb9   :  { %v428_v38 = vadd.f32 0.5, %v425_v61  ;;  %2849 = vtanh.f32 %v420_v33  ;;  %v4613_v61 = vld [vmem:[#allocation65_spill] sm:$0xff] }
  0xba   :  { %v429_v63 = vadd.f32 0.5, %v426_v50 }
  0xbc   :  { %v403_v30 = vpop.f32.mrf.mxu2  ;;  %v432_v56 = vmul.f32 0.0, %v429_v63 }
  0xbd   :  { %v416_v3 = vpop.f32.mrf.mxu3  ;;  %v4615_v30 = vld [vmem:[#allocation23_spill] sm:$0xff] }
  0xbe   :  { %v2848_v0 = vpop.eup %2847 }
  0xbf   :  { %v433_v55 = vmul.f32 %v2848_v0, %v428_v38  ;;  %v2850_v34 = vpop.eup %2849  ;;  %v4614_v38 = vld [vmem:[#allocation21_spill] sm:$0xff]  ;;  %v4617_v0 = vld [vmem:[#allocation27_spill] sm:$0xff] }
  0xc0   :  { %v427_v49 = vmul.f32 0.5, %v2850_v34  ;;  %v4619_v34 = vld [vmem:[#allocation29_spill] sm:$0xff] }
  0xc1   :  { %v3479_v6 = vadd.f32 %v433_v55, %v432_v56  ;;  %v4616_v56 = vld [vmem:[#allocation25_spill] sm:$0xff]  ;;  %v4618_v55 = vld [vmem:[#allocation74_spill] sm:$0xff] }
  0xc2   :  { %v430_v33 = vadd.f32 0.5, %v427_v49  ;;  %v4620_v49 = vld [vmem:[#allocation31_spill] sm:$0xff] }
  0xc3   :  { %2851 = vtanh.f32 %v3479_v6 }
  0xc9   :  { %v2852_v50 = vpop.eup %2851 }
  0xca   :  { %v436_v63 = vmul.f32 %v2852_v50, %v430_v33  ;;  %v4621_v33 = vld [vmem:[#allocation36_spill] sm:$0xff]  ;;  %v4622_v50 = vld [vmem:[#allocation37_spill] sm:$0xff] }
  0xcc   :  { %v437_v3 = vpack.c.bf16 %v436_v63, %v436_v63  ;;  %v4623_v63 = vld [vmem:[#allocation40_spill] sm:$0xff] }
  0xce   :  { %767 = vmatmul.bf16.vlgmr.msrb.gmra.mxu0 %v437_v3  ;;  %793 = vmatmul.bf16.vlgmr.msrb.gmra.mxu2 %v437_v3 }
  0xcf   :  { %914 = vmatmul.bf16.vlgmr.msrb.gmra.mxu1 %v437_v3  ;;  %940 = vmatmul.bf16.vlgmr.msrb.gmra.mxu3 %v437_v3 }
  0xd0   :  { %893 = vmatpush.bf16.msrb.mxu0 %v3118_v5  ;;  %919 = vmatpush.bf16.msrb.mxu2 %v3122_v10 }
  0xd1   :  { %1031 = vmatpush.bf16.msrb.mxu1 %v3282_v15  ;;  %1057 = vmatpush.bf16.msrb.mxu3 %v3288_v1 }
  0xd4   :  { %894 = vmatpush.bf16.msrb.mxu0 %v3129_v18  ;;  %920 = vmatpush.bf16.msrb.mxu2 %v3134_v23 }
  0xd5   :  { %1032 = vmatpush.bf16.msrb.mxu1 %v3291_v41  ;;  %1058 = vmatpush.bf16.msrb.mxu3 %v3295_v42 }
  0xd8   :  { %895 = vmatpush.bf16.msrb.mxu0 %v3139_v31  ;;  %921 = vmatpush.bf16.msrb.mxu2 %v3145_v36 }
  0xd9   :  { %1033 = vmatpush.bf16.msrb.mxu1 %v3298_v7  ;;  %1059 = vmatpush.bf16.msrb.mxu3 %v3301_v24  ;;  %v4634_v24 = vld [vmem:[#allocation76_spill] sm:$0xff]  ;;  %v807_v7 = vpop.f32.mrf.mxu3 }
  0xdc   :  { %896 = vmatpush.bf16.msrb.mxu0 %v3151_v46  ;;  %922 = vmatpush.bf16.msrb.mxu2 %v3157_v48 }
  0xdd   :  { %1034 = vmatpush.bf16.msrb.mxu1 %v3309_v59  ;;  %1060 = vmatpush.bf16.msrb.mxu3 %v4610_v26  ;;  %v4630_v26 = vld [vmem:[#allocation68_spill] sm:$0xff]  ;;  %v4633_v59 = vld [vmem:[#allocation75_spill] sm:$0xff] }
  0xde   :  { %819 = vmatmul.bf16.vlgmr.msra.gmra.mxu0 %v437_v3  ;;  %845 = vmatmul.bf16.vlgmr.msra.gmra.mxu2 %v437_v3 }
  0xe0   :  { %897 = vmatpush.bf16.msrb.mxu0 %v4611_v47  ;;  %923 = vmatpush.bf16.msrb.mxu2 %v4612_v12 }
  0xe1   :  { %1035 = vmatpush.bf16.msrb.mxu1 %v4613_v61  ;;  %1061 = vmatpush.bf16.msrb.mxu3 %v3323_v45  ;;  %v4628_v45 = vld [vmem:[#allocation64_spill] sm:$0xff]  ;;  %v4629_v61 = vld [vmem:[#allocation67_spill] sm:$0xff]  ;;  %v809_v41 = vpop.f32.mrf.mxu3 }
  0xe4   :  { %898 = vmatpush.bf16.msrb.mxu0 %v4614_v38  ;;  %924 = vmatpush.bf16.msrb.mxu2 %v4615_v30 }
  0xe5   :  { %1036 = vmatpush.bf16.msrb.mxu1 %v3333_v43  ;;  %1062 = vmatpush.bf16.msrb.mxu3 %v3336_v25  ;;  %v4624_v25 = vld [vmem:[#allocation41_spill] sm:$0xff]  ;;  %v4627_v43 = vld [vmem:[#allocation63_spill] sm:$0xff] }
  0xe8   :  { %899 = vmatpush.bf16.msrb.mxu0 %v4616_v56  ;;  %925 = vmatpush.bf16.msrb.mxu2 %v4617_v0 }
  0xe9   :  { %1037 = vmatpush.bf16.msrb.mxu1 %v3345_v53  ;;  %1063 = vmatpush.bf16.msrb.mxu3 %v4618_v55  ;;  %v4625_v53 = vld [vmem:[#allocation59_spill] sm:$0xff]  ;;  %v4626_v55 = vld [vmem:[#allocation60_spill] sm:$0xff] }
  0xec   :  { %900 = vmatpush.bf16.msrb.mxu0 %v4619_v34  ;;  %926 = vmatpush.bf16.msrb.mxu2 %v4620_v49 }
  0xed   :  { %1038 = vmatpush.bf16.msrb.mxu1 %v3357_v28  ;;  %1064 = vmatpush.bf16.msrb.mxu3 %v3361_v32  ;;  %v4631_v28 = vld [vmem:[#allocation71_spill] sm:$0xff]  ;;  %v4632_v32 = vld [vmem:[#allocation72_spill] sm:$0xff] }
  0xef   :  { %901 = vmatmul.bf16.vlgmr.msrb.gmra.mxu0 %v437_v3  ;;  %927 = vmatmul.bf16.vlgmr.msrb.gmra.mxu2 %v437_v3  ;;  %v781_v3 = vpop.f32.mrf.mxu1 }
  0xf0   :  { %966 = vmatpush.bf16.msra.mxu0 %v4621_v33  ;;  %992 = vmatpush.bf16.msra.mxu2 %v4622_v50 }
  0xf4   :  { %967 = vmatpush.bf16.msra.mxu0 %v4623_v63  ;;  %993 = vmatpush.bf16.msra.mxu2 %v4624_v25 }
  0xf7   :  { %v783_v42 = vpop.f32.mrf.mxu1 }
  0xf8   :  { %968 = vmatpush.bf16.msra.mxu0 %v4625_v53  ;;  %994 = vmatpush.bf16.msra.mxu2 %v4626_v55 }
  0xfc   :  { %969 = vmatpush.bf16.msra.mxu0 %v4627_v43  ;;  %995 = vmatpush.bf16.msra.mxu2 %v4628_v45 }
 0x100   :  { %970 = vmatpush.bf16.msra.mxu0 %v4629_v61  ;;  %996 = vmatpush.bf16.msra.mxu2 %v4630_v26 }
 0x104   :  { %971 = vmatpush.bf16.msra.mxu0 %v4631_v28  ;;  %997 = vmatpush.bf16.msra.mxu2 %v4632_v32  ;;  %v833_v32 = vpop.f32.mrf.mxu1  ;;  %v4641_v28 = vld [vmem:[#allocation92_spill] sm:$0xff] }
 0x108   :  { %972 = vmatpush.bf16.msra.mxu0 %v4633_v59  ;;  %998 = vmatpush.bf16.msra.mxu2 %v4634_v24  ;;  %v883_v24 = vpop.permute.xlu0 %882 }
 0x109   :  { %v886_v1 = vmul.f32 %v883_v24, %v4641_v28 }
 0x10c   :  { %973 = vmatpush.bf16.msra.mxu0 %v3369_v22  ;;  %999 = vmatpush.bf16.msra.mxu2 %v3371_v57  ;;  %v859_v57 = vpop.f32.mrf.mxu3  ;;  %v835_v42 = vpop.f32.mrf.mxu1 }
 0x10d   :  { %v171_v42 = vld [vmem:[%s4302_s5] sm:$0xf] }
 0x10e   :  { %v3557_v59 = vperm.slane %v171_v42, 2  ;;  %v3560_v15 = vperm.slane %v171_v42, 3 }
 0x110   :  { %1018 = vmatpush.bf16.msrb.mxu0 %v3375_v14  ;;  %1044 = vmatpush.bf16.msrb.mxu2 %v3377_v19  ;;  %v4635_v14 = vld [vmem:[#allocation90_spill] sm:$0xff]  ;;  %v4636_v19 = vld [vmem:[#allocation93_spill] sm:$0xff]  ;;  %4640 = vst [vmem:[#allocation23_spill] sm:$0xff] %v3557_v59 }
 0x111   :  { %4642 = vst [vmem:[#allocation101_spill] sm:$0xff] %v3560_v15 }
 0x114   :  { %1019 = vmatpush.bf16.msrb.mxu0 %v3384_v35  ;;  %1045 = vmatpush.bf16.msrb.mxu2 %v3386_v29  ;;  %v4637_v35 = vld [vmem:[#allocation94_spill] sm:$0xff]  ;;  %v861_v41 = vpop.f32.mrf.mxu3 }
 0x118   :  { %1020 = vmatpush.bf16.msrb.mxu0 %v3391_v40  ;;  %1046 = vmatpush.bf16.msrb.mxu2 %v3394_v58 }
 0x11c   :  { %1021 = vmatpush.bf16.msrb.mxu0 %v3399_v17  ;;  %1047 = vmatpush.bf16.msrb.mxu2 %v3402_v13 }
 0x120   :  { %1022 = vmatpush.bf16.msrb.mxu0 %v3410_v11  ;;  %1048 = vmatpush.bf16.msrb.mxu2 %v4635_v14  ;;  %v3551_v14 = vperm.slane %v171_v42, 1  ;;  %v3553_v11 = vperm.slane %v171_v42, 0 }
 0x122   :  { %4638 = vst [vmem:[#allocation17_spill] sm:$0xff] %v3551_v14 }
 0x123   :  { %4639 = vst [vmem:[#allocation19_spill] sm:$0xff] %v3553_v11 }
 0x124   :  { %1023 = vmatpush.bf16.msrb.mxu0 %v4636_v19  ;;  %1049 = vmatpush.bf16.msrb.mxu2 %v4637_v35 }
 0x128   :  { %1024 = vmatpush.bf16.msrb.mxu0 %v3441_v54  ;;  %1050 = vmatpush.bf16.msrb.mxu2 %v3443_v51 }
 0x12c   :  { %1025 = vmatpush.bf16.msrb.mxu0 %v3453_v8  ;;  %1051 = vmatpush.bf16.msrb.mxu2 %v3457_v9 }
 0x14b   :  { %v768_v13 = vpop.f32.mrf.mxu0 }
 0x14c   :  { %v915_v17 = vpop.f32.mrf.mxu1  ;;  %v769_v8 = vadd.f32 %v768_v13, %v3553_v11  ;;  %v890_v13 = vadd.f32 %v886_v1, %v3435_v52  ;;  %v4643_v11 = vld [vmem:[#allocation91_spill] sm:$0xff] }
 0x14d   :  { %v885_v28 = vmul.f32 %v883_v24, %v4643_v11  ;;  %v4644_v1 = vld [vmem:[#allocation95_spill] sm:$0xff] }
 0x14e   :  { %v782_v40 = vadd.f32 %v781_v3, %v769_v8  ;;  %v946_v8 = vadd.f32 %v915_v17, %v890_v13  ;;  %v887_v17 = vmul.f32 %v883_v24, %v3455_v2 }
 0x14f   :  { %v889_v52 = vadd.f32 %v885_v28, %v4644_v1 }
 0x151   :  { %v794_v19 = vpop.f32.mrf.mxu2 }
 0x152   :  { %v941_v41 = vpop.f32.mrf.mxu3  ;;  %v795_v54 = vadd.f32 %v794_v19, %v3551_v14 }
 0x153   :  { %v770_v35 = vpop.f32.mrf.mxu0 }
 0x154   :  { %v917_v51 = vpop.f32.mrf.mxu1  ;;  %v808_v58 = vadd.f32 %v807_v7, %v795_v54 }
 0x156   :  { %2853 = vtanh.f32 %v808_v58 }
 0x157   :  { %2855 = vtanh.f32 %v782_v40 }
 0x159   :  { %v796_v9 = vpop.f32.mrf.mxu2 }
 0x15a   :  { %v943_v29 = vpop.f32.mrf.mxu3 }
 0x15b   :  { %v820_v22 = vpop.f32.mrf.mxu0 }
 0x15c   :  { %v821_v35 = vadd.f32 %v820_v22, %v3557_v59  ;;  %v2854_v51 = vpop.eup %2853  ;;  %v888_v22 = vmul.f32 %v883_v24, %v3451_v60 }
 0x15d   :  { %v2856_v29 = vpop.eup %2855  ;;  %v867_v9 = vmul.f32 0.5, %v2854_v51 }
 0x15e   :  { %v834_v3 = vadd.f32 %v833_v32, %v821_v35  ;;  %v866_v40 = vmul.f32 0.5, %v2856_v29  ;;  %v892_v32 = vadd.f32 %v888_v22, %v3463_v20 }
 0x15f   :  { %v870_v42 = vadd.f32 0.5, %v867_v9 }
 0x160   :  { %v869_v14 = vadd.f32 0.5, %v866_v40  ;;  %v948_v29 = vadd.f32 %v941_v41, %v892_v32 }
 0x161   :  { %v846_v19 = vpop.f32.mrf.mxu2 }
 0x162   :  { %v847_v54 = vadd.f32 %v846_v19, %v3560_v15 }
 0x163   :  { %v822_v7 = vpop.f32.mrf.mxu0 }
 0x164   :  { %v860_v58 = vadd.f32 %v859_v57, %v847_v54  ;;  %v873_v57 = vmul.f32 0.0, %v870_v42 }
 0x166   :  { %2857 = vtanh.f32 %v860_v58 }
 0x167   :  { %2859 = vtanh.f32 %v946_v8 }
 0x168   :  { %2861 = vtanh.f32 %v834_v3 }
 0x169   :  { %v848_v59 = vpop.f32.mrf.mxu2 }
 0x16a   :  { %v891_v59 = vadd.f32 %v887_v17, %v3466_v27 }
 0x16c   :  { %v2858_v19 = vpop.eup %2857  ;;  %v902_v7 = vpop.f32.mrf.mxu0 }
 0x16d   :  { %v874_v35 = vmul.f32 %v2858_v19, %v869_v14  ;;  %v945_v51 = vadd.f32 %v902_v7, %v889_v52  ;;  %v2860_v13 = vpop.eup %2859 }
 0x16e   :  { %v2862_v54 = vpop.eup %2861  ;;  %v953_v28 = vmul.f32 0.5, %v2860_v13 }
 0x16f   :  { %v3570_v8 = vadd.f32 %v874_v35, %v873_v57  ;;  %2863 = vtanh.f32 %v945_v51  ;;  %v868_v58 = vmul.f32 0.5, %v2862_v54  ;;  %v4645_v54 = vld [vmem:[#allocation9_spill] sm:$0xff] }
 0x170   :  { %v956_v42 = vadd.f32 0.5, %v953_v28  ;;  %v2730_v28 = vld [vmem:[%s4297_s0 + $0x10] sm:$0xff] }
 0x171   :  { %2865 = vtanh.f32 %v3570_v8  ;;  %v871_v14 = vadd.f32 0.5, %v868_v58  ;;  %1089 = vperm.xlu1 %2839, %v2730_v28   ;;  %v4648_v58 = vld [vmem:[#allocation12_spill] sm:$0xff] }
 0x172   :  { %v928_v9 = vpop.f32.mrf.mxu2  ;;  %2867 = vtanh.f32 %v948_v29  ;;  %v959_v57 = vmul.f32 %v956_v42, %v3479_v6  ;;  %v4646_v29 = vld [vmem:[#allocation10_spill] sm:$0xff]  ;;  %v4647_v6 = vld [vmem:[#allocation11_spill] sm:$0xff]  ;;  %v4660_v28 = vld [vmem:[#allocation32_spill] sm:$0xff] }
 0x173   :  { %v947_v24 = vadd.f32 %v928_v9, %v891_v59  ;;  %v4650_v42 = vld [vmem:[#allocation14_spill] sm:$0xff] }
 0x174   :  { %v904_v3 = vpop.f32.mrf.mxu0 }
 0x175   :  { %v2864_v40 = vpop.eup %2863  ;;  %2869 = vtanh.f32 %v947_v24 }
 0x176   :  { %v952_v52 = vmul.f32 0.5, %v2864_v40  ;;  %v4649_v40 = vld [vmem:[#allocation13_spill] sm:$0xff] }
 0x177   :  { %v2866_v22 = vpop.eup %2865 }
 0x178   :  { %v955_v41 = vadd.f32 0.5, %v952_v52  ;;  %v877_v19 = vmul.f32 %v2866_v22, %v871_v14  ;;  %v2868_v7 = vpop.eup %2867  ;;  %v2731_v52 = vld [vmem:[%s4297_s0 + $0x18] sm:$0xff] }
 0x179   :  { %1296 = vperm.xlu1 %2839, %v2731_v52   ;;  %v4651_v22 = vld [vmem:[#allocation15_spill] sm:$0xff]  ;;  %v4664_v52 = vld [vmem:[#allocation38_spill] sm:$0xff] }
 0x17a   :  { %v960_v32 = vmul.f32 %v2868_v7, %v955_v41  ;;  %v930_v35 = vpop.f32.mrf.mxu2  ;;  %v965_v17 = vpack.c.bf16 %v877_v19, %v877_v19  ;;  %v4652_v41 = vld [vmem:[#allocation16_spill] sm:$0xff]  ;;  %v4653_v7 = vld [vmem:[#allocation18_spill] sm:$0xff] }
 0x17b   :  { %v2870_v51 = vpop.eup %2869  ;;  %v2735_v19 = vld [vmem:[%s4297_s0 + $0x38] sm:$0xff] }
 0x17c   :  { %v3575_v13 = vadd.f32 %v960_v32, %v959_v57  ;;  %987 = vmatmul.bf16.vlgmr.msra.gmra.mxu1 %v965_v17  ;;  %1013 = vmatmul.bf16.vlgmr.msra.gmra.mxu3 %v965_v17  ;;  %v954_v59 = vmul.f32 0.5, %v2870_v51  ;;  %v4654_v57 = vld [vmem:[#allocation20_spill] sm:$0xff]  ;;  %v4655_v32 = vld [vmem:[#allocation22_spill] sm:$0xff] }
 0x17d   :  { %1113 = vmatpush.bf16.msra.mxu1 %v4645_v54  ;;  %1139 = vmatpush.bf16.msra.mxu3 %v4646_v29  ;;  %v4656_v35 = vld [vmem:[#allocation24_spill] sm:$0xff] }
 0x17e   :  { %2871 = vtanh.f32 %v3575_v13  ;;  %v957_v9 = vadd.f32 0.5, %v954_v59  ;;  %v4658_v51 = vld [vmem:[#allocation28_spill] sm:$0xff]  ;;  %v4659_v59 = vld [vmem:[#allocation30_spill] sm:$0xff] }
 0x181   :  { %1114 = vmatpush.bf16.msra.mxu1 %v4647_v6  ;;  %1140 = vmatpush.bf16.msra.mxu3 %v4648_v58 }
 0x182   :  { %2124 = vperm.xlu1 %2839, %v2735_v19   ;;  %v4665_v19 = vld [vmem:[#allocation39_spill] sm:$0xff] }
 0x184   :  { %v2872_v24 = vpop.eup %2871 }
 0x185   :  { %v963_v3 = vmul.f32 %v2872_v24, %v957_v9  ;;  %1115 = vmatpush.bf16.msra.mxu1 %v4649_v40  ;;  %1141 = vmatpush.bf16.msra.mxu3 %v4650_v42  ;;  %v4661_v9 = vld [vmem:[#allocation33_spill] sm:$0xff]  ;;  %v4662_v24 = vld [vmem:[#allocation34_spill] sm:$0xff] }
 0x187   :  { %v964_v14 = vpack.c.bf16 %v963_v3, %v963_v3  ;;  %v4663_v3 = vld [vmem:[#allocation35_spill] sm:$0xff] }
 0x189   :  { %974 = vmatmul.bf16.vlgmr.msra.gmra.mxu0 %v964_v14  ;;  %1000 = vmatmul.bf16.vlgmr.msra.gmra.mxu2 %v964_v14 }
 0x18a   :  { %1100 = vmatpush.bf16.msra.mxu0 %v3118_v5  ;;  %1116 = vmatpush.bf16.msra.mxu1 %v4651_v22 }
 0x18b   :  { %1126 = vmatpush.bf16.msra.mxu2 %v3122_v10  ;;  %1142 = vmatpush.bf16.msra.mxu3 %v4652_v41 }
 0x18c   :  { %1039 = vmatmul.bf16.vlgmr.msrb.gmra.mxu1 %v965_v17  ;;  %1065 = vmatmul.bf16.vlgmr.msrb.gmra.mxu3 %v965_v17  ;;  %v4657_v17 = vld [vmem:[#allocation26_spill] sm:$0xff] }
 0x18e   :  { %1101 = vmatpush.bf16.msra.mxu0 %v3129_v18  ;;  %1117 = vmatpush.bf16.msra.mxu1 %v4653_v7 }
 0x18f   :  { %1127 = vmatpush.bf16.msra.mxu2 %v3134_v23  ;;  %1143 = vmatpush.bf16.msra.mxu3 %v4654_v57 }
 0x192   :  { %1102 = vmatpush.bf16.msra.mxu0 %v3139_v31  ;;  %1118 = vmatpush.bf16.msra.mxu1 %v4655_v32 }
 0x193   :  { %1128 = vmatpush.bf16.msra.mxu2 %v3145_v36  ;;  %1144 = vmatpush.bf16.msra.mxu3 %v4656_v35 }
 0x196   :  { %1103 = vmatpush.bf16.msra.mxu0 %v3151_v46  ;;  %1119 = vmatpush.bf16.msra.mxu1 %v4657_v17 }
 0x197   :  { %1129 = vmatpush.bf16.msra.mxu2 %v3157_v48  ;;  %1145 = vmatpush.bf16.msra.mxu3 %v4658_v51 }
 0x199   :  { %1026 = vmatmul.bf16.vlgmr.msrb.gmra.mxu0 %v964_v14  ;;  %1052 = vmatmul.bf16.vlgmr.msrb.gmra.mxu2 %v964_v14 }
 0x19a   :  { %1104 = vmatpush.bf16.msra.mxu0 %v4611_v47  ;;  %1120 = vmatpush.bf16.msra.mxu1 %v4659_v59 }
 0x19b   :  { %1130 = vmatpush.bf16.msra.mxu2 %v4612_v12  ;;  %1146 = vmatpush.bf16.msra.mxu3 %v4660_v28  ;;  %v4666_v28 = vld [vmem:[#allocation42_spill] sm:$0xff] }
 0x19d   :  { %1121 = vmatmul.bf16.vlgmr.msra.gmra.mxu1 %v964_v14 }
 0x19e   :  { %1186 = vmatpush.bf16.msrb.mxu1 %v4661_v9  ;;  %1147 = vmatmul.bf16.vlgmr.msra.gmra.mxu3 %v964_v14 }
 0x19f   :  { %1212 = vmatpush.bf16.msrb.mxu3 %v4662_v24  ;;  %1105 = vmatpush.bf16.msra.mxu0 %v4614_v38  ;;  %v4667_v38 = vld [vmem:[#allocation43_spill] sm:$0xff] }
 0x1a0   :  { %1131 = vmatpush.bf16.msra.mxu2 %v4615_v30 }
 0x1a2   :  { %1187 = vmatpush.bf16.msrb.mxu1 %v4663_v3 }
 0x1a3   :  { %1213 = vmatpush.bf16.msrb.mxu3 %v4664_v52  ;;  %1106 = vmatpush.bf16.msra.mxu0 %v4616_v56  ;;  %v4668_v52 = vld [vmem:[#allocation44_spill] sm:$0xff] }
 0x1a4   :  { %1132 = vmatpush.bf16.msra.mxu2 %v4617_v0  ;;  %v4669_v0 = vld [vmem:[#allocation45_spill] sm:$0xff] }
 0x1a6   :  { %1188 = vmatpush.bf16.msrb.mxu1 %v4665_v19 }
 0x1a7   :  { %1214 = vmatpush.bf16.msrb.mxu3 %v4666_v28  ;;  %1107 = vmatpush.bf16.msra.mxu0 %v4619_v34 }
 0x1a8   :  { %1133 = vmatpush.bf16.msra.mxu2 %v4620_v49  ;;  %v4711_v49 = vld [vmem:[#allocation96_spill] sm:$0xff] }
 0x1aa   :  { %1189 = vmatpush.bf16.msrb.mxu1 %v4667_v38  ;;  %1108 = vmatmul.bf16.vlgmr.msra.gmra.mxu0 %v964_v14 }
 0x1ab   :  { %1173 = vmatpush.bf16.msrb.mxu0 %v4621_v33  ;;  %1215 = vmatpush.bf16.msrb.mxu3 %v4668_v52  ;;  %v4710_v33 = vld [vmem:[#allocation92_spill] sm:$0xff] }
 0x1ac   :  { %1199 = vmatpush.bf16.msrb.mxu2 %v4622_v50 }
 0x1ad   :  { %1134 = vmatmul.bf16.vlgmr.msra.gmra.mxu2 %v964_v14  ;;  %v4670_v14 = vld [vmem:[#allocation52_spill] sm:$0xff] }
 0x1ae   :  { %1190 = vmatpush.bf16.msrb.mxu1 %v4669_v0 }
 0x1af   :  { %1174 = vmatpush.bf16.msrb.mxu0 %v4623_v63  ;;  %1216 = vmatpush.bf16.msrb.mxu3 %v3265_v16 }
 0x1b0   :  { %1200 = vmatpush.bf16.msrb.mxu2 %v4624_v25  ;;  %v4708_v25 = vld [vmem:[#allocation17_spill] sm:$0xff] }
 0x1b2   :  { %1191 = vmatpush.bf16.msrb.mxu1 %v3268_v21 }
 0x1b3   :  { %1175 = vmatpush.bf16.msrb.mxu0 %v4625_v53  ;;  %1217 = vmatpush.bf16.msrb.mxu3 %v3271_v37  ;;  %v4672_v37 = vld [vmem:[#allocation71_spill] sm:$0xff] }
 0x1b4   :  { %1201 = vmatpush.bf16.msrb.mxu2 %v4626_v55  ;;  %v4671_v55 = vld [vmem:[#allocation54_spill] sm:$0xff] }
 0x1b6   :  { %1192 = vmatpush.bf16.msrb.mxu1 %v3274_v39  ;;  %v4674_v39 = vld [vmem:[#allocation55_spill] sm:$0xff] }
 0x1b7   :  { %1176 = vmatpush.bf16.msrb.mxu0 %v4627_v43  ;;  %1218 = vmatpush.bf16.msrb.mxu3 %v3277_v62  ;;  %v4673_v43 = vld [vmem:[#allocation72_spill] sm:$0xff]  ;;  %v4676_v62 = vld [vmem:[#allocation75_spill] sm:$0xff] }
 0x1b8   :  { %1202 = vmatpush.bf16.msrb.mxu2 %v4628_v45  ;;  %v4675_v45 = vld [vmem:[#allocation56_spill] sm:$0xff] }
 0x1ba   :  { %1193 = vmatpush.bf16.msrb.mxu1 %v3280_v4  ;;  %v4678_v4 = vld [vmem:[#allocation57_spill] sm:$0xff] }
 0x1bb   :  { %1177 = vmatpush.bf16.msrb.mxu0 %v4629_v61  ;;  %1219 = vmatpush.bf16.msrb.mxu3 %v3285_v44  ;;  %v4677_v61 = vld [vmem:[#allocation76_spill] sm:$0xff]  ;;  %v4680_v44 = vld [vmem:[#allocation79_spill] sm:$0xff] }
 0x1bc   :  { %1203 = vmatpush.bf16.msrb.mxu2 %v4630_v26  ;;  %v4679_v26 = vld [vmem:[#allocation58_spill] sm:$0xff] }
 0x1be   :  { %1238 = vmatpush.bf16.msra.mxu1 %v4670_v14  ;;  %v4681_v14 = vld [vmem:[#allocation80_spill] sm:$0xff] }
 0x1bf   :  { %1264 = vmatpush.bf16.msra.mxu3 %v4671_v55  ;;  %1178 = vmatpush.bf16.msrb.mxu0 %v4672_v37  ;;  %v4682_v55 = vld [vmem:[#allocation81_spill] sm:$0xff] }
 0x1c0   :  { %1204 = vmatpush.bf16.msrb.mxu2 %v4673_v43  ;;  %v4683_v37 = vld [vmem:[#allocation61_spill] sm:$0xff]  ;;  %v4684_v43 = vld [vmem:[#allocation82_spill] sm:$0xff] }
 0x1c2   :  { %1239 = vmatpush.bf16.msra.mxu1 %v4674_v39  ;;  %v4685_v39 = vld [vmem:[#allocation62_spill] sm:$0xff] }
 0x1c3   :  { %1265 = vmatpush.bf16.msra.mxu3 %v4675_v45  ;;  %1179 = vmatpush.bf16.msrb.mxu0 %v4676_v62  ;;  %v4686_v45 = vld [vmem:[#allocation83_spill] sm:$0xff]  ;;  %v4687_v62 = vld [vmem:[#allocation65_spill] sm:$0xff] }
 0x1c4   :  { %1205 = vmatpush.bf16.msrb.mxu2 %v4677_v61  ;;  %v4688_v61 = vld [vmem:[#allocation84_spill] sm:$0xff] }
 0x1c6   :  { %1240 = vmatpush.bf16.msra.mxu1 %v4678_v4  ;;  %v4689_v4 = vld [vmem:[#allocation66_spill] sm:$0xff] }
 0x1c7   :  { %1266 = vmatpush.bf16.msra.mxu3 %v4679_v26  ;;  %1180 = vmatpush.bf16.msrb.mxu0 %v4680_v44  ;;  %v4690_v26 = vld [vmem:[#allocation85_spill] sm:$0xff] }
 0x1c8   :  { %1206 = vmatpush.bf16.msrb.mxu2 %v4681_v14  ;;  %v4691_v44 = vld [vmem:[#allocation69_spill] sm:$0xff]  ;;  %v4692_v14 = vld [vmem:[#allocation86_spill] sm:$0xff] }
 0x1ca   :  { %1241 = vmatpush.bf16.msra.mxu1 %v4683_v37  ;;  %v4694_v37 = vld [vmem:[#allocation87_spill] sm:$0xff] }
 0x1cb   :  { %1225 = vmatpush.bf16.msra.mxu0 %v4682_v55  ;;  %1267 = vmatpush.bf16.msra.mxu3 %v4685_v39  ;;  %v4693_v55 = vld [vmem:[#allocation70_spill] sm:$0xff]  ;;  %v4696_v39 = vld [vmem:[#allocation88_spill] sm:$0xff] }
 0x1cc   :  { %1251 = vmatpush.bf16.msra.mxu2 %v4684_v43  ;;  %v4695_v43 = vld [vmem:[#allocation73_spill] sm:$0xff] }
 0x1ce   :  { %1242 = vmatpush.bf16.msra.mxu1 %v4687_v62  ;;  %v4698_v62 = vld [vmem:[#allocation89_spill] sm:$0xff] }
 0x1cf   :  { %1226 = vmatpush.bf16.msra.mxu0 %v4686_v45  ;;  %1268 = vmatpush.bf16.msra.mxu3 %v4689_v4  ;;  %v4697_v45 = vld [vmem:[#allocation74_spill] sm:$0xff] }
 0x1d0   :  { %1252 = vmatpush.bf16.msra.mxu2 %v4688_v61  ;;  %v4699_v61 = vld [vmem:[#allocation77_spill] sm:$0xff]  ;;  %v4700_v4 = vld [vmem:[#allocation90_spill] sm:$0xff] }
 0x1d2   :  { %1243 = vmatpush.bf16.msra.mxu1 %v4691_v44  ;;  %v4702_v44 = vld [vmem:[#allocation93_spill] sm:$0xff] }
 0x1d3   :  { %1227 = vmatpush.bf16.msra.mxu0 %v4690_v26  ;;  %1269 = vmatpush.bf16.msra.mxu3 %v4693_v55  ;;  %v4701_v26 = vld [vmem:[#allocation78_spill] sm:$0xff]  ;;  %v4704_v55 = vld [vmem:[#allocation97_spill] sm:$0xff] }
 0x1d4   :  { %1253 = vmatpush.bf16.msra.mxu2 %v4692_v14  ;;  %v4703_v14 = vld [vmem:[#allocation94_spill] sm:$0xff] }
 0x1d6   :  { %1244 = vmatpush.bf16.msra.mxu1 %v4695_v43  ;;  %v4706_v43 = vld [vmem:[#allocation99_spill] sm:$0xff] }
 0x1d7   :  { %1228 = vmatpush.bf16.msra.mxu0 %v4694_v37  ;;  %1270 = vmatpush.bf16.msra.mxu3 %v4697_v45  ;;  %v4705_v37 = vld [vmem:[#allocation98_spill] sm:$0xff] }
 0x1d8   :  { %1254 = vmatpush.bf16.msra.mxu2 %v4696_v39  ;;  %v4707_v39 = vld [vmem:[#allocation100_spill] sm:$0xff] }
 0x1da   :  { %1245 = vmatpush.bf16.msra.mxu1 %v4699_v61 }
 0x1db   :  { %1229 = vmatpush.bf16.msra.mxu0 %v4698_v62  ;;  %1271 = vmatpush.bf16.msra.mxu3 %v4701_v26 }
 0x1dc   :  { %1255 = vmatpush.bf16.msra.mxu2 %v4700_v4 }
 0x1df   :  { %1230 = vmatpush.bf16.msra.mxu0 %v4702_v44 }
 0x1e0   :  { %1256 = vmatpush.bf16.msra.mxu2 %v4703_v14  ;;  %v4709_v14 = vld [vmem:[#allocation19_spill] sm:$0xff] }
 0x1e3   :  { %1231 = vmatpush.bf16.msra.mxu0 %v4704_v55 }
 0x1e4   :  { %1257 = vmatpush.bf16.msra.mxu2 %v4705_v37 }
 0x1e7   :  { %1232 = vmatpush.bf16.msra.mxu0 %v4706_v43  ;;  %v1090_v43 = vpop.permute.xlu1 %1089 }
 0x1e8   :  { %1258 = vmatpush.bf16.msra.mxu2 %v4707_v39 }
 0x1f9   :  { %v988_v45 = vpop.f32.mrf.mxu1 }
 0x1ff   :  { %v1014_v62 = vpop.f32.mrf.mxu3 }
 0x201   :  { %v990_v21 = vpop.f32.mrf.mxu1 }
 0x202   :  { %v1093_v21 = vmul.f32 %v1090_v43, %v4710_v33 }
 0x204   :  { %v1097_v34 = vadd.f32 %v1093_v21, %v4711_v49 }
 0x206   :  { %v975_v61 = vpop.f32.mrf.mxu0 }
 0x207   :  { %v1016_v53 = vpop.f32.mrf.mxu3  ;;  %v976_v63 = vadd.f32 %v975_v61, %v4709_v14 }
 0x209   :  { %v1040_v4 = vpop.f32.mrf.mxu1  ;;  %v989_v50 = vadd.f32 %v988_v45, %v976_v63  ;;  %v1092_v45 = vmul.f32 %v1090_v43, %v4643_v11 }
 0x20c   :  { %v1001_v16 = vpop.f32.mrf.mxu2 }
 0x20d   :  { %v1002_v44 = vadd.f32 %v1001_v16, %v4708_v25 }
 0x20e   :  { %v977_v26 = vpop.f32.mrf.mxu0 }
 0x20f   :  { %v1066_v0 = vpop.f32.mrf.mxu3  ;;  %v1015_v52 = vadd.f32 %v1014_v62, %v1002_v44  ;;  %v4712_v26 = vld [vmem:[#allocation23_spill] sm:$0xff] }
 0x211   :  { %v1042_v55 = vpop.f32.mrf.mxu1  ;;  %2873 = vtanh.f32 %v1015_v52 }
 0x212   :  { %2875 = vtanh.f32 %v989_v50  ;;  %v1095_v50 = vmul.f32 %v1090_v43, %v3451_v60 }
 0x214   :  { %v1003_v37 = vpop.f32.mrf.mxu2 }
 0x216   :  { %v1027_v38 = vpop.f32.mrf.mxu0 }
 0x217   :  { %v1068_v39 = vpop.f32.mrf.mxu3  ;;  %v1028_v28 = vadd.f32 %v1027_v38, %v4712_v26  ;;  %v2874_v25 = vpop.eup %2873  ;;  %v1096_v38 = vadd.f32 %v1092_v45, %v4644_v1 }
 0x218   :  { %v2876_v44 = vpop.eup %2875  ;;  %v1074_v63 = vmul.f32 0.5, %v2874_v25 }
 0x219   :  { %v1041_v39 = vadd.f32 %v1040_v4, %v1028_v28  ;;  %v1073_v33 = vmul.f32 0.5, %v2876_v44  ;;  %v1094_v28 = vmul.f32 %v1090_v43, %v3455_v2 }
 0x21a   :  { %v1122_v53 = vpop.f32.mrf.mxu1  ;;  %v1077_v49 = vadd.f32 0.5, %v1074_v63 }
 0x21b   :  { %v1153_v37 = vadd.f32 %v1122_v53, %v1097_v34  ;;  %v1076_v34 = vadd.f32 0.5, %v1073_v33  ;;  %v1098_v33 = vadd.f32 %v1094_v28, %v3466_v27 }
 0x21c   :  { %v1053_v16 = vpop.f32.mrf.mxu2  ;;  %v1080_v4 = vmul.f32 %v1077_v49, %v3570_v8 }
 0x21d   :  { %v1054_v61 = vadd.f32 %v1053_v16, %v3560_v15 }
 0x21e   :  { %v1029_v55 = vpop.f32.mrf.mxu0 }
 0x21f   :  { %v1067_v62 = vadd.f32 %v1066_v0, %v1054_v61  ;;  %v1099_v55 = vadd.f32 %v1095_v50, %v3463_v20 }
 0x221   :  { %2877 = vtanh.f32 %v1067_v62  ;;  %v1148_v52 = vpop.f32.mrf.mxu3 }
 0x222   :  { %v1124_v21 = vpop.f32.mrf.mxu1  ;;  %2879 = vtanh.f32 %v1153_v37  ;;  %v1155_v44 = vadd.f32 %v1148_v52, %v1099_v55 }
 0x223   :  { %2881 = vtanh.f32 %v1041_v39 }
 0x224   :  { %v1055_v16 = vpop.f32.mrf.mxu2 }
 0x227   :  { %v1109_v0 = vpop.f32.mrf.mxu0  ;;  %v2878_v53 = vpop.eup %2877 }
 0x228   :  { %v1152_v61 = vadd.f32 %v1109_v0, %v1096_v38  ;;  %v1081_v25 = vmul.f32 %v2878_v53, %v1076_v34  ;;  %v2880_v62 = vpop.eup %2879 }
 0x229   :  { %v1150_v37 = vpop.f32.mrf.mxu3  ;;  %v2882_v21 = vpop.eup %2881  ;;  %v1160_v63 = vmul.f32 0.5, %v2880_v62 }
 0x22a   :  { %2883 = vtanh.f32 %v1152_v61  ;;  %v3695_v45 = vadd.f32 %v1081_v25, %v1080_v4  ;;  %v1075_v39 = vmul.f32 0.5, %v2882_v21 }
 0x22b   :  { %v1163_v16 = vadd.f32 0.5, %v1160_v63 }
 0x22c   :  { %2885 = vtanh.f32 %v3695_v45  ;;  %v1078_v52 = vadd.f32 0.5, %v1075_v39  ;;  %v4713_v39 = vld [vmem:[#allocation32_spill] sm:$0xff] }
 0x22d   :  { %2887 = vtanh.f32 %v1155_v44  ;;  %v1166_v61 = vmul.f32 %v1163_v16, %v3575_v13  ;;  %v4718_v16 = vld [vmem:[#allocation29_spill] sm:$0xff] }
 0x22f   :  { %v1111_v49 = vpop.f32.mrf.mxu0 }
 0x230   :  { %v1135_v50 = vpop.f32.mrf.mxu2  ;;  %v2884_v8 = vpop.eup %2883  ;;  %v4716_v49 = vld [vmem:[#allocation27_spill] sm:$0xff] }
 0x231   :  { %v1154_v38 = vadd.f32 %v1135_v50, %v1098_v33  ;;  %v1159_v43 = vmul.f32 0.5, %v2884_v8  ;;  %v4714_v50 = vld [vmem:[#allocation21_spill] sm:$0xff]  ;;  %v4717_v8 = vld [vmem:[#allocation42_spill] sm:$0xff] }
 0x232   :  { %v2886_v55 = vpop.eup %2885 }
 0x233   :  { %2889 = vtanh.f32 %v1154_v38  ;;  %v1162_v34 = vadd.f32 0.5, %v1159_v43  ;;  %v2888_v0 = vpop.eup %2887  ;;  %v1084_v53 = vmul.f32 %v2886_v55, %v1078_v52  ;;  %v4715_v38 = vld [vmem:[#allocation38_spill] sm:$0xff]  ;;  %v4719_v43 = vld [vmem:[#allocation31_spill] sm:$0xff]  ;;  %v4720_v52 = vld [vmem:[#allocation36_spill] sm:$0xff] }
 0x234   :  { %v4721_v55 = vld [vmem:[#allocation43_spill] sm:$0xff] }
 0x235   :  { %v1167_v4 = vmul.f32 %v2888_v0, %v1162_v34  ;;  %v1172_v62 = vpack.c.bf16 %v1084_v53, %v1084_v53  ;;  %v4722_v34 = vld [vmem:[#allocation37_spill] sm:$0xff]  ;;  %v4723_v0 = vld [vmem:[#allocation44_spill] sm:$0xff] }
 0x236   :  { %v4724_v53 = vld [vmem:[#allocation40_spill] sm:$0xff] }
 0x237   :  { %v3700_v37 = vadd.f32 %v1167_v4, %v1166_v61  ;;  %1194 = vmatmul.bf16.vlgmr.msrb.gmra.mxu1 %v1172_v62  ;;  %1220 = vmatmul.bf16.vlgmr.msrb.gmra.mxu3 %v1172_v62  ;;  %v4725_v61 = vld [vmem:[#allocation45_spill] sm:$0xff] }
 0x238   :  { %v1137_v25 = vpop.f32.mrf.mxu2  ;;  %1320 = vmatpush.bf16.msrb.mxu1 %v4645_v54  ;;  %1346 = vmatpush.bf16.msrb.mxu3 %v4646_v29  ;;  %v4726_v4 = vld [vmem:[#allocation41_spill] sm:$0xff] }
 0x239   :  { %v2890_v28 = vpop.eup %2889  ;;  %2891 = vtanh.f32 %v3700_v37  ;;  %v4727_v25 = vld [vmem:[#allocation46_spill] sm:$0xff] }
 0x23a   :  { %v1161_v44 = vmul.f32 0.5, %v2890_v28  ;;  %v4729_v28 = vld [vmem:[#allocation47_spill] sm:$0xff] }
 0x23c   :  { %1321 = vmatpush.bf16.msrb.mxu1 %v4647_v6  ;;  %1347 = vmatpush.bf16.msrb.mxu3 %v4648_v58  ;;  %v1164_v13 = vadd.f32 0.5, %v1161_v44  ;;  %v4730_v44 = vld [vmem:[#allocation60_spill] sm:$0xff] }
 0x23f   :  { %v2892_v21 = vpop.eup %2891 }
 0x240   :  { %v1170_v63 = vmul.f32 %v2892_v21, %v1164_v13  ;;  %1322 = vmatpush.bf16.msrb.mxu1 %v4649_v40  ;;  %1348 = vmatpush.bf16.msrb.mxu3 %v4650_v42  ;;  %v4731_v13 = vld [vmem:[#allocation48_spill] sm:$0xff]  ;;  %v4732_v21 = vld [vmem:[#allocation63_spill] sm:$0xff] }
 0x242   :  { %v1171_v33 = vpack.c.bf16 %v1170_v63, %v1170_v63  ;;  %v4733_v63 = vld [vmem:[#allocation49_spill] sm:$0xff] }
 0x244   :  { %1181 = vmatmul.bf16.vlgmr.msrb.gmra.mxu0 %v1171_v33  ;;  %1207 = vmatmul.bf16.vlgmr.msrb.gmra.mxu2 %v1171_v33 }
 0x245   :  { %1307 = vmatpush.bf16.msrb.mxu0 %v3118_v5  ;;  %1323 = vmatpush.bf16.msrb.mxu1 %v4651_v22 }
 0x246   :  { %1333 = vmatpush.bf16.msrb.mxu2 %v3122_v10  ;;  %1349 = vmatpush.bf16.msrb.mxu3 %v4652_v41 }
 0x247   :  { %1246 = vmatmul.bf16.vlgmr.msra.gmra.mxu1 %v1172_v62  ;;  %1272 = vmatmul.bf16.vlgmr.msra.gmra.mxu3 %v1172_v62  ;;  %v4728_v62 = vld [vmem:[#allocation59_spill] sm:$0xff] }
 0x249   :  { %1308 = vmatpush.bf16.msrb.mxu0 %v3129_v18  ;;  %1324 = vmatpush.bf16.msrb.mxu1 %v4653_v7 }
 0x24a   :  { %1334 = vmatpush.bf16.msrb.mxu2 %v3134_v23  ;;  %1350 = vmatpush.bf16.msrb.mxu3 %v4654_v57 }
 0x24d   :  { %1309 = vmatpush.bf16.msrb.mxu0 %v3139_v31  ;;  %1325 = vmatpush.bf16.msrb.mxu1 %v4655_v32 }
 0x24e   :  { %1335 = vmatpush.bf16.msrb.mxu2 %v3145_v36  ;;  %1351 = vmatpush.bf16.msrb.mxu3 %v4656_v35 }
 0x251   :  { %1310 = vmatpush.bf16.msrb.mxu0 %v3151_v46  ;;  %1326 = vmatpush.bf16.msrb.mxu1 %v4657_v17 }
 0x252   :  { %1336 = vmatpush.bf16.msrb.mxu2 %v3157_v48  ;;  %1352 = vmatpush.bf16.msrb.mxu3 %v4658_v51 }
 0x254   :  { %1233 = vmatmul.bf16.vlgmr.msra.gmra.mxu0 %v1171_v33  ;;  %1259 = vmatmul.bf16.vlgmr.msra.gmra.mxu2 %v1171_v33 }
 0x255   :  { %1311 = vmatpush.bf16.msrb.mxu0 %v4611_v47  ;;  %1327 = vmatpush.bf16.msrb.mxu1 %v4659_v59 }
 0x256   :  { %1337 = vmatpush.bf16.msrb.mxu2 %v4612_v12  ;;  %1353 = vmatpush.bf16.msrb.mxu3 %v4713_v39 }
 0x258   :  { %1328 = vmatmul.bf16.vlgmr.msrb.gmra.mxu1 %v1171_v33 }
 0x259   :  { %1393 = vmatpush.bf16.msra.mxu1 %v4661_v9  ;;  %1354 = vmatmul.bf16.vlgmr.msrb.gmra.mxu3 %v1171_v33 }
 0x25a   :  { %1419 = vmatpush.bf16.msra.mxu3 %v4662_v24  ;;  %1312 = vmatpush.bf16.msrb.mxu0 %v4714_v50 }
 0x25b   :  { %1338 = vmatpush.bf16.msrb.mxu2 %v4615_v30 }
 0x25d   :  { %1394 = vmatpush.bf16.msra.mxu1 %v4663_v3 }
 0x25e   :  { %1420 = vmatpush.bf16.msra.mxu3 %v4715_v38  ;;  %1313 = vmatpush.bf16.msrb.mxu0 %v4616_v56 }
 0x25f   :  { %1339 = vmatpush.bf16.msrb.mxu2 %v4716_v49 }
 0x261   :  { %1395 = vmatpush.bf16.msra.mxu1 %v4665_v19 }
 0x262   :  { %1421 = vmatpush.bf16.msra.mxu3 %v4717_v8  ;;  %1314 = vmatpush.bf16.msrb.mxu0 %v4718_v16 }
 0x263   :  { %1340 = vmatpush.bf16.msrb.mxu2 %v4719_v43 }
 0x265   :  { %1396 = vmatpush.bf16.msra.mxu1 %v4721_v55  ;;  %1315 = vmatmul.bf16.vlgmr.msrb.gmra.mxu0 %v1171_v33 }
 0x266   :  { %1380 = vmatpush.bf16.msra.mxu0 %v4720_v52  ;;  %1422 = vmatpush.bf16.msra.mxu3 %v4723_v0  ;;  %v4778_v52 = vld [vmem:[#allocation17_spill] sm:$0xff] }
 0x267   :  { %1406 = vmatpush.bf16.msra.mxu2 %v4722_v34 }
 0x268   :  { %1341 = vmatmul.bf16.vlgmr.msrb.gmra.mxu2 %v1171_v33  ;;  %v4734_v33 = vld [vmem:[#allocation64_spill] sm:$0xff] }
 0x269   :  { %1397 = vmatpush.bf16.msra.mxu1 %v4725_v61  ;;  %v4736_v61 = vld [vmem:[#allocation67_spill] sm:$0xff] }
 0x26a   :  { %1381 = vmatpush.bf16.msra.mxu0 %v4724_v53  ;;  %1423 = vmatpush.bf16.msra.mxu3 %v4727_v25  ;;  %v4735_v53 = vld [vmem:[#allocation50_spill] sm:$0xff]  ;;  %v4738_v25 = vld [vmem:[#allocation68_spill] sm:$0xff] }
 0x26b   :  { %1407 = vmatpush.bf16.msra.mxu2 %v4726_v4  ;;  %v4737_v4 = vld [vmem:[#allocation51_spill] sm:$0xff] }
 0x26d   :  { %1398 = vmatpush.bf16.msra.mxu1 %v4729_v28  ;;  %v4740_v28 = vld [vmem:[#allocation52_spill] sm:$0xff] }
 0x26e   :  { %1382 = vmatpush.bf16.msra.mxu0 %v4728_v62  ;;  %1424 = vmatpush.bf16.msra.mxu3 %v4731_v13  ;;  %v4739_v62 = vld [vmem:[#allocation53_spill] sm:$0xff]  ;;  %v4742_v13 = vld [vmem:[#allocation71_spill] sm:$0xff] }
 0x26f   :  { %1408 = vmatpush.bf16.msra.mxu2 %v4730_v44  ;;  %v4741_v44 = vld [vmem:[#allocation54_spill] sm:$0xff] }
 0x271   :  { %1399 = vmatpush.bf16.msra.mxu1 %v4733_v63  ;;  %v4744_v63 = vld [vmem:[#allocation55_spill] sm:$0xff] }
 0x272   :  { %1383 = vmatpush.bf16.msra.mxu0 %v4732_v21  ;;  %1425 = vmatpush.bf16.msra.mxu3 %v4735_v53  ;;  %v4743_v21 = vld [vmem:[#allocation72_spill] sm:$0xff]  ;;  %v4746_v53 = vld [vmem:[#allocation75_spill] sm:$0xff] }
 0x273   :  { %1409 = vmatpush.bf16.msra.mxu2 %v4734_v33  ;;  %v4745_v33 = vld [vmem:[#allocation56_spill] sm:$0xff] }
 0x275   :  { %1400 = vmatpush.bf16.msra.mxu1 %v4737_v4  ;;  %v4748_v4 = vld [vmem:[#allocation57_spill] sm:$0xff] }
 0x276   :  { %1384 = vmatpush.bf16.msra.mxu0 %v4736_v61  ;;  %1426 = vmatpush.bf16.msra.mxu3 %v4739_v62  ;;  %v4747_v61 = vld [vmem:[#allocation76_spill] sm:$0xff]  ;;  %v4750_v62 = vld [vmem:[#allocation79_spill] sm:$0xff] }
 0x277   :  { %1410 = vmatpush.bf16.msra.mxu2 %v4738_v25  ;;  %v4749_v25 = vld [vmem:[#allocation58_spill] sm:$0xff] }
 0x279   :  { %1445 = vmatpush.bf16.msrb.mxu1 %v4740_v28  ;;  %v4751_v28 = vld [vmem:[#allocation80_spill] sm:$0xff] }
 0x27a   :  { %1471 = vmatpush.bf16.msrb.mxu3 %v4741_v44  ;;  %1385 = vmatpush.bf16.msra.mxu0 %v4742_v13  ;;  %v4752_v44 = vld [vmem:[#allocation81_spill] sm:$0xff] }
 0x27b   :  { %1411 = vmatpush.bf16.msra.mxu2 %v4743_v21  ;;  %v4753_v13 = vld [vmem:[#allocation61_spill] sm:$0xff]  ;;  %v4754_v21 = vld [vmem:[#allocation82_spill] sm:$0xff] }
 0x27d   :  { %1446 = vmatpush.bf16.msrb.mxu1 %v4744_v63  ;;  %v4755_v63 = vld [vmem:[#allocation62_spill] sm:$0xff] }
 0x27e   :  { %1472 = vmatpush.bf16.msrb.mxu3 %v4745_v33  ;;  %1386 = vmatpush.bf16.msra.mxu0 %v4746_v53  ;;  %v4756_v33 = vld [vmem:[#allocation83_spill] sm:$0xff]  ;;  %v4757_v53 = vld [vmem:[#allocation65_spill] sm:$0xff] }
 0x27f   :  { %1412 = vmatpush.bf16.msra.mxu2 %v4747_v61  ;;  %v4758_v61 = vld [vmem:[#allocation84_spill] sm:$0xff] }
 0x281   :  { %1447 = vmatpush.bf16.msrb.mxu1 %v4748_v4  ;;  %v4759_v4 = vld [vmem:[#allocation66_spill] sm:$0xff] }
 0x282   :  { %1473 = vmatpush.bf16.msrb.mxu3 %v4749_v25  ;;  %1387 = vmatpush.bf16.msra.mxu0 %v4750_v62  ;;  %v4760_v25 = vld [vmem:[#allocation85_spill] sm:$0xff] }
 0x283   :  { %1413 = vmatpush.bf16.msra.mxu2 %v4751_v28  ;;  %v4761_v62 = vld [vmem:[#allocation69_spill] sm:$0xff]  ;;  %v4762_v28 = vld [vmem:[#allocation86_spill] sm:$0xff] }
 0x285   :  { %1448 = vmatpush.bf16.msrb.mxu1 %v4753_v13  ;;  %v4764_v13 = vld [vmem:[#allocation87_spill] sm:$0xff] }
 0x286   :  { %1432 = vmatpush.bf16.msrb.mxu0 %v4752_v44  ;;  %1474 = vmatpush.bf16.msrb.mxu3 %v4755_v63  ;;  %v4763_v44 = vld [vmem:[#allocation70_spill] sm:$0xff]  ;;  %v4766_v63 = vld [vmem:[#allocation88_spill] sm:$0xff] }
 0x287   :  { %1458 = vmatpush.bf16.msrb.mxu2 %v4754_v21  ;;  %v4765_v21 = vld [vmem:[#allocation73_spill] sm:$0xff] }
 0x289   :  { %1449 = vmatpush.bf16.msrb.mxu1 %v4757_v53  ;;  %v4768_v53 = vld [vmem:[#allocation89_spill] sm:$0xff] }
 0x28a   :  { %1433 = vmatpush.bf16.msrb.mxu0 %v4756_v33  ;;  %1475 = vmatpush.bf16.msrb.mxu3 %v4759_v4  ;;  %v4767_v33 = vld [vmem:[#allocation74_spill] sm:$0xff] }
 0x28b   :  { %1459 = vmatpush.bf16.msrb.mxu2 %v4758_v61  ;;  %v4769_v61 = vld [vmem:[#allocation77_spill] sm:$0xff]  ;;  %v4770_v4 = vld [vmem:[#allocation90_spill] sm:$0xff] }
 0x28d   :  { %1450 = vmatpush.bf16.msrb.mxu1 %v4761_v62  ;;  %v4772_v62 = vld [vmem:[#allocation93_spill] sm:$0xff] }
 0x28e   :  { %1434 = vmatpush.bf16.msrb.mxu0 %v4760_v25  ;;  %1476 = vmatpush.bf16.msrb.mxu3 %v4763_v44  ;;  %v4771_v25 = vld [vmem:[#allocation78_spill] sm:$0xff]  ;;  %v4774_v44 = vld [vmem:[#allocation97_spill] sm:$0xff] }
 0x28f   :  { %1460 = vmatpush.bf16.msrb.mxu2 %v4762_v28  ;;  %v4773_v28 = vld [vmem:[#allocation94_spill] sm:$0xff] }
 0x291   :  { %1451 = vmatpush.bf16.msrb.mxu1 %v4765_v21  ;;  %v4776_v21 = vld [vmem:[#allocation99_spill] sm:$0xff] }
 0x292   :  { %1435 = vmatpush.bf16.msrb.mxu0 %v4764_v13  ;;  %1477 = vmatpush.bf16.msrb.mxu3 %v4767_v33  ;;  %v4775_v13 = vld [vmem:[#allocation98_spill] sm:$0xff] }
 0x293   :  { %1461 = vmatpush.bf16.msrb.mxu2 %v4766_v63  ;;  %v4777_v63 = vld [vmem:[#allocation100_spill] sm:$0xff] }
 0x295   :  { %1452 = vmatpush.bf16.msrb.mxu1 %v4769_v61 }
 0x296   :  { %1436 = vmatpush.bf16.msrb.mxu0 %v4768_v53  ;;  %1478 = vmatpush.bf16.msrb.mxu3 %v4771_v25 }
 0x297   :  { %1462 = vmatpush.bf16.msrb.mxu2 %v4770_v4 }
 0x29a   :  { %1437 = vmatpush.bf16.msrb.mxu0 %v4772_v62 }
 0x29b   :  { %1463 = vmatpush.bf16.msrb.mxu2 %v4773_v28 }
 0x29e   :  { %1438 = vmatpush.bf16.msrb.mxu0 %v4774_v44 }
 0x29f   :  { %1464 = vmatpush.bf16.msrb.mxu2 %v4775_v13 }
 0x2a2   :  { %1439 = vmatpush.bf16.msrb.mxu0 %v4776_v21 }
 0x2a3   :  { %1465 = vmatpush.bf16.msrb.mxu2 %v4777_v63  ;;  %v1297_v63 = vpop.permute.xlu1 %1296 }
 0x2b4   :  { %v1195_v33 = vpop.f32.mrf.mxu1 }
 0x2ba   :  { %v1221_v53 = vpop.f32.mrf.mxu3 }
 0x2bc   :  { %v1197_v0 = vpop.f32.mrf.mxu1 }
 0x2bd   :  { %v4779_v0 = vld [vmem:[#allocation92_spill] sm:$0xff] }
 0x2be   :  { %v1300_v49 = vmul.f32 %v1297_v63, %v4779_v0 }
 0x2c1   :  { %v1182_v61 = vpop.f32.mrf.mxu0 }
 0x2c2   :  { %v1223_v34 = vpop.f32.mrf.mxu3  ;;  %v1183_v28 = vadd.f32 %v1182_v61, %v4709_v14 }
 0x2c4   :  { %v1247_v4 = vpop.f32.mrf.mxu1  ;;  %v1196_v8 = vadd.f32 %v1195_v33, %v1183_v28 }
 0x2c7   :  { %v1208_v55 = vpop.f32.mrf.mxu2 }
 0x2c8   :  { %v1209_v62 = vadd.f32 %v1208_v55, %v4778_v52  ;;  %v4780_v55 = vld [vmem:[#allocation96_spill] sm:$0xff] }
 0x2c9   :  { %v1184_v25 = vpop.f32.mrf.mxu0  ;;  %v1304_v52 = vadd.f32 %v1300_v49, %v4780_v55 }
 0x2ca   :  { %v1273_v43 = vpop.f32.mrf.mxu3  ;;  %v1222_v16 = vadd.f32 %v1221_v53, %v1209_v62 }
 0x2cc   :  { %v1249_v44 = vpop.f32.mrf.mxu1  ;;  %2893 = vtanh.f32 %v1222_v16 }
 0x2cd   :  { %2895 = vtanh.f32 %v1196_v8  ;;  %v1299_v8 = vmul.f32 %v1297_v63, %v4643_v11 }
 0x2cf   :  { %v1210_v13 = vpop.f32.mrf.mxu2 }
 0x2d1   :  { %v1234_v21 = vpop.f32.mrf.mxu0 }
 0x2d2   :  { %v1275_v19 = vpop.f32.mrf.mxu3  ;;  %v1235_v56 = vadd.f32 %v1234_v21, %v4712_v26  ;;  %v2894_v38 = vpop.eup %2893  ;;  %v1302_v21 = vmul.f32 %v1297_v63, %v3451_v60 }
 0x2d3   :  { %v2896_v53 = vpop.eup %2895  ;;  %v1281_v13 = vmul.f32 0.5, %v2894_v38 }
 0x2d4   :  { %v1248_v16 = vadd.f32 %v1247_v4, %v1235_v56  ;;  %v1280_v33 = vmul.f32 0.5, %v2896_v53  ;;  %v1306_v38 = vadd.f32 %v1302_v21, %v3463_v20 }
 0x2d5   :  { %v1329_v34 = vpop.f32.mrf.mxu1  ;;  %v1284_v26 = vadd.f32 0.5, %v1281_v13 }
 0x2d6   :  { %v1360_v62 = vadd.f32 %v1329_v34, %v1304_v52  ;;  %v1301_v34 = vmul.f32 %v1297_v63, %v3455_v2 }
 0x2d7   :  { %v1260_v25 = vpop.f32.mrf.mxu2 }
 0x2d8   :  { %v1261_v61 = vadd.f32 %v1260_v25, %v3560_v15  ;;  %v1303_v25 = vadd.f32 %v1299_v8, %v4644_v1 }
 0x2d9   :  { %v1236_v44 = vpop.f32.mrf.mxu0 }
 0x2da   :  { %v1274_v28 = vadd.f32 %v1273_v43, %v1261_v61  ;;  %v1283_v44 = vadd.f32 0.5, %v1280_v33  ;;  %v1287_v43 = vmul.f32 %v1284_v26, %v3695_v45 }
 0x2dc   :  { %2897 = vtanh.f32 %v1274_v28  ;;  %v1355_v19 = vpop.f32.mrf.mxu3 }
 0x2dd   :  { %v1331_v0 = vpop.f32.mrf.mxu1  ;;  %2899 = vtanh.f32 %v1360_v62  ;;  %v1362_v61 = vadd.f32 %v1355_v19, %v1306_v38 }
 0x2de   :  { %2901 = vtanh.f32 %v1248_v16  ;;  %v1305_v16 = vadd.f32 %v1301_v34, %v3466_v27 }
 0x2df   :  { %v1262_v49 = vpop.f32.mrf.mxu2 }
 0x2e2   :  { %v1316_v15 = vpop.f32.mrf.mxu0  ;;  %v2898_v52 = vpop.eup %2897 }
 0x2e3   :  { %v1359_v56 = vadd.f32 %v1316_v15, %v1303_v25  ;;  %v1288_v4 = vmul.f32 %v2898_v52, %v1283_v44  ;;  %v2900_v0 = vpop.eup %2899 }
 0x2e4   :  { %v1357_v53 = vpop.f32.mrf.mxu3  ;;  %v2902_v62 = vpop.eup %2901  ;;  %v1367_v13 = vmul.f32 0.5, %v2900_v0 }
 0x2e5   :  { %2903 = vtanh.f32 %v1359_v56  ;;  %v3811_v28 = vadd.f32 %v1288_v4, %v1287_v43  ;;  %v1282_v8 = vmul.f32 0.5, %v2902_v62 }
 0x2e6   :  { %v1370_v21 = vadd.f32 0.5, %v1367_v13 }
 0x2e7   :  { %2905 = vtanh.f32 %v3811_v28  ;;  %v1285_v19 = vadd.f32 0.5, %v1282_v8  ;;  %v2733_v8 = vld [vmem:[%s4297_s0 + $0x28] sm:$0xff] }
 0x2e8   :  { %2907 = vtanh.f32 %v1362_v61  ;;  %v1373_v38 = vmul.f32 %v1370_v21, %v3700_v37  ;;  %v4785_v21 = vld [vmem:[#allocation42_spill] sm:$0xff] }
 0x2ea   :  { %v1318_v26 = vpop.f32.mrf.mxu0 }
 0x2eb   :  { %v1342_v15 = vpop.f32.mrf.mxu2  ;;  %v2904_v45 = vpop.eup %2903  ;;  %v4783_v26 = vld [vmem:[#allocation27_spill] sm:$0xff] }
 0x2ec   :  { %v1361_v33 = vadd.f32 %v1342_v15, %v1305_v16  ;;  %v1366_v63 = vmul.f32 0.5, %v2904_v45  ;;  %v2732_v16 = vld [vmem:[%s4297_s0 + $0x20] sm:$0xff]  ;;  %v4781_v15 = vld [vmem:[#allocation38_spill] sm:$0xff]  ;;  %v4784_v45 = vld [vmem:[#allocation39_spill] sm:$0xff] }
 0x2ed   :  { %v2906_v49 = vpop.eup %2905  ;;  %1503 = vperm.xlu2 %2840, %v2732_v16   ;;  %v4801_v16 = vld [vmem:[#allocation49_spill] sm:$0xff] }
 0x2ee   :  { %2909 = vtanh.f32 %v1361_v33  ;;  %v1369_v25 = vadd.f32 0.5, %v1366_v63  ;;  %v2908_v44 = vpop.eup %2907  ;;  %v1291_v52 = vmul.f32 %v2906_v49, %v1285_v19  ;;  %v4782_v33 = vld [vmem:[#allocation25_spill] sm:$0xff]  ;;  %v4787_v19 = vld [vmem:[#allocation31_spill] sm:$0xff]  ;;  %v4788_v49 = vld [vmem:[#allocation36_spill] sm:$0xff] }
 0x2ef   :  { %v4786_v63 = vld [vmem:[#allocation29_spill] sm:$0xff] }
 0x2f0   :  { %v1374_v56 = vmul.f32 %v2908_v44, %v1369_v25  ;;  %v1379_v4 = vpack.c.bf16 %v1291_v52, %v1291_v52  ;;  %v4789_v25 = vld [vmem:[#allocation43_spill] sm:$0xff]  ;;  %v4790_v44 = vld [vmem:[#allocation37_spill] sm:$0xff]  ;;  %v4791_v52 = vld [vmem:[#allocation44_spill] sm:$0xff] }
 0x2f2   :  { %v3816_v0 = vadd.f32 %v1374_v56, %v1373_v38  ;;  %1401 = vmatmul.bf16.vlgmr.msra.gmra.mxu1 %v1379_v4  ;;  %1427 = vmatmul.bf16.vlgmr.msra.gmra.mxu3 %v1379_v4  ;;  %v4792_v38 = vld [vmem:[#allocation40_spill] sm:$0xff]  ;;  %v4793_v56 = vld [vmem:[#allocation45_spill] sm:$0xff] }
 0x2f3   :  { %v1344_v43 = vpop.f32.mrf.mxu2  ;;  %1527 = vmatpush.bf16.msra.mxu1 %v4645_v54  ;;  %1553 = vmatpush.bf16.msra.mxu3 %v4646_v29 }
 0x2f4   :  { %v2910_v34 = vpop.eup %2909  ;;  %2911 = vtanh.f32 %v3816_v0  ;;  %v4794_v43 = vld [vmem:[#allocation41_spill] sm:$0xff] }
 0x2f5   :  { %v1368_v61 = vmul.f32 0.5, %v2910_v34  ;;  %1710 = vperm.xlu2 %2840, %v2733_v8   ;;  %v4796_v34 = vld [vmem:[#allocation59_spill] sm:$0xff]  ;;  %v4803_v8 = vld [vmem:[#allocation50_spill] sm:$0xff] }
 0x2f7   :  { %1528 = vmatpush.bf16.msra.mxu1 %v4647_v6  ;;  %1554 = vmatpush.bf16.msra.mxu3 %v4648_v58  ;;  %v1371_v37 = vadd.f32 0.5, %v1368_v61  ;;  %v4797_v61 = vld [vmem:[#allocation47_spill] sm:$0xff] }
 0x2fa   :  { %v2912_v53 = vpop.eup %2911 }
 0x2fb   :  { %v1377_v62 = vmul.f32 %v2912_v53, %v1371_v37  ;;  %1529 = vmatpush.bf16.msra.mxu1 %v4649_v40  ;;  %1555 = vmatpush.bf16.msra.mxu3 %v4650_v42  ;;  %v4798_v37 = vld [vmem:[#allocation60_spill] sm:$0xff] }
 0x2fc   :  { %v4799_v53 = vld [vmem:[#allocation48_spill] sm:$0xff] }
 0x2fd   :  { %v1378_v13 = vpack.c.bf16 %v1377_v62, %v1377_v62  ;;  %v4800_v62 = vld [vmem:[#allocation63_spill] sm:$0xff] }
 0x2ff   :  { %1388 = vmatmul.bf16.vlgmr.msra.gmra.mxu0 %v1378_v13  ;;  %1414 = vmatmul.bf16.vlgmr.msra.gmra.mxu2 %v1378_v13 }
 0x300   :  { %1514 = vmatpush.bf16.msra.mxu0 %v3118_v5  ;;  %1530 = vmatpush.bf16.msra.mxu1 %v4651_v22 }
 0x301   :  { %1540 = vmatpush.bf16.msra.mxu2 %v3122_v10  ;;  %1556 = vmatpush.bf16.msra.mxu3 %v4652_v41 }
 0x302   :  { %1453 = vmatmul.bf16.vlgmr.msrb.gmra.mxu1 %v1379_v4  ;;  %1479 = vmatmul.bf16.vlgmr.msrb.gmra.mxu3 %v1379_v4  ;;  %v4795_v4 = vld [vmem:[#allocation46_spill] sm:$0xff] }
 0x304   :  { %1515 = vmatpush.bf16.msra.mxu0 %v3129_v18  ;;  %1531 = vmatpush.bf16.msra.mxu1 %v4653_v7 }
 0x305   :  { %1541 = vmatpush.bf16.msra.mxu2 %v3134_v23  ;;  %1557 = vmatpush.bf16.msra.mxu3 %v4654_v57 }
 0x308   :  { %1516 = vmatpush.bf16.msra.mxu0 %v3139_v31  ;;  %1532 = vmatpush.bf16.msra.mxu1 %v4655_v32 }
 0x309   :  { %1542 = vmatpush.bf16.msra.mxu2 %v3145_v36  ;;  %1558 = vmatpush.bf16.msra.mxu3 %v4656_v35 }
 0x30c   :  { %1517 = vmatpush.bf16.msra.mxu0 %v3151_v46  ;;  %1533 = vmatpush.bf16.msra.mxu1 %v4657_v17 }
 0x30d   :  { %1543 = vmatpush.bf16.msra.mxu2 %v3157_v48  ;;  %1559 = vmatpush.bf16.msra.mxu3 %v4658_v51 }
 0x30f   :  { %1440 = vmatmul.bf16.vlgmr.msrb.gmra.mxu0 %v1378_v13  ;;  %1466 = vmatmul.bf16.vlgmr.msrb.gmra.mxu2 %v1378_v13 }
 0x310   :  { %1518 = vmatpush.bf16.msra.mxu0 %v4611_v47  ;;  %1534 = vmatpush.bf16.msra.mxu1 %v4659_v59 }
 0x311   :  { %1544 = vmatpush.bf16.msra.mxu2 %v4612_v12  ;;  %1560 = vmatpush.bf16.msra.mxu3 %v4713_v39 }
 0x313   :  { %1535 = vmatmul.bf16.vlgmr.msra.gmra.mxu1 %v1378_v13 }
 0x314   :  { %1600 = vmatpush.bf16.msrb.mxu1 %v4661_v9  ;;  %1561 = vmatmul.bf16.vlgmr.msra.gmra.mxu3 %v1378_v13 }
 0x315   :  { %1626 = vmatpush.bf16.msrb.mxu3 %v4662_v24  ;;  %1519 = vmatpush.bf16.msra.mxu0 %v4714_v50 }
 0x316   :  { %1545 = vmatpush.bf16.msra.mxu2 %v4615_v30 }
 0x318   :  { %1601 = vmatpush.bf16.msrb.mxu1 %v4663_v3 }
 0x319   :  { %1627 = vmatpush.bf16.msrb.mxu3 %v4781_v15  ;;  %1520 = vmatpush.bf16.msra.mxu0 %v4782_v33  ;;  %v4849_v15 = vld [vmem:[#allocation101_spill] sm:$0xff] }
 0x31a   :  { %1546 = vmatpush.bf16.msra.mxu2 %v4783_v26 }
 0x31c   :  { %1602 = vmatpush.bf16.msrb.mxu1 %v4784_v45 }
 0x31d   :  { %1628 = vmatpush.bf16.msrb.mxu3 %v4785_v21  ;;  %1521 = vmatpush.bf16.msra.mxu0 %v4786_v63 }
 0x31e   :  { %1547 = vmatpush.bf16.msra.mxu2 %v4787_v19 }
 0x320   :  { %1603 = vmatpush.bf16.msrb.mxu1 %v4789_v25  ;;  %1522 = vmatmul.bf16.vlgmr.msra.gmra.mxu0 %v1378_v13  ;;  %v4846_v25 = vld [vmem:[#allocation17_spill] sm:$0xff] }
 0x321   :  { %1587 = vmatpush.bf16.msrb.mxu0 %v4788_v49  ;;  %1629 = vmatpush.bf16.msrb.mxu3 %v4791_v52 }
 0x322   :  { %1613 = vmatpush.bf16.msrb.mxu2 %v4790_v44 }
 0x323   :  { %1548 = vmatmul.bf16.vlgmr.msra.gmra.mxu2 %v1378_v13  ;;  %v4802_v13 = vld [vmem:[#allocation64_spill] sm:$0xff] }
 0x324   :  { %1604 = vmatpush.bf16.msrb.mxu1 %v4793_v56  ;;  %v4804_v56 = vld [vmem:[#allocation67_spill] sm:$0xff] }
 0x325   :  { %1588 = vmatpush.bf16.msrb.mxu0 %v4792_v38  ;;  %1630 = vmatpush.bf16.msrb.mxu3 %v4795_v4  ;;  %v4806_v4 = vld [vmem:[#allocation68_spill] sm:$0xff] }
 0x326   :  { %1614 = vmatpush.bf16.msrb.mxu2 %v4794_v43  ;;  %v4805_v43 = vld [vmem:[#allocation51_spill] sm:$0xff] }
 0x328   :  { %1605 = vmatpush.bf16.msrb.mxu1 %v4797_v61  ;;  %v4808_v61 = vld [vmem:[#allocation52_spill] sm:$0xff] }
 0x329   :  { %1589 = vmatpush.bf16.msrb.mxu0 %v4796_v34  ;;  %1631 = vmatpush.bf16.msrb.mxu3 %v4799_v53  ;;  %v4807_v34 = vld [vmem:[#allocation53_spill] sm:$0xff]  ;;  %v4810_v53 = vld [vmem:[#allocation71_spill] sm:$0xff] }
 0x32a   :  { %1615 = vmatpush.bf16.msrb.mxu2 %v4798_v37  ;;  %v4809_v37 = vld [vmem:[#allocation54_spill] sm:$0xff] }
 0x32c   :  { %1606 = vmatpush.bf16.msrb.mxu1 %v4801_v16  ;;  %v4812_v16 = vld [vmem:[#allocation55_spill] sm:$0xff] }
 0x32d   :  { %1590 = vmatpush.bf16.msrb.mxu0 %v4800_v62  ;;  %1632 = vmatpush.bf16.msrb.mxu3 %v4803_v8  ;;  %v4811_v62 = vld [vmem:[#allocation72_spill] sm:$0xff]  ;;  %v4814_v8 = vld [vmem:[#allocation75_spill] sm:$0xff] }
 0x32e   :  { %1616 = vmatpush.bf16.msrb.mxu2 %v4802_v13  ;;  %v4813_v13 = vld [vmem:[#allocation56_spill] sm:$0xff] }
 0x330   :  { %1607 = vmatpush.bf16.msrb.mxu1 %v4805_v43  ;;  %v4816_v43 = vld [vmem:[#allocation57_spill] sm:$0xff] }
 0x331   :  { %1591 = vmatpush.bf16.msrb.mxu0 %v4804_v56  ;;  %1633 = vmatpush.bf16.msrb.mxu3 %v4807_v34  ;;  %v4815_v56 = vld [vmem:[#allocation76_spill] sm:$0xff]  ;;  %v4818_v34 = vld [vmem:[#allocation79_spill] sm:$0xff] }
 0x332   :  { %1617 = vmatpush.bf16.msrb.mxu2 %v4806_v4  ;;  %v4817_v4 = vld [vmem:[#allocation58_spill] sm:$0xff] }
 0x334   :  { %1652 = vmatpush.bf16.msra.mxu1 %v4808_v61  ;;  %v4819_v61 = vld [vmem:[#allocation80_spill] sm:$0xff] }
 0x335   :  { %1678 = vmatpush.bf16.msra.mxu3 %v4809_v37  ;;  %1592 = vmatpush.bf16.msrb.mxu0 %v4810_v53  ;;  %v4820_v37 = vld [vmem:[#allocation81_spill] sm:$0xff] }
 0x336   :  { %1618 = vmatpush.bf16.msrb.mxu2 %v4811_v62  ;;  %v4821_v53 = vld [vmem:[#allocation61_spill] sm:$0xff]  ;;  %v4822_v62 = vld [vmem:[#allocation82_spill] sm:$0xff] }
 0x338   :  { %1653 = vmatpush.bf16.msra.mxu1 %v4812_v16  ;;  %v4823_v16 = vld [vmem:[#allocation62_spill] sm:$0xff] }
 0x339   :  { %1679 = vmatpush.bf16.msra.mxu3 %v4813_v13  ;;  %1593 = vmatpush.bf16.msrb.mxu0 %v4814_v8  ;;  %v4824_v13 = vld [vmem:[#allocation83_spill] sm:$0xff]  ;;  %v4825_v8 = vld [vmem:[#allocation65_spill] sm:$0xff] }
 0x33a   :  { %1619 = vmatpush.bf16.msrb.mxu2 %v4815_v56  ;;  %v4826_v56 = vld [vmem:[#allocation84_spill] sm:$0xff] }
 0x33c   :  { %1654 = vmatpush.bf16.msra.mxu1 %v4816_v43  ;;  %v4827_v43 = vld [vmem:[#allocation66_spill] sm:$0xff] }
 0x33d   :  { %1680 = vmatpush.bf16.msra.mxu3 %v4817_v4  ;;  %1594 = vmatpush.bf16.msrb.mxu0 %v4818_v34  ;;  %v4828_v4 = vld [vmem:[#allocation85_spill] sm:$0xff] }
 0x33e   :  { %1620 = vmatpush.bf16.msrb.mxu2 %v4819_v61  ;;  %v4829_v34 = vld [vmem:[#allocation69_spill] sm:$0xff]  ;;  %v4830_v61 = vld [vmem:[#allocation86_spill] sm:$0xff] }
 0x340   :  { %1655 = vmatpush.bf16.msra.mxu1 %v4821_v53  ;;  %v4832_v53 = vld [vmem:[#allocation87_spill] sm:$0xff] }
 0x341   :  { %1639 = vmatpush.bf16.msra.mxu0 %v4820_v37  ;;  %1681 = vmatpush.bf16.msra.mxu3 %v4823_v16  ;;  %v4831_v37 = vld [vmem:[#allocation70_spill] sm:$0xff]  ;;  %v4834_v16 = vld [vmem:[#allocation88_spill] sm:$0xff] }
 0x342   :  { %1665 = vmatpush.bf16.msra.mxu2 %v4822_v62  ;;  %v4833_v62 = vld [vmem:[#allocation73_spill] sm:$0xff] }
 0x344   :  { %1656 = vmatpush.bf16.msra.mxu1 %v4825_v8  ;;  %v4836_v8 = vld [vmem:[#allocation89_spill] sm:$0xff] }
 0x345   :  { %1640 = vmatpush.bf16.msra.mxu0 %v4824_v13  ;;  %1682 = vmatpush.bf16.msra.mxu3 %v4827_v43  ;;  %v4835_v13 = vld [vmem:[#allocation74_spill] sm:$0xff] }
 0x346   :  { %1666 = vmatpush.bf16.msra.mxu2 %v4826_v56  ;;  %v4837_v56 = vld [vmem:[#allocation77_spill] sm:$0xff]  ;;  %v4838_v43 = vld [vmem:[#allocation90_spill] sm:$0xff] }
 0x347   :  { %v1504_v63 = vpop.permute.xlu2 %1503 }
 0x348   :  { %1657 = vmatpush.bf16.msra.mxu1 %v4829_v34  ;;  %v4840_v34 = vld [vmem:[#allocation93_spill] sm:$0xff] }
 0x349   :  { %1641 = vmatpush.bf16.msra.mxu0 %v4828_v4  ;;  %1683 = vmatpush.bf16.msra.mxu3 %v4831_v37  ;;  %v4839_v4 = vld [vmem:[#allocation78_spill] sm:$0xff]  ;;  %v4842_v37 = vld [vmem:[#allocation97_spill] sm:$0xff] }
 0x34a   :  { %1667 = vmatpush.bf16.msra.mxu2 %v4830_v61  ;;  %v4841_v61 = vld [vmem:[#allocation94_spill] sm:$0xff] }
 0x34c   :  { %1658 = vmatpush.bf16.msra.mxu1 %v4833_v62  ;;  %v4844_v62 = vld [vmem:[#allocation99_spill] sm:$0xff] }
 0x34d   :  { %1642 = vmatpush.bf16.msra.mxu0 %v4832_v53  ;;  %1684 = vmatpush.bf16.msra.mxu3 %v4835_v13  ;;  %v4843_v53 = vld [vmem:[#allocation98_spill] sm:$0xff] }
 0x34e   :  { %1668 = vmatpush.bf16.msra.mxu2 %v4834_v16  ;;  %v4845_v16 = vld [vmem:[#allocation100_spill] sm:$0xff] }
 0x350   :  { %1659 = vmatpush.bf16.msra.mxu1 %v4837_v56 }
 0x351   :  { %1643 = vmatpush.bf16.msra.mxu0 %v4836_v8  ;;  %1685 = vmatpush.bf16.msra.mxu3 %v4839_v4 }
 0x352   :  { %1669 = vmatpush.bf16.msra.mxu2 %v4838_v43 }
 0x355   :  { %1644 = vmatpush.bf16.msra.mxu0 %v4840_v34 }
 0x356   :  { %1670 = vmatpush.bf16.msra.mxu2 %v4841_v61 }
 0x359   :  { %1645 = vmatpush.bf16.msra.mxu0 %v4842_v37 }
 0x35a   :  { %1671 = vmatpush.bf16.msra.mxu2 %v4843_v53 }
 0x35d   :  { %1646 = vmatpush.bf16.msra.mxu0 %v4844_v62 }
 0x35e   :  { %1672 = vmatpush.bf16.msra.mxu2 %v4845_v16  ;;  %v4847_v16 = vld [vmem:[#allocation92_spill] sm:$0xff] }
 0x35f   :  { %v1507_v45 = vmul.f32 %v1504_v63, %v4847_v16 }
 0x361   :  { %v1511_v26 = vadd.f32 %v1507_v45, %v4780_v55 }
 0x36f   :  { %v1402_v13 = vpop.f32.mrf.mxu1 }
 0x375   :  { %v1428_v8 = vpop.f32.mrf.mxu3 }
 0x377   :  { %v1404_v38 = vpop.f32.mrf.mxu1 }
 0x37c   :  { %v1389_v56 = vpop.f32.mrf.mxu0 }
 0x37d   :  { %v1430_v52 = vpop.f32.mrf.mxu3  ;;  %v1390_v61 = vadd.f32 %v1389_v56, %v4709_v14 }
 0x37f   :  { %v1454_v43 = vpop.f32.mrf.mxu1  ;;  %v1403_v62 = vadd.f32 %v1402_v13, %v1390_v61  ;;  %v1506_v61 = vmul.f32 %v1504_v63, %v4643_v11 }
 0x382   :  { %v1415_v44 = vpop.f32.mrf.mxu2 }
 0x383   :  { %v1416_v34 = vadd.f32 %v1415_v44, %v4846_v25 }
 0x384   :  { %v1391_v4 = vpop.f32.mrf.mxu0 }
 0x385   :  { %v1480_v49 = vpop.f32.mrf.mxu3  ;;  %v1429_v19 = vadd.f32 %v1428_v8, %v1416_v34  ;;  %v4848_v4 = vld [vmem:[#allocation23_spill] sm:$0xff] }
 0x387   :  { %v1456_v37 = vpop.f32.mrf.mxu1  ;;  %2913 = vtanh.f32 %v1429_v19 }
 0x388   :  { %2915 = vtanh.f32 %v1403_v62  ;;  %v1509_v62 = vmul.f32 %v1504_v63, %v3451_v60 }
 0x38a   :  { %v1417_v53 = vpop.f32.mrf.mxu2 }
 0x38c   :  { %v1441_v21 = vpop.f32.mrf.mxu0 }
 0x38d   :  { %v1482_v38 = vpop.f32.mrf.mxu3  ;;  %v1442_v33 = vadd.f32 %v1441_v21, %v4848_v4  ;;  %v2914_v25 = vpop.eup %2913  ;;  %v1510_v21 = vadd.f32 %v1506_v61, %v4644_v1 }
 0x38e   :  { %v2916_v34 = vpop.eup %2915  ;;  %v1488_v19 = vmul.f32 0.5, %v2914_v25 }
 0x38f   :  { %v1455_v13 = vadd.f32 %v1454_v43, %v1442_v33  ;;  %v1487_v16 = vmul.f32 0.5, %v2916_v34  ;;  %v1508_v43 = vmul.f32 %v1504_v63, %v3455_v2 }
 0x390   :  { %v1536_v52 = vpop.f32.mrf.mxu1  ;;  %v1491_v55 = vadd.f32 0.5, %v1488_v19 }
 0x391   :  { %v1567_v53 = vadd.f32 %v1536_v52, %v1511_v26  ;;  %v1490_v26 = vadd.f32 0.5, %v1487_v16  ;;  %v1512_v16 = vadd.f32 %v1508_v43, %v3466_v27 }
 0x392   :  { %v1467_v44 = vpop.f32.mrf.mxu2  ;;  %v1494_v33 = vmul.f32 %v1491_v55, %v3811_v28 }
 0x393   :  { %v1468_v56 = vadd.f32 %v1467_v44, %v4849_v15 }
 0x394   :  { %v1443_v37 = vpop.f32.mrf.mxu0 }
 0x395   :  { %v1481_v8 = vadd.f32 %v1480_v49, %v1468_v56  ;;  %v1513_v37 = vadd.f32 %v1509_v62, %v3463_v20 }
 0x397   :  { %2917 = vtanh.f32 %v1481_v8  ;;  %v1562_v38 = vpop.f32.mrf.mxu3 }
 0x398   :  { %v1538_v45 = vpop.f32.mrf.mxu1  ;;  %2919 = vtanh.f32 %v1567_v53  ;;  %v1569_v34 = vadd.f32 %v1562_v38, %v1513_v37 }
 0x399   :  { %2921 = vtanh.f32 %v1455_v13 }
 0x39a   :  { %v1469_v44 = vpop.f32.mrf.mxu2 }
 0x39d   :  { %v1523_v49 = vpop.f32.mrf.mxu0  ;;  %v2918_v52 = vpop.eup %2917 }
 0x39e   :  { %v1566_v56 = vadd.f32 %v1523_v49, %v1510_v21  ;;  %v1495_v25 = vmul.f32 %v2918_v52, %v1490_v26  ;;  %v2920_v8 = vpop.eup %2919 }
 0x39f   :  { %v1564_v53 = vpop.f32.mrf.mxu3  ;;  %v2922_v45 = vpop.eup %2921  ;;  %v1574_v19 = vmul.f32 0.5, %v2920_v8 }
 0x3a0   :  { %2923 = vtanh.f32 %v1566_v56  ;;  %v3933_v61 = vadd.f32 %v1495_v25, %v1494_v33  ;;  %v1489_v13 = vmul.f32 0.5, %v2922_v45 }
 0x3a1   :  { %v1577_v44 = vadd.f32 0.5, %v1574_v19 }
 0x3a2   :  { %2925 = vtanh.f32 %v3933_v61  ;;  %v1492_v38 = vadd.f32 0.5, %v1489_v13  ;;  %v4850_v13 = vld [vmem:[#allocation38_spill] sm:$0xff] }
 0x3a3   :  { %2927 = vtanh.f32 %v1569_v34  ;;  %v1580_v56 = vmul.f32 %v1577_v44, %v3816_v0  ;;  %v4855_v44 = vld [vmem:[#allocation29_spill] sm:$0xff] }
 0x3a5   :  { %v1525_v55 = vpop.f32.mrf.mxu0 }
 0x3a6   :  { %v1549_v62 = vpop.f32.mrf.mxu2  ;;  %v2924_v28 = vpop.eup %2923  ;;  %v4853_v55 = vld [vmem:[#allocation39_spill] sm:$0xff] }
 0x3a7   :  { %v1568_v21 = vadd.f32 %v1549_v62, %v1512_v16  ;;  %v1573_v63 = vmul.f32 0.5, %v2924_v28  ;;  %v4851_v62 = vld [vmem:[#allocation25_spill] sm:$0xff]  ;;  %v4854_v28 = vld [vmem:[#allocation42_spill] sm:$0xff] }
 0x3a8   :  { %v2926_v37 = vpop.eup %2925 }
 0x3a9   :  { %2929 = vtanh.f32 %v1568_v21  ;;  %v1576_v26 = vadd.f32 0.5, %v1573_v63  ;;  %v2928_v49 = vpop.eup %2927  ;;  %v1498_v52 = vmul.f32 %v2926_v37, %v1492_v38  ;;  %v4852_v21 = vld [vmem:[#allocation27_spill] sm:$0xff]  ;;  %v4857_v38 = vld [vmem:[#allocation36_spill] sm:$0xff] }
 0x3aa   :  { %v4856_v63 = vld [vmem:[#allocation31_spill] sm:$0xff] }
 0x3ab   :  { %v1581_v33 = vmul.f32 %v2928_v49, %v1576_v26  ;;  %v1586_v8 = vpack.c.bf16 %v1498_v52, %v1498_v52  ;;  %v4858_v37 = vld [vmem:[#allocation43_spill] sm:$0xff]  ;;  %v4859_v26 = vld [vmem:[#allocation37_spill] sm:$0xff]  ;;  %v4860_v49 = vld [vmem:[#allocation44_spill] sm:$0xff] }
 0x3ac   :  { %v4861_v52 = vld [vmem:[#allocation40_spill] sm:$0xff] }
 0x3ad   :  { %v3938_v53 = vadd.f32 %v1581_v33, %v1580_v56  ;;  %1608 = vmatmul.bf16.vlgmr.msrb.gmra.mxu1 %v1586_v8  ;;  %1634 = vmatmul.bf16.vlgmr.msrb.gmra.mxu3 %v1586_v8  ;;  %v4862_v56 = vld [vmem:[#allocation45_spill] sm:$0xff] }
 0x3ae   :  { %v1551_v25 = vpop.f32.mrf.mxu2  ;;  %1734 = vmatpush.bf16.msrb.mxu1 %v4645_v54  ;;  %1760 = vmatpush.bf16.msrb.mxu3 %v4646_v29  ;;  %v4863_v33 = vld [vmem:[#allocation41_spill] sm:$0xff] }
 0x3af   :  { %v2930_v43 = vpop.eup %2929  ;;  %2931 = vtanh.f32 %v3938_v53  ;;  %v4864_v25 = vld [vmem:[#allocation46_spill] sm:$0xff] }
 0x3b0   :  { %v1575_v34 = vmul.f32 0.5, %v2930_v43  ;;  %v4866_v43 = vld [vmem:[#allocation47_spill] sm:$0xff] }
 0x3b2   :  { %1735 = vmatpush.bf16.msrb.mxu1 %v4647_v6  ;;  %1761 = vmatpush.bf16.msrb.mxu3 %v4648_v58  ;;  %v1578_v0 = vadd.f32 0.5, %v1575_v34  ;;  %v4867_v34 = vld [vmem:[#allocation60_spill] sm:$0xff] }
 0x3b5   :  { %v2932_v45 = vpop.eup %2931 }
 0x3b6   :  { %v1584_v19 = vmul.f32 %v2932_v45, %v1578_v0  ;;  %1736 = vmatpush.bf16.msrb.mxu1 %v4649_v40  ;;  %1762 = vmatpush.bf16.msrb.mxu3 %v4650_v42  ;;  %v4868_v0 = vld [vmem:[#allocation48_spill] sm:$0xff]  ;;  %v4869_v45 = vld [vmem:[#allocation63_spill] sm:$0xff] }
 0x3b8   :  { %v1585_v16 = vpack.c.bf16 %v1584_v19, %v1584_v19  ;;  %v4870_v19 = vld [vmem:[#allocation49_spill] sm:$0xff] }
 0x3ba   :  { %1595 = vmatmul.bf16.vlgmr.msrb.gmra.mxu0 %v1585_v16  ;;  %1621 = vmatmul.bf16.vlgmr.msrb.gmra.mxu2 %v1585_v16 }
 0x3bb   :  { %1721 = vmatpush.bf16.msrb.mxu0 %v3118_v5  ;;  %1737 = vmatpush.bf16.msrb.mxu1 %v4651_v22 }
 0x3bc   :  { %1747 = vmatpush.bf16.msrb.mxu2 %v3122_v10  ;;  %1763 = vmatpush.bf16.msrb.mxu3 %v4652_v41 }
 0x3bd   :  { %1660 = vmatmul.bf16.vlgmr.msra.gmra.mxu1 %v1586_v8  ;;  %1686 = vmatmul.bf16.vlgmr.msra.gmra.mxu3 %v1586_v8  ;;  %v4865_v8 = vld [vmem:[#allocation59_spill] sm:$0xff] }
 0x3bf   :  { %1722 = vmatpush.bf16.msrb.mxu0 %v3129_v18  ;;  %1738 = vmatpush.bf16.msrb.mxu1 %v4653_v7 }
 0x3c0   :  { %1748 = vmatpush.bf16.msrb.mxu2 %v3134_v23  ;;  %1764 = vmatpush.bf16.msrb.mxu3 %v4654_v57 }
 0x3c3   :  { %1723 = vmatpush.bf16.msrb.mxu0 %v3139_v31  ;;  %1739 = vmatpush.bf16.msrb.mxu1 %v4655_v32 }
 0x3c4   :  { %1749 = vmatpush.bf16.msrb.mxu2 %v3145_v36  ;;  %1765 = vmatpush.bf16.msrb.mxu3 %v4656_v35 }
 0x3c7   :  { %1724 = vmatpush.bf16.msrb.mxu0 %v3151_v46  ;;  %1740 = vmatpush.bf16.msrb.mxu1 %v4657_v17 }
 0x3c8   :  { %1750 = vmatpush.bf16.msrb.mxu2 %v3157_v48  ;;  %1766 = vmatpush.bf16.msrb.mxu3 %v4658_v51 }
 0x3ca   :  { %1647 = vmatmul.bf16.vlgmr.msra.gmra.mxu0 %v1585_v16  ;;  %1673 = vmatmul.bf16.vlgmr.msra.gmra.mxu2 %v1585_v16 }
 0x3cb   :  { %1725 = vmatpush.bf16.msrb.mxu0 %v4611_v47  ;;  %1741 = vmatpush.bf16.msrb.mxu1 %v4659_v59 }
 0x3cc   :  { %1751 = vmatpush.bf16.msrb.mxu2 %v4612_v12  ;;  %1767 = vmatpush.bf16.msrb.mxu3 %v4713_v39 }
 0x3ce   :  { %1742 = vmatmul.bf16.vlgmr.msrb.gmra.mxu1 %v1585_v16 }
 0x3cf   :  { %1807 = vmatpush.bf16.msra.mxu1 %v4661_v9  ;;  %1768 = vmatmul.bf16.vlgmr.msrb.gmra.mxu3 %v1585_v16 }
 0x3d0   :  { %1833 = vmatpush.bf16.msra.mxu3 %v4662_v24  ;;  %1726 = vmatpush.bf16.msrb.mxu0 %v4714_v50 }
 0x3d1   :  { %1752 = vmatpush.bf16.msrb.mxu2 %v4615_v30 }
 0x3d3   :  { %1808 = vmatpush.bf16.msra.mxu1 %v4663_v3 }
 0x3d4   :  { %1834 = vmatpush.bf16.msra.mxu3 %v4850_v13  ;;  %1727 = vmatpush.bf16.msrb.mxu0 %v4851_v62 }
 0x3d5   :  { %1753 = vmatpush.bf16.msrb.mxu2 %v4852_v21 }
 0x3d7   :  { %1809 = vmatpush.bf16.msra.mxu1 %v4853_v55 }
 0x3d8   :  { %1835 = vmatpush.bf16.msra.mxu3 %v4854_v28  ;;  %1728 = vmatpush.bf16.msrb.mxu0 %v4855_v44 }
 0x3d9   :  { %1754 = vmatpush.bf16.msrb.mxu2 %v4856_v63 }
 0x3db   :  { %1810 = vmatpush.bf16.msra.mxu1 %v4858_v37  ;;  %1729 = vmatmul.bf16.vlgmr.msrb.gmra.mxu0 %v1585_v16 }
 0x3dc   :  { %1794 = vmatpush.bf16.msra.mxu0 %v4857_v38  ;;  %1836 = vmatpush.bf16.msra.mxu3 %v4860_v49  ;;  %v4915_v38 = vld [vmem:[#allocation17_spill] sm:$0xff] }
 0x3dd   :  { %1820 = vmatpush.bf16.msra.mxu2 %v4859_v26 }
 0x3de   :  { %1755 = vmatmul.bf16.vlgmr.msrb.gmra.mxu2 %v1585_v16  ;;  %v4871_v16 = vld [vmem:[#allocation64_spill] sm:$0xff] }
 0x3df   :  { %1811 = vmatpush.bf16.msra.mxu1 %v4862_v56  ;;  %v4873_v56 = vld [vmem:[#allocation67_spill] sm:$0xff] }
 0x3e0   :  { %1795 = vmatpush.bf16.msra.mxu0 %v4861_v52  ;;  %1837 = vmatpush.bf16.msra.mxu3 %v4864_v25  ;;  %v4872_v52 = vld [vmem:[#allocation50_spill] sm:$0xff]  ;;  %v4875_v25 = vld [vmem:[#allocation68_spill] sm:$0xff] }
 0x3e1   :  { %1821 = vmatpush.bf16.msra.mxu2 %v4863_v33  ;;  %v4874_v33 = vld [vmem:[#allocation51_spill] sm:$0xff] }
 0x3e3   :  { %1812 = vmatpush.bf16.msra.mxu1 %v4866_v43  ;;  %v4877_v43 = vld [vmem:[#allocation52_spill] sm:$0xff] }
 0x3e4   :  { %1796 = vmatpush.bf16.msra.mxu0 %v4865_v8  ;;  %1838 = vmatpush.bf16.msra.mxu3 %v4868_v0  ;;  %v4876_v8 = vld [vmem:[#allocation53_spill] sm:$0xff]  ;;  %v4879_v0 = vld [vmem:[#allocation71_spill] sm:$0xff] }
 0x3e5   :  { %1822 = vmatpush.bf16.msra.mxu2 %v4867_v34  ;;  %v4878_v34 = vld [vmem:[#allocation54_spill] sm:$0xff] }
 0x3e7   :  { %1813 = vmatpush.bf16.msra.mxu1 %v4870_v19  ;;  %v4881_v19 = vld [vmem:[#allocation55_spill] sm:$0xff] }
 0x3e8   :  { %1797 = vmatpush.bf16.msra.mxu0 %v4869_v45  ;;  %1839 = vmatpush.bf16.msra.mxu3 %v4872_v52  ;;  %v4880_v45 = vld [vmem:[#allocation72_spill] sm:$0xff]  ;;  %v4883_v52 = vld [vmem:[#allocation75_spill] sm:$0xff] }
 0x3e9   :  { %1823 = vmatpush.bf16.msra.mxu2 %v4871_v16  ;;  %v4882_v16 = vld [vmem:[#allocation56_spill] sm:$0xff] }
 0x3eb   :  { %1814 = vmatpush.bf16.msra.mxu1 %v4874_v33  ;;  %v4885_v33 = vld [vmem:[#allocation57_spill] sm:$0xff] }
 0x3ec   :  { %1798 = vmatpush.bf16.msra.mxu0 %v4873_v56  ;;  %1840 = vmatpush.bf16.msra.mxu3 %v4876_v8  ;;  %v4884_v56 = vld [vmem:[#allocation76_spill] sm:$0xff]  ;;  %v4887_v8 = vld [vmem:[#allocation79_spill] sm:$0xff] }
 0x3ed   :  { %1824 = vmatpush.bf16.msra.mxu2 %v4875_v25  ;;  %v4886_v25 = vld [vmem:[#allocation58_spill] sm:$0xff] }
 0x3ef   :  { %1859 = vmatpush.bf16.msrb.mxu1 %v4877_v43  ;;  %v4888_v43 = vld [vmem:[#allocation80_spill] sm:$0xff] }
 0x3f0   :  { %1885 = vmatpush.bf16.msrb.mxu3 %v4878_v34  ;;  %1799 = vmatpush.bf16.msra.mxu0 %v4879_v0  ;;  %v4889_v34 = vld [vmem:[#allocation81_spill] sm:$0xff] }
 0x3f1   :  { %1825 = vmatpush.bf16.msra.mxu2 %v4880_v45  ;;  %v4890_v0 = vld [vmem:[#allocation61_spill] sm:$0xff]  ;;  %v4891_v45 = vld [vmem:[#allocation82_spill] sm:$0xff] }
 0x3f3   :  { %1860 = vmatpush.bf16.msrb.mxu1 %v4881_v19  ;;  %v4892_v19 = vld [vmem:[#allocation62_spill] sm:$0xff] }
 0x3f4   :  { %1886 = vmatpush.bf16.msrb.mxu3 %v4882_v16  ;;  %1800 = vmatpush.bf16.msra.mxu0 %v4883_v52  ;;  %v4893_v16 = vld [vmem:[#allocation83_spill] sm:$0xff]  ;;  %v4894_v52 = vld [vmem:[#allocation65_spill] sm:$0xff] }
 0x3f5   :  { %1826 = vmatpush.bf16.msra.mxu2 %v4884_v56  ;;  %v4895_v56 = vld [vmem:[#allocation84_spill] sm:$0xff] }
 0x3f7   :  { %1861 = vmatpush.bf16.msrb.mxu1 %v4885_v33  ;;  %v4896_v33 = vld [vmem:[#allocation66_spill] sm:$0xff] }
 0x3f8   :  { %1887 = vmatpush.bf16.msrb.mxu3 %v4886_v25  ;;  %1801 = vmatpush.bf16.msra.mxu0 %v4887_v8  ;;  %v4897_v25 = vld [vmem:[#allocation85_spill] sm:$0xff] }
 0x3f9   :  { %1827 = vmatpush.bf16.msra.mxu2 %v4888_v43  ;;  %v4898_v8 = vld [vmem:[#allocation69_spill] sm:$0xff]  ;;  %v4899_v43 = vld [vmem:[#allocation86_spill] sm:$0xff] }
 0x3fb   :  { %1862 = vmatpush.bf16.msrb.mxu1 %v4890_v0  ;;  %v4901_v0 = vld [vmem:[#allocation87_spill] sm:$0xff] }
 0x3fc   :  { %1846 = vmatpush.bf16.msrb.mxu0 %v4889_v34  ;;  %1888 = vmatpush.bf16.msrb.mxu3 %v4892_v19  ;;  %v4900_v34 = vld [vmem:[#allocation70_spill] sm:$0xff]  ;;  %v4903_v19 = vld [vmem:[#allocation88_spill] sm:$0xff] }
 0x3fd   :  { %1872 = vmatpush.bf16.msrb.mxu2 %v4891_v45  ;;  %v4902_v45 = vld [vmem:[#allocation73_spill] sm:$0xff] }
 0x3ff   :  { %1863 = vmatpush.bf16.msrb.mxu1 %v4894_v52  ;;  %v4905_v52 = vld [vmem:[#allocation89_spill] sm:$0xff] }
 0x400   :  { %1847 = vmatpush.bf16.msrb.mxu0 %v4893_v16  ;;  %1889 = vmatpush.bf16.msrb.mxu3 %v4896_v33  ;;  %v4904_v16 = vld [vmem:[#allocation74_spill] sm:$0xff] }
 0x401   :  { %1873 = vmatpush.bf16.msrb.mxu2 %v4895_v56  ;;  %v4906_v56 = vld [vmem:[#allocation77_spill] sm:$0xff]  ;;  %v4907_v33 = vld [vmem:[#allocation90_spill] sm:$0xff] }
 0x403   :  { %1864 = vmatpush.bf16.msrb.mxu1 %v4898_v8  ;;  %v4909_v8 = vld [vmem:[#allocation93_spill] sm:$0xff] }
 0x404   :  { %1848 = vmatpush.bf16.msrb.mxu0 %v4897_v25  ;;  %1890 = vmatpush.bf16.msrb.mxu3 %v4900_v34  ;;  %v4908_v25 = vld [vmem:[#allocation78_spill] sm:$0xff]  ;;  %v4911_v34 = vld [vmem:[#allocation97_spill] sm:$0xff] }
 0x405   :  { %1874 = vmatpush.bf16.msrb.mxu2 %v4899_v43  ;;  %v4910_v43 = vld [vmem:[#allocation94_spill] sm:$0xff] }
 0x407   :  { %1865 = vmatpush.bf16.msrb.mxu1 %v4902_v45  ;;  %v4913_v45 = vld [vmem:[#allocation99_spill] sm:$0xff] }
 0x408   :  { %1849 = vmatpush.bf16.msrb.mxu0 %v4901_v0  ;;  %1891 = vmatpush.bf16.msrb.mxu3 %v4904_v16  ;;  %v4912_v0 = vld [vmem:[#allocation98_spill] sm:$0xff] }
 0x409   :  { %1875 = vmatpush.bf16.msrb.mxu2 %v4903_v19  ;;  %v4914_v19 = vld [vmem:[#allocation100_spill] sm:$0xff] }
 0x40b   :  { %1866 = vmatpush.bf16.msrb.mxu1 %v4906_v56 }
 0x40c   :  { %1850 = vmatpush.bf16.msrb.mxu0 %v4905_v52  ;;  %1892 = vmatpush.bf16.msrb.mxu3 %v4908_v25 }
 0x40d   :  { %1876 = vmatpush.bf16.msrb.mxu2 %v4907_v33 }
 0x410   :  { %1851 = vmatpush.bf16.msrb.mxu0 %v4909_v8 }
 0x411   :  { %1877 = vmatpush.bf16.msrb.mxu2 %v4910_v43 }
 0x414   :  { %1852 = vmatpush.bf16.msrb.mxu0 %v4911_v34 }
 0x415   :  { %1878 = vmatpush.bf16.msrb.mxu2 %v4912_v0 }
 0x418   :  { %1853 = vmatpush.bf16.msrb.mxu0 %v4913_v45  ;;  %v1711_v45 = vpop.permute.xlu2 %1710 }
 0x419   :  { %1879 = vmatpush.bf16.msrb.mxu2 %v4914_v19 }
 0x42a   :  { %v1609_v16 = vpop.f32.mrf.mxu1 }
 0x430   :  { %v1635_v52 = vpop.f32.mrf.mxu3 }
 0x432   :  { %v1611_v49 = vpop.f32.mrf.mxu1 }
 0x433   :  { %v4916_v49 = vld [vmem:[#allocation92_spill] sm:$0xff] }
 0x434   :  { %v1714_v21 = vmul.f32 %v1711_v45, %v4916_v49 }
 0x437   :  { %v1596_v56 = vpop.f32.mrf.mxu0 }
 0x438   :  { %v1637_v26 = vpop.f32.mrf.mxu3  ;;  %v1597_v43 = vadd.f32 %v1596_v56, %v4709_v14 }
 0x43a   :  { %v1661_v33 = vpop.f32.mrf.mxu1  ;;  %v1610_v28 = vadd.f32 %v1609_v16, %v1597_v43 }
 0x43d   :  { %v1622_v37 = vpop.f32.mrf.mxu2 }
 0x43e   :  { %v1623_v8 = vadd.f32 %v1622_v37, %v4915_v38  ;;  %v4917_v37 = vld [vmem:[#allocation96_spill] sm:$0xff] }
 0x43f   :  { %v1598_v25 = vpop.f32.mrf.mxu0  ;;  %v1718_v38 = vadd.f32 %v1714_v21, %v4917_v37 }
 0x440   :  { %v1687_v63 = vpop.f32.mrf.mxu3  ;;  %v1636_v44 = vadd.f32 %v1635_v52, %v1623_v8 }
 0x442   :  { %v1663_v34 = vpop.f32.mrf.mxu1  ;;  %2933 = vtanh.f32 %v1636_v44 }
 0x443   :  { %2935 = vtanh.f32 %v1610_v28  ;;  %v1713_v28 = vmul.f32 %v1711_v45, %v4643_v11 }
 0x445   :  { %v1624_v0 = vpop.f32.mrf.mxu2 }
 0x447   :  { %v1648_v55 = vpop.f32.mrf.mxu0 }
 0x448   :  { %v1689_v19 = vpop.f32.mrf.mxu3  ;;  %v1649_v62 = vadd.f32 %v1648_v55, %v4848_v4  ;;  %v2934_v13 = vpop.eup %2933  ;;  %v1716_v55 = vmul.f32 %v1711_v45, %v3451_v60 }
 0x449   :  { %v2936_v52 = vpop.eup %2935  ;;  %v1695_v0 = vmul.f32 0.5, %v2934_v13 }
 0x44a   :  { %v1662_v16 = vadd.f32 %v1661_v33, %v1649_v62  ;;  %v1694_v19 = vmul.f32 0.5, %v2936_v52  ;;  %v1720_v13 = vadd.f32 %v1716_v55, %v3463_v20 }
 0x44b   :  { %v1743_v26 = vpop.f32.mrf.mxu1  ;;  %v1698_v4 = vadd.f32 0.5, %v1695_v0 }
 0x44c   :  { %v1774_v8 = vadd.f32 %v1743_v26, %v1718_v38  ;;  %v1715_v26 = vmul.f32 %v1711_v45, %v3455_v2 }
 0x44d   :  { %v1674_v25 = vpop.f32.mrf.mxu2 }
 0x44e   :  { %v1675_v56 = vadd.f32 %v1674_v25, %v4849_v15  ;;  %v1717_v25 = vadd.f32 %v1713_v28, %v4644_v1 }
 0x44f   :  { %v1650_v34 = vpop.f32.mrf.mxu0 }
 0x450   :  { %v1688_v43 = vadd.f32 %v1687_v63, %v1675_v56  ;;  %v1697_v34 = vadd.f32 0.5, %v1694_v19  ;;  %v1701_v63 = vmul.f32 %v1698_v4, %v3933_v61 }
 0x452   :  { %2937 = vtanh.f32 %v1688_v43  ;;  %v1769_v44 = vpop.f32.mrf.mxu3 }
 0x453   :  { %v1745_v49 = vpop.f32.mrf.mxu1  ;;  %2939 = vtanh.f32 %v1774_v8  ;;  %v1776_v56 = vadd.f32 %v1769_v44, %v1720_v13 }
 0x454   :  { %2941 = vtanh.f32 %v1662_v16  ;;  %v1719_v16 = vadd.f32 %v1715_v26, %v3466_v27 }
 0x455   :  { %v1676_v21 = vpop.f32.mrf.mxu2 }
 0x458   :  { %v1730_v15 = vpop.f32.mrf.mxu0  ;;  %v2938_v38 = vpop.eup %2937 }
 0x459   :  { %v1773_v62 = vadd.f32 %v1730_v15, %v1717_v25  ;;  %v1702_v33 = vmul.f32 %v2938_v38, %v1697_v34  ;;  %v2940_v49 = vpop.eup %2939 }
 0x45a   :  { %v1771_v52 = vpop.f32.mrf.mxu3  ;;  %v2942_v8 = vpop.eup %2941  ;;  %v1781_v0 = vmul.f32 0.5, %v2940_v49 }
 0x45b   :  { %2943 = vtanh.f32 %v1773_v62  ;;  %v4049_v43 = vadd.f32 %v1702_v33, %v1701_v63  ;;  %v1696_v28 = vmul.f32 0.5, %v2942_v8 }
 0x45c   :  { %v1784_v55 = vadd.f32 0.5, %v1781_v0 }
 0x45d   :  { %2945 = vtanh.f32 %v4049_v43  ;;  %v1699_v44 = vadd.f32 0.5, %v1696_v28  ;;  %v4919_v28 = vld [vmem:[#allocation25_spill] sm:$0xff] }
 0x45e   :  { %2947 = vtanh.f32 %v1776_v56  ;;  %v1787_v13 = vmul.f32 %v1784_v55, %v3938_v53  ;;  %v4924_v55 = vld [vmem:[#allocation31_spill] sm:$0xff] }
 0x460   :  { %v1732_v4 = vpop.f32.mrf.mxu0 }
 0x461   :  { %v1756_v15 = vpop.f32.mrf.mxu2  ;;  %v2944_v61 = vpop.eup %2943  ;;  %v4922_v4 = vld [vmem:[#allocation42_spill] sm:$0xff] }
 0x462   :  { %v1775_v19 = vadd.f32 %v1756_v15, %v1719_v16  ;;  %v1780_v45 = vmul.f32 0.5, %v2944_v61  ;;  %v4918_v16 = vld [vmem:[#allocation38_spill] sm:$0xff]  ;;  %v4920_v15 = vld [vmem:[#allocation27_spill] sm:$0xff]  ;;  %v4923_v61 = vld [vmem:[#allocation29_spill] sm:$0xff] }
 0x463   :  { %v2946_v21 = vpop.eup %2945 }
 0x464   :  { %2949 = vtanh.f32 %v1775_v19  ;;  %v1783_v25 = vadd.f32 0.5, %v1780_v45  ;;  %v2948_v34 = vpop.eup %2947  ;;  %v1705_v38 = vmul.f32 %v2946_v21, %v1699_v44  ;;  %v4921_v19 = vld [vmem:[#allocation39_spill] sm:$0xff]  ;;  %v4925_v45 = vld [vmem:[#allocation36_spill] sm:$0xff]  ;;  %v4927_v21 = vld [vmem:[#allocation37_spill] sm:$0xff] }
 0x465   :  { %v4926_v44 = vld [vmem:[#allocation43_spill] sm:$0xff] }
 0x466   :  { %v1788_v62 = vmul.f32 %v2948_v34, %v1783_v25  ;;  %v1793_v33 = vpack.c.bf16 %v1705_v38, %v1705_v38  ;;  %v4928_v25 = vld [vmem:[#allocation44_spill] sm:$0xff]  ;;  %v4930_v38 = vld [vmem:[#allocation45_spill] sm:$0xff] }
 0x467   :  { %v4929_v34 = vld [vmem:[#allocation40_spill] sm:$0xff] }
 0x468   :  { %v4054_v49 = vadd.f32 %v1788_v62, %v1787_v13  ;;  %1815 = vmatmul.bf16.vlgmr.msra.gmra.mxu1 %v1793_v33  ;;  %1841 = vmatmul.bf16.vlgmr.msra.gmra.mxu3 %v1793_v33  ;;  %v4931_v13 = vld [vmem:[#allocation41_spill] sm:$0xff]  ;;  %v4932_v62 = vld [vmem:[#allocation46_spill] sm:$0xff] }
 0x469   :  { %v1758_v63 = vpop.f32.mrf.mxu2  ;;  %1941 = vmatpush.bf16.msra.mxu1 %v4645_v54  ;;  %1967 = vmatpush.bf16.msra.mxu3 %v4646_v29 }
 0x46a   :  { %v2950_v26 = vpop.eup %2949  ;;  %2951 = vtanh.f32 %v4054_v49  ;;  %v4933_v63 = vld [vmem:[#allocation59_spill] sm:$0xff] }
 0x46b   :  { %v1782_v56 = vmul.f32 0.5, %v2950_v26  ;;  %v4935_v26 = vld [vmem:[#allocation60_spill] sm:$0xff] }
 0x46d   :  { %1942 = vmatpush.bf16.msra.mxu1 %v4647_v6  ;;  %1968 = vmatpush.bf16.msra.mxu3 %v4648_v58  ;;  %v1785_v53 = vadd.f32 0.5, %v1782_v56  ;;  %v4936_v56 = vld [vmem:[#allocation48_spill] sm:$0xff] }
 0x470   :  { %v2952_v52 = vpop.eup %2951 }
 0x471   :  { %v1791_v8 = vmul.f32 %v2952_v52, %v1785_v53  ;;  %1943 = vmatpush.bf16.msra.mxu1 %v4649_v40  ;;  %1969 = vmatpush.bf16.msra.mxu3 %v4650_v42  ;;  %v4937_v53 = vld [vmem:[#allocation63_spill] sm:$0xff]  ;;  %v4938_v52 = vld [vmem:[#allocation49_spill] sm:$0xff] }
 0x473   :  { %v1792_v0 = vpack.c.bf16 %v1791_v8, %v1791_v8  ;;  %v4939_v8 = vld [vmem:[#allocation64_spill] sm:$0xff] }
 0x475   :  { %1802 = vmatmul.bf16.vlgmr.msra.gmra.mxu0 %v1792_v0  ;;  %1828 = vmatmul.bf16.vlgmr.msra.gmra.mxu2 %v1792_v0 }
 0x476   :  { %1928 = vmatpush.bf16.msra.mxu0 %v3118_v5  ;;  %1944 = vmatpush.bf16.msra.mxu1 %v4651_v22 }
 0x477   :  { %1954 = vmatpush.bf16.msra.mxu2 %v3122_v10  ;;  %1970 = vmatpush.bf16.msra.mxu3 %v4652_v41 }
 0x478   :  { %1867 = vmatmul.bf16.vlgmr.msrb.gmra.mxu1 %v1793_v33  ;;  %1893 = vmatmul.bf16.vlgmr.msrb.gmra.mxu3 %v1793_v33  ;;  %v4934_v33 = vld [vmem:[#allocation47_spill] sm:$0xff] }
 0x47a   :  { %1929 = vmatpush.bf16.msra.mxu0 %v3129_v18  ;;  %1945 = vmatpush.bf16.msra.mxu1 %v4653_v7 }
 0x47b   :  { %1955 = vmatpush.bf16.msra.mxu2 %v3134_v23  ;;  %1971 = vmatpush.bf16.msra.mxu3 %v4654_v57 }
 0x47e   :  { %1930 = vmatpush.bf16.msra.mxu0 %v3139_v31  ;;  %1946 = vmatpush.bf16.msra.mxu1 %v4655_v32 }
 0x47f   :  { %1956 = vmatpush.bf16.msra.mxu2 %v3145_v36  ;;  %1972 = vmatpush.bf16.msra.mxu3 %v4656_v35 }
 0x482   :  { %1931 = vmatpush.bf16.msra.mxu0 %v3151_v46  ;;  %1947 = vmatpush.bf16.msra.mxu1 %v4657_v17 }
 0x483   :  { %1957 = vmatpush.bf16.msra.mxu2 %v3157_v48  ;;  %1973 = vmatpush.bf16.msra.mxu3 %v4658_v51 }
 0x485   :  { %1854 = vmatmul.bf16.vlgmr.msrb.gmra.mxu0 %v1792_v0  ;;  %1880 = vmatmul.bf16.vlgmr.msrb.gmra.mxu2 %v1792_v0 }
 0x486   :  { %1932 = vmatpush.bf16.msra.mxu0 %v4611_v47  ;;  %1948 = vmatpush.bf16.msra.mxu1 %v4659_v59 }
 0x487   :  { %1958 = vmatpush.bf16.msra.mxu2 %v4612_v12  ;;  %1974 = vmatpush.bf16.msra.mxu3 %v4713_v39 }
 0x489   :  { %1949 = vmatmul.bf16.vlgmr.msra.gmra.mxu1 %v1792_v0 }
 0x48a   :  { %2014 = vmatpush.bf16.msrb.mxu1 %v4661_v9  ;;  %1975 = vmatmul.bf16.vlgmr.msra.gmra.mxu3 %v1792_v0 }
 0x48b   :  { %2040 = vmatpush.bf16.msrb.mxu3 %v4662_v24  ;;  %1933 = vmatpush.bf16.msra.mxu0 %v4714_v50 }
 0x48c   :  { %1959 = vmatpush.bf16.msra.mxu2 %v4615_v30 }
 0x48e   :  { %2015 = vmatpush.bf16.msrb.mxu1 %v4663_v3 }
 0x48f   :  { %2041 = vmatpush.bf16.msrb.mxu3 %v4918_v16  ;;  %1934 = vmatpush.bf16.msra.mxu0 %v4919_v28 }
 0x490   :  { %1960 = vmatpush.bf16.msra.mxu2 %v4920_v15  ;;  %v4985_v15 = vld [vmem:[#allocation23_spill] sm:$0xff] }
 0x492   :  { %2016 = vmatpush.bf16.msrb.mxu1 %v4921_v19  ;;  %v4984_v19 = vld [vmem:[#allocation92_spill] sm:$0xff] }
 0x493   :  { %2042 = vmatpush.bf16.msrb.mxu3 %v4922_v4  ;;  %1935 = vmatpush.bf16.msra.mxu0 %v4923_v61 }
 0x494   :  { %1961 = vmatpush.bf16.msra.mxu2 %v4924_v55 }
 0x496   :  { %2017 = vmatpush.bf16.msrb.mxu1 %v4926_v44  ;;  %1936 = vmatmul.bf16.vlgmr.msra.gmra.mxu0 %v1792_v0  ;;  %v4983_v44 = vld [vmem:[#allocation17_spill] sm:$0xff] }
 0x497   :  { %2001 = vmatpush.bf16.msrb.mxu0 %v4925_v45  ;;  %2043 = vmatpush.bf16.msrb.mxu3 %v4928_v25 }
 0x498   :  { %2027 = vmatpush.bf16.msrb.mxu2 %v4927_v21 }
 0x499   :  { %1962 = vmatmul.bf16.vlgmr.msra.gmra.mxu2 %v1792_v0  ;;  %v4940_v0 = vld [vmem:[#allocation50_spill] sm:$0xff] }
 0x49a   :  { %2018 = vmatpush.bf16.msrb.mxu1 %v4930_v38  ;;  %v4941_v38 = vld [vmem:[#allocation67_spill] sm:$0xff] }
 0x49b   :  { %2002 = vmatpush.bf16.msrb.mxu0 %v4929_v34  ;;  %2044 = vmatpush.bf16.msrb.mxu3 %v4932_v62  ;;  %v4943_v62 = vld [vmem:[#allocation68_spill] sm:$0xff] }
 0x49c   :  { %2028 = vmatpush.bf16.msrb.mxu2 %v4931_v13  ;;  %v4942_v13 = vld [vmem:[#allocation51_spill] sm:$0xff] }
 0x49e   :  { %2019 = vmatpush.bf16.msrb.mxu1 %v4934_v33  ;;  %v4945_v33 = vld [vmem:[#allocation52_spill] sm:$0xff] }
 0x49f   :  { %2003 = vmatpush.bf16.msrb.mxu0 %v4933_v63  ;;  %2045 = vmatpush.bf16.msrb.mxu3 %v4936_v56  ;;  %v4944_v63 = vld [vmem:[#allocation53_spill] sm:$0xff]  ;;  %v4947_v56 = vld [vmem:[#allocation71_spill] sm:$0xff] }
 0x4a0   :  { %2029 = vmatpush.bf16.msrb.mxu2 %v4935_v26  ;;  %v4946_v26 = vld [vmem:[#allocation54_spill] sm:$0xff] }
 0x4a2   :  { %2020 = vmatpush.bf16.msrb.mxu1 %v4938_v52  ;;  %v4949_v52 = vld [vmem:[#allocation55_spill] sm:$0xff] }
 0x4a3   :  { %2004 = vmatpush.bf16.msrb.mxu0 %v4937_v53  ;;  %2046 = vmatpush.bf16.msrb.mxu3 %v4940_v0  ;;  %v4948_v53 = vld [vmem:[#allocation72_spill] sm:$0xff]  ;;  %v4951_v0 = vld [vmem:[#allocation75_spill] sm:$0xff] }
 0x4a4   :  { %2030 = vmatpush.bf16.msrb.mxu2 %v4939_v8  ;;  %v4950_v8 = vld [vmem:[#allocation56_spill] sm:$0xff] }
 0x4a6   :  { %2021 = vmatpush.bf16.msrb.mxu1 %v4942_v13  ;;  %v4953_v13 = vld [vmem:[#allocation57_spill] sm:$0xff] }
 0x4a7   :  { %2005 = vmatpush.bf16.msrb.mxu0 %v4941_v38  ;;  %2047 = vmatpush.bf16.msrb.mxu3 %v4944_v63  ;;  %v4952_v38 = vld [vmem:[#allocation76_spill] sm:$0xff]  ;;  %v4955_v63 = vld [vmem:[#allocation79_spill] sm:$0xff] }
 0x4a8   :  { %2031 = vmatpush.bf16.msrb.mxu2 %v4943_v62  ;;  %v4954_v62 = vld [vmem:[#allocation58_spill] sm:$0xff] }
 0x4aa   :  { %2066 = vmatpush.bf16.msra.mxu1 %v4945_v33  ;;  %v4956_v33 = vld [vmem:[#allocation80_spill] sm:$0xff] }
 0x4ab   :  { %2092 = vmatpush.bf16.msra.mxu3 %v4946_v26  ;;  %2006 = vmatpush.bf16.msrb.mxu0 %v4947_v56  ;;  %v4957_v26 = vld [vmem:[#allocation81_spill] sm:$0xff] }
 0x4ac   :  { %2032 = vmatpush.bf16.msrb.mxu2 %v4948_v53  ;;  %v4958_v56 = vld [vmem:[#allocation61_spill] sm:$0xff]  ;;  %v4959_v53 = vld [vmem:[#allocation82_spill] sm:$0xff] }
 0x4ae   :  { %2067 = vmatpush.bf16.msra.mxu1 %v4949_v52  ;;  %v4960_v52 = vld [vmem:[#allocation62_spill] sm:$0xff] }
 0x4af   :  { %2093 = vmatpush.bf16.msra.mxu3 %v4950_v8  ;;  %2007 = vmatpush.bf16.msrb.mxu0 %v4951_v0  ;;  %v4961_v8 = vld [vmem:[#allocation83_spill] sm:$0xff]  ;;  %v4962_v0 = vld [vmem:[#allocation65_spill] sm:$0xff] }
 0x4b0   :  { %2033 = vmatpush.bf16.msrb.mxu2 %v4952_v38  ;;  %v4963_v38 = vld [vmem:[#allocation84_spill] sm:$0xff] }
 0x4b2   :  { %2068 = vmatpush.bf16.msra.mxu1 %v4953_v13  ;;  %v4964_v13 = vld [vmem:[#allocation66_spill] sm:$0xff] }
 0x4b3   :  { %2094 = vmatpush.bf16.msra.mxu3 %v4954_v62  ;;  %2008 = vmatpush.bf16.msrb.mxu0 %v4955_v63  ;;  %v4965_v62 = vld [vmem:[#allocation85_spill] sm:$0xff] }
 0x4b4   :  { %2034 = vmatpush.bf16.msrb.mxu2 %v4956_v33  ;;  %v4966_v63 = vld [vmem:[#allocation69_spill] sm:$0xff]  ;;  %v4967_v33 = vld [vmem:[#allocation86_spill] sm:$0xff] }
 0x4b6   :  { %2069 = vmatpush.bf16.msra.mxu1 %v4958_v56  ;;  %v4969_v56 = vld [vmem:[#allocation87_spill] sm:$0xff] }
 0x4b7   :  { %2053 = vmatpush.bf16.msra.mxu0 %v4957_v26  ;;  %2095 = vmatpush.bf16.msra.mxu3 %v4960_v52  ;;  %v4968_v26 = vld [vmem:[#allocation70_spill] sm:$0xff]  ;;  %v4971_v52 = vld [vmem:[#allocation88_spill] sm:$0xff] }
 0x4b8   :  { %2079 = vmatpush.bf16.msra.mxu2 %v4959_v53  ;;  %v4970_v53 = vld [vmem:[#allocation73_spill] sm:$0xff] }
 0x4ba   :  { %2070 = vmatpush.bf16.msra.mxu1 %v4962_v0  ;;  %v4973_v0 = vld [vmem:[#allocation89_spill] sm:$0xff] }
 0x4bb   :  { %2054 = vmatpush.bf16.msra.mxu0 %v4961_v8  ;;  %2096 = vmatpush.bf16.msra.mxu3 %v4964_v13  ;;  %v4972_v8 = vld [vmem:[#allocation74_spill] sm:$0xff] }
 0x4bc   :  { %2080 = vmatpush.bf16.msra.mxu2 %v4963_v38  ;;  %v4974_v38 = vld [vmem:[#allocation77_spill] sm:$0xff]  ;;  %v4975_v13 = vld [vmem:[#allocation90_spill] sm:$0xff] }
 0x4be   :  { %2071 = vmatpush.bf16.msra.mxu1 %v4966_v63  ;;  %v4977_v63 = vld [vmem:[#allocation93_spill] sm:$0xff] }
 0x4bf   :  { %2055 = vmatpush.bf16.msra.mxu0 %v4965_v62  ;;  %2097 = vmatpush.bf16.msra.mxu3 %v4968_v26  ;;  %v4976_v62 = vld [vmem:[#allocation78_spill] sm:$0xff]  ;;  %v4979_v26 = vld [vmem:[#allocation97_spill] sm:$0xff] }
 0x4c0   :  { %2081 = vmatpush.bf16.msra.mxu2 %v4967_v33  ;;  %v4978_v33 = vld [vmem:[#allocation94_spill] sm:$0xff] }
 0x4c2   :  { %2072 = vmatpush.bf16.msra.mxu1 %v4970_v53  ;;  %v4981_v53 = vld [vmem:[#allocation99_spill] sm:$0xff] }
 0x4c3   :  { %2056 = vmatpush.bf16.msra.mxu0 %v4969_v56  ;;  %2098 = vmatpush.bf16.msra.mxu3 %v4972_v8  ;;  %v4980_v56 = vld [vmem:[#allocation98_spill] sm:$0xff] }
 0x4c4   :  { %2082 = vmatpush.bf16.msra.mxu2 %v4971_v52  ;;  %v4982_v52 = vld [vmem:[#allocation100_spill] sm:$0xff] }
 0x4c6   :  { %2073 = vmatpush.bf16.msra.mxu1 %v4974_v38 }
 0x4c7   :  { %2057 = vmatpush.bf16.msra.mxu0 %v4973_v0  ;;  %2099 = vmatpush.bf16.msra.mxu3 %v4976_v62 }
 0x4c8   :  { %2083 = vmatpush.bf16.msra.mxu2 %v4975_v13 }
 0x4cb   :  { %2058 = vmatpush.bf16.msra.mxu0 %v4977_v63 }
 0x4cc   :  { %2084 = vmatpush.bf16.msra.mxu2 %v4978_v33 }
 0x4cf   :  { %2059 = vmatpush.bf16.msra.mxu0 %v4979_v26 }
 0x4d0   :  { %2085 = vmatpush.bf16.msra.mxu2 %v4980_v56 }
 0x4d3   :  { %2060 = vmatpush.bf16.msra.mxu0 %v4981_v53  ;;  %v1918_v53 = vpop.permute.xlu0 %1917 }
 0x4d4   :  { %2086 = vmatpush.bf16.msra.mxu2 %v4982_v52 }
 0x4e5   :  { %v1816_v8 = vpop.f32.mrf.mxu1 }
 0x4eb   :  { %v1842_v0 = vpop.f32.mrf.mxu3 }
 0x4ed   :  { %v1818_v34 = vpop.f32.mrf.mxu1 }
 0x4ee   :  { %v1921_v34 = vmul.f32 %v1918_v53, %v4984_v19 }
 0x4f2   :  { %v1803_v38 = vpop.f32.mrf.mxu0 }
 0x4f3   :  { %v1844_v25 = vpop.f32.mrf.mxu3  ;;  %v1804_v33 = vadd.f32 %v1803_v38, %v4709_v14 }
 0x4f5   :  { %v1868_v13 = vpop.f32.mrf.mxu1  ;;  %v1817_v61 = vadd.f32 %v1816_v8, %v1804_v33 }
 0x4f8   :  { %v1829_v21 = vpop.f32.mrf.mxu2 }
 0x4f9   :  { %v1830_v63 = vadd.f32 %v1829_v21, %v4983_v44  ;;  %v1925_v21 = vadd.f32 %v1921_v34, %v4917_v37  ;;  %v4986_v44 = vld [vmem:[#allocation101_spill] sm:$0xff] }
 0x4fa   :  { %v1805_v62 = vpop.f32.mrf.mxu0 }
 0x4fb   :  { %v1894_v45 = vpop.f32.mrf.mxu3  ;;  %v1843_v55 = vadd.f32 %v1842_v0, %v1830_v63 }
 0x4fd   :  { %v1870_v26 = vpop.f32.mrf.mxu1  ;;  %2953 = vtanh.f32 %v1843_v55  ;;  %v1920_v55 = vmul.f32 %v1918_v53, %v4643_v11 }
 0x4fe   :  { %2955 = vtanh.f32 %v1817_v61 }
 0x500   :  { %v1831_v56 = vpop.f32.mrf.mxu2 }
 0x502   :  { %v1855_v4 = vpop.f32.mrf.mxu0 }
 0x503   :  { %v1896_v52 = vpop.f32.mrf.mxu3  ;;  %v1856_v28 = vadd.f32 %v1855_v4, %v4985_v15  ;;  %v2954_v16 = vpop.eup %2953  ;;  %v1923_v4 = vmul.f32 %v1918_v53, %v3451_v60 }
 0x504   :  { %v2956_v63 = vpop.eup %2955  ;;  %v1902_v8 = vmul.f32 0.5, %v2954_v16 }
 0x505   :  { %v1869_v0 = vadd.f32 %v1868_v13, %v1856_v28  ;;  %v1901_v61 = vmul.f32 0.5, %v2956_v63  ;;  %v1927_v16 = vadd.f32 %v1923_v4, %v3463_v20 }
 0x506   :  { %v1950_v25 = vpop.f32.mrf.mxu1  ;;  %v1905_v15 = vadd.f32 0.5, %v1902_v8 }
 0x507   :  { %v1981_v56 = vadd.f32 %v1950_v25, %v1925_v21 }
 0x508   :  { %v1881_v62 = vpop.f32.mrf.mxu2  ;;  %v1908_v13 = vmul.f32 %v1905_v15, %v4049_v43 }
 0x509   :  { %v1882_v38 = vadd.f32 %v1881_v62, %v4986_v44  ;;  %v1924_v62 = vadd.f32 %v1920_v55, %v4644_v1 }
 0x50a   :  { %v1857_v26 = vpop.f32.mrf.mxu0 }
 0x50b   :  { %v1895_v33 = vadd.f32 %v1894_v45, %v1882_v38  ;;  %v1904_v26 = vadd.f32 0.5, %v1901_v61  ;;  %v1922_v45 = vmul.f32 %v1918_v53, %v3455_v2 }
 0x50d   :  { %2957 = vtanh.f32 %v1895_v33  ;;  %v1976_v52 = vpop.f32.mrf.mxu3 }
 0x50e   :  { %v1952_v19 = vpop.f32.mrf.mxu1  ;;  %2959 = vtanh.f32 %v1981_v56  ;;  %v1983_v38 = vadd.f32 %v1976_v52, %v1927_v16 }
 0x50f   :  { %2961 = vtanh.f32 %v1869_v0  ;;  %v1926_v0 = vadd.f32 %v1922_v45, %v3466_v27 }
 0x510   :  { %v1883_v34 = vpop.f32.mrf.mxu2 }
 0x513   :  { %v1937_v44 = vpop.f32.mrf.mxu0  ;;  %v2958_v25 = vpop.eup %2957 }
 0x514   :  { %v1980_v28 = vadd.f32 %v1937_v44, %v1924_v62  ;;  %v1909_v21 = vmul.f32 %v2958_v25, %v1904_v26  ;;  %v2960_v19 = vpop.eup %2959 }
 0x515   :  { %v1978_v63 = vpop.f32.mrf.mxu3  ;;  %v2962_v56 = vpop.eup %2961  ;;  %v1988_v8 = vmul.f32 0.5, %v2960_v19 }
 0x516   :  { %2963 = vtanh.f32 %v1980_v28  ;;  %v4165_v33 = vadd.f32 %v1909_v21, %v1908_v13  ;;  %v1903_v55 = vmul.f32 0.5, %v2962_v56 }
 0x517   :  { %v1991_v43 = vadd.f32 0.5, %v1988_v8 }
 0x518   :  { %2965 = vtanh.f32 %v4165_v33  ;;  %v1906_v52 = vadd.f32 0.5, %v1903_v55  ;;  %v5019_v55 = vld [vmem:[#allocation56_spill] sm:$0xff] }
 0x519   :  { %2967 = vtanh.f32 %v1983_v38  ;;  %v1994_v16 = vmul.f32 %v1991_v43, %v4054_v49  ;;  %v5024_v43 = vld [vmem:[#allocation79_spill] sm:$0xff] }
 0x51b   :  { %v1939_v53 = vpop.f32.mrf.mxu0 }
 0x51c   :  { %v1963_v44 = vpop.f32.mrf.mxu2  ;;  %v2964_v4 = vpop.eup %2963  ;;  %v5022_v53 = vld [vmem:[#allocation57_spill] sm:$0xff] }
 0x51d   :  { %v1982_v61 = vadd.f32 %v1963_v44, %v1926_v0  ;;  %v1987_v15 = vmul.f32 0.5, %v2964_v4  ;;  %v5018_v0 = vld [vmem:[#allocation55_spill] sm:$0xff]  ;;  %v5023_v4 = vld [vmem:[#allocation58_spill] sm:$0xff] }
 0x51e   :  { %v2966_v34 = vpop.eup %2965  ;;  %v5020_v44 = vld [vmem:[#allocation75_spill] sm:$0xff] }
 0x51f   :  { %2969 = vtanh.f32 %v1982_v61  ;;  %v1990_v62 = vadd.f32 0.5, %v1987_v15  ;;  %v2968_v26 = vpop.eup %2967  ;;  %v1912_v25 = vmul.f32 %v2966_v34, %v1906_v52  ;;  %v5021_v61 = vld [vmem:[#allocation76_spill] sm:$0xff]  ;;  %v5026_v52 = vld [vmem:[#allocation81_spill] sm:$0xff] }
 0x520   :  { %v5025_v15 = vld [vmem:[#allocation80_spill] sm:$0xff]  ;;  %v5027_v34 = vld [vmem:[#allocation61_spill] sm:$0xff] }
 0x521   :  { %v1995_v28 = vmul.f32 %v2968_v26, %v1990_v62  ;;  %v2000_v21 = vpack.c.bf16 %v1912_v25, %v1912_v25  ;;  %v5028_v62 = vld [vmem:[#allocation82_spill] sm:$0xff]  ;;  %v5030_v25 = vld [vmem:[#allocation83_spill] sm:$0xff] }
 0x522   :  { %v5029_v26 = vld [vmem:[#allocation62_spill] sm:$0xff] }
 0x523   :  { %v4170_v19 = vadd.f32 %v1995_v28, %v1994_v16  ;;  %2022 = vmatmul.bf16.vlgmr.msrb.gmra.mxu1 %v2000_v21  ;;  %2048 = vmatmul.bf16.vlgmr.msrb.gmra.mxu3 %v2000_v21  ;;  %v5031_v16 = vld [vmem:[#allocation65_spill] sm:$0xff]  ;;  %v5032_v28 = vld [vmem:[#allocation84_spill] sm:$0xff] }
 0x524   :  { %v1965_v13 = vpop.f32.mrf.mxu2  ;;  %2148 = vmatpush.bf16.msrb.mxu1 %v4645_v54  ;;  %2174 = vmatpush.bf16.msrb.mxu3 %v4646_v29  ;;  %v4998_v54 = vld [vmem:[#allocation40_spill] sm:$0xff]  ;;  %v4999_v29 = vld [vmem:[#allocation45_spill] sm:$0xff] }
 0x525   :  { %v2970_v45 = vpop.eup %2969  ;;  %2971 = vtanh.f32 %v4170_v19  ;;  %v5033_v13 = vld [vmem:[#allocation66_spill] sm:$0xff] }
 0x526   :  { %v1989_v38 = vmul.f32 0.5, %v2970_v45  ;;  %v5035_v45 = vld [vmem:[#allocation69_spill] sm:$0xff] }
 0x528   :  { %2149 = vmatpush.bf16.msrb.mxu1 %v4647_v6  ;;  %2175 = vmatpush.bf16.msrb.mxu3 %v4648_v58  ;;  %v1992_v49 = vadd.f32 0.5, %v1989_v38  ;;  %v5000_v6 = vld [vmem:[#allocation41_spill] sm:$0xff]  ;;  %v5001_v58 = vld [vmem:[#allocation46_spill] sm:$0xff] }
 0x529   :  { %v5036_v38 = vld [vmem:[#allocation86_spill] sm:$0xff] }
 0x52b   :  { %v2972_v63 = vpop.eup %2971 }
 0x52c   :  { %v1998_v56 = vmul.f32 %v2972_v63, %v1992_v49  ;;  %2150 = vmatpush.bf16.msrb.mxu1 %v4649_v40  ;;  %2176 = vmatpush.bf16.msrb.mxu3 %v4650_v42  ;;  %v5002_v40 = vld [vmem:[#allocation59_spill] sm:$0xff]  ;;  %v5037_v49 = vld [vmem:[#allocation70_spill] sm:$0xff] }
 0x52d   :  { %v5003_v42 = vld [vmem:[#allocation47_spill] sm:$0xff] }
 0x52e   :  { %v1999_v8 = vpack.c.bf16 %v1998_v56, %v1998_v56  ;;  %v5038_v63 = vld [vmem:[#allocation87_spill] sm:$0xff]  ;;  %v5039_v56 = vld [vmem:[#allocation73_spill] sm:$0xff] }
 0x530   :  { %2009 = vmatmul.bf16.vlgmr.msrb.gmra.mxu0 %v1999_v8  ;;  %2035 = vmatmul.bf16.vlgmr.msrb.gmra.mxu2 %v1999_v8 }
 0x531   :  { %2135 = vmatpush.bf16.msrb.mxu0 %v3118_v5  ;;  %2151 = vmatpush.bf16.msrb.mxu1 %v4651_v22  ;;  %v4987_v5 = vld [vmem:[#allocation38_spill] sm:$0xff]  ;;  %v5004_v22 = vld [vmem:[#allocation60_spill] sm:$0xff] }
 0x532   :  { %2161 = vmatpush.bf16.msrb.mxu2 %v3122_v10  ;;  %2177 = vmatpush.bf16.msrb.mxu3 %v4652_v41  ;;  %v4988_v10 = vld [vmem:[#allocation25_spill] sm:$0xff]  ;;  %v5005_v41 = vld [vmem:[#allocation48_spill] sm:$0xff] }
 0x533   :  { %2074 = vmatmul.bf16.vlgmr.msra.gmra.mxu1 %v2000_v21  ;;  %2100 = vmatmul.bf16.vlgmr.msra.gmra.mxu3 %v2000_v21  ;;  %v5034_v21 = vld [vmem:[#allocation85_spill] sm:$0xff] }
 0x535   :  { %2136 = vmatpush.bf16.msrb.mxu0 %v3129_v18  ;;  %2152 = vmatpush.bf16.msrb.mxu1 %v4653_v7  ;;  %v4989_v18 = vld [vmem:[#allocation27_spill] sm:$0xff] }
 0x536   :  { %2162 = vmatpush.bf16.msrb.mxu2 %v3134_v23  ;;  %2178 = vmatpush.bf16.msrb.mxu3 %v4654_v57  ;;  %v4990_v23 = vld [vmem:[#allocation39_spill] sm:$0xff]  ;;  %v5007_v57 = vld [vmem:[#allocation49_spill] sm:$0xff] }
 0x537   :  { %v5006_v7 = vld [vmem:[#allocation63_spill] sm:$0xff] }
 0x539   :  { %2137 = vmatpush.bf16.msrb.mxu0 %v3139_v31  ;;  %2153 = vmatpush.bf16.msrb.mxu1 %v4655_v32  ;;  %v4991_v31 = vld [vmem:[#allocation42_spill] sm:$0xff]  ;;  %v5008_v32 = vld [vmem:[#allocation64_spill] sm:$0xff] }
 0x53a   :  { %2163 = vmatpush.bf16.msrb.mxu2 %v3145_v36  ;;  %2179 = vmatpush.bf16.msrb.mxu3 %v4656_v35  ;;  %v4992_v36 = vld [vmem:[#allocation29_spill] sm:$0xff]  ;;  %v5009_v35 = vld [vmem:[#allocation50_spill] sm:$0xff] }
 0x53d   :  { %2138 = vmatpush.bf16.msrb.mxu0 %v3151_v46  ;;  %2154 = vmatpush.bf16.msrb.mxu1 %v4657_v17  ;;  %v4993_v46 = vld [vmem:[#allocation31_spill] sm:$0xff] }
 0x53e   :  { %2164 = vmatpush.bf16.msrb.mxu2 %v3157_v48  ;;  %2180 = vmatpush.bf16.msrb.mxu3 %v4658_v51  ;;  %v4994_v48 = vld [vmem:[#allocation36_spill] sm:$0xff]  ;;  %v5010_v17 = vld [vmem:[#allocation67_spill] sm:$0xff] }
 0x53f   :  { %v5011_v51 = vld [vmem:[#allocation51_spill] sm:$0xff] }
 0x540   :  { %2061 = vmatmul.bf16.vlgmr.msra.gmra.mxu0 %v1999_v8  ;;  %2087 = vmatmul.bf16.vlgmr.msra.gmra.mxu2 %v1999_v8 }
 0x541   :  { %2139 = vmatpush.bf16.msrb.mxu0 %v4611_v47  ;;  %2155 = vmatpush.bf16.msrb.mxu1 %v4659_v59  ;;  %v4995_v47 = vld [vmem:[#allocation43_spill] sm:$0xff]  ;;  %v5012_v59 = vld [vmem:[#allocation68_spill] sm:$0xff] }
 0x542   :  { %2165 = vmatpush.bf16.msrb.mxu2 %v4612_v12  ;;  %2181 = vmatpush.bf16.msrb.mxu3 %v4713_v39  ;;  %v4996_v12 = vld [vmem:[#allocation37_spill] sm:$0xff]  ;;  %v5016_v39 = vld [vmem:[#allocation71_spill] sm:$0xff] }
 0x544   :  { %2156 = vmatmul.bf16.vlgmr.msrb.gmra.mxu1 %v1999_v8 }
 0x545   :  { %2221 = vmatpush.bf16.msra.mxu1 %v4661_v9  ;;  %2182 = vmatmul.bf16.vlgmr.msrb.gmra.mxu3 %v1999_v8  ;;  %v5013_v9 = vld [vmem:[#allocation53_spill] sm:$0xff] }
 0x546   :  { %2247 = vmatpush.bf16.msra.mxu3 %v4662_v24  ;;  %2140 = vmatpush.bf16.msrb.mxu0 %v4714_v50  ;;  %v5014_v24 = vld [vmem:[#allocation52_spill] sm:$0xff] }
 0x547   :  { %2166 = vmatpush.bf16.msrb.mxu2 %v4615_v30  ;;  %v4997_v30 = vld [vmem:[#allocation44_spill] sm:$0xff] }
 0x548   :  { %v5017_v50 = vld [vmem:[#allocation72_spill] sm:$0xff] }
 0x549   :  { %2222 = vmatpush.bf16.msra.mxu1 %v4663_v3  ;;  %v5015_v3 = vld [vmem:[#allocation54_spill] sm:$0xff] }
 0x54a   :  { %2248 = vmatpush.bf16.msra.mxu3 %v4987_v5  ;;  %2141 = vmatpush.bf16.msrb.mxu0 %v4988_v10  ;;  %v5041_v5 = vld [vmem:[#allocation74_spill] sm:$0xff]  ;;  %v5042_v10 = vld [vmem:[#allocation89_spill] sm:$0xff] }
 0x54b   :  { %2167 = vmatpush.bf16.msrb.mxu2 %v4989_v18  ;;  %v5043_v18 = vld [vmem:[#allocation77_spill] sm:$0xff] }
 0x54d   :  { %2223 = vmatpush.bf16.msra.mxu1 %v4990_v23  ;;  %v5044_v23 = vld [vmem:[#allocation90_spill] sm:$0xff] }
 0x54e   :  { %2249 = vmatpush.bf16.msra.mxu3 %v4991_v31  ;;  %2142 = vmatpush.bf16.msrb.mxu0 %v4992_v36  ;;  %v5045_v31 = vld [vmem:[#allocation78_spill] sm:$0xff]  ;;  %v5046_v36 = vld [vmem:[#allocation93_spill] sm:$0xff] }
 0x54f   :  { %2168 = vmatpush.bf16.msrb.mxu2 %v4993_v46  ;;  %v5047_v46 = vld [vmem:[#allocation94_spill] sm:$0xff] }
 0x551   :  { %2224 = vmatpush.bf16.msra.mxu1 %v4995_v47  ;;  %2143 = vmatmul.bf16.vlgmr.msrb.gmra.mxu0 %v1999_v8  ;;  %v5049_v47 = vld [vmem:[#allocation98_spill] sm:$0xff] }
 0x552   :  { %2208 = vmatpush.bf16.msra.mxu0 %v4994_v48  ;;  %2250 = vmatpush.bf16.msra.mxu3 %v4997_v30  ;;  %v5048_v48 = vld [vmem:[#allocation97_spill] sm:$0xff]  ;;  %v5051_v30 = vld [vmem:[#allocation100_spill] sm:$0xff] }
 0x553   :  { %2234 = vmatpush.bf16.msra.mxu2 %v4996_v12  ;;  %v5050_v12 = vld [vmem:[#allocation99_spill] sm:$0xff] }
 0x554   :  { %2169 = vmatmul.bf16.vlgmr.msrb.gmra.mxu2 %v1999_v8  ;;  %v5040_v8 = vld [vmem:[#allocation88_spill] sm:$0xff] }
 0x555   :  { %2225 = vmatpush.bf16.msra.mxu1 %v4999_v29 }
 0x556   :  { %2209 = vmatpush.bf16.msra.mxu0 %v4998_v54  ;;  %2251 = vmatpush.bf16.msra.mxu3 %v5001_v58 }
 0x557   :  { %2235 = vmatpush.bf16.msra.mxu2 %v5000_v6 }
 0x559   :  { %2226 = vmatpush.bf16.msra.mxu1 %v5003_v42 }
 0x55a   :  { %2210 = vmatpush.bf16.msra.mxu0 %v5002_v40  ;;  %2252 = vmatpush.bf16.msra.mxu3 %v5005_v41 }
 0x55b   :  { %2236 = vmatpush.bf16.msra.mxu2 %v5004_v22 }
 0x55d   :  { %2227 = vmatpush.bf16.msra.mxu1 %v5007_v57 }
 0x55e   :  { %2211 = vmatpush.bf16.msra.mxu0 %v5006_v7  ;;  %2253 = vmatpush.bf16.msra.mxu3 %v5009_v35  ;;  %v5052_v7 = vld [vmem:[#allocation17_spill] sm:$0xff] }
 0x55f   :  { %2237 = vmatpush.bf16.msra.mxu2 %v5008_v32 }
 0x561   :  { %2228 = vmatpush.bf16.msra.mxu1 %v5011_v51 }
 0x562   :  { %2212 = vmatpush.bf16.msra.mxu0 %v5010_v17  ;;  %2254 = vmatpush.bf16.msra.mxu3 %v5013_v9 }
 0x563   :  { %2238 = vmatpush.bf16.msra.mxu2 %v5012_v59 }
 0x565   :  { %2273 = vmatpush.bf16.msrb.mxu1 %v5014_v24  ;;  %v2125_v24 = vpop.permute.xlu1 %2124 }
 0x566   :  { %2299 = vmatpush.bf16.msrb.mxu3 %v5015_v3  ;;  %2213 = vmatpush.bf16.msra.mxu0 %v5016_v39 }
 0x567   :  { %2239 = vmatpush.bf16.msra.mxu2 %v5017_v50  ;;  %v5053_v50 = vld [vmem:[#allocation92_spill] sm:$0xff] }
 0x569   :  { %2274 = vmatpush.bf16.msrb.mxu1 %v5018_v0  ;;  %v2128_v0 = vmul.f32 %v2125_v24, %v5053_v50 }
 0x56a   :  { %2300 = vmatpush.bf16.msrb.mxu3 %v5019_v55  ;;  %2214 = vmatpush.bf16.msra.mxu0 %v5020_v44  ;;  %v5054_v44 = vld [vmem:[#allocation23_spill] sm:$0xff] }
 0x56b   :  { %2240 = vmatpush.bf16.msra.mxu2 %v5021_v61 }
 0x56d   :  { %2275 = vmatpush.bf16.msrb.mxu1 %v5022_v53 }
 0x56e   :  { %2301 = vmatpush.bf16.msrb.mxu3 %v5023_v4  ;;  %2215 = vmatpush.bf16.msra.mxu0 %v5024_v43  ;;  %v2132_v43 = vadd.f32 %v2128_v0, %v4917_v37 }
 0x56f   :  { %2241 = vmatpush.bf16.msra.mxu2 %v5025_v15  ;;  %v5055_v15 = vld [vmem:[#allocation101_spill] sm:$0xff] }
 0x571   :  { %2276 = vmatpush.bf16.msrb.mxu1 %v5027_v34 }
 0x572   :  { %2260 = vmatpush.bf16.msrb.mxu0 %v5026_v52  ;;  %2302 = vmatpush.bf16.msrb.mxu3 %v5029_v26 }
 0x573   :  { %2286 = vmatpush.bf16.msrb.mxu2 %v5028_v62 }
 0x575   :  { %2277 = vmatpush.bf16.msrb.mxu1 %v5031_v16 }
 0x576   :  { %2261 = vmatpush.bf16.msrb.mxu0 %v5030_v25  ;;  %2303 = vmatpush.bf16.msrb.mxu3 %v5033_v13  ;;  %v2127_v13 = vmul.f32 %v2125_v24, %v4643_v11  ;;  %v2129_v11 = vmul.f32 %v2125_v24, %v3455_v2 }
 0x577   :  { %2287 = vmatpush.bf16.msrb.mxu2 %v5032_v28 }
 0x579   :  { %2278 = vmatpush.bf16.msrb.mxu1 %v5035_v45 }
 0x57a   :  { %2262 = vmatpush.bf16.msrb.mxu0 %v5034_v21  ;;  %2304 = vmatpush.bf16.msrb.mxu3 %v5037_v49  ;;  %v2130_v49 = vmul.f32 %v2125_v24, %v3451_v60 }
 0x57b   :  { %2288 = vmatpush.bf16.msrb.mxu2 %v5036_v38 }
 0x57d   :  { %2279 = vmatpush.bf16.msrb.mxu1 %v5039_v56  ;;  %v2131_v56 = vadd.f32 %v2127_v13, %v4644_v1  ;;  %v2133_v1 = vadd.f32 %v2129_v11, %v3466_v27 }
 0x57e   :  { %2263 = vmatpush.bf16.msrb.mxu0 %v5038_v63  ;;  %2305 = vmatpush.bf16.msrb.mxu3 %v5041_v5 }
 0x57f   :  { %2289 = vmatpush.bf16.msrb.mxu2 %v5040_v8 }
 0x581   :  { %2280 = vmatpush.bf16.msrb.mxu1 %v5043_v18  ;;  %v2134_v18 = vadd.f32 %v2130_v49, %v3463_v20 }
 0x582   :  { %2264 = vmatpush.bf16.msrb.mxu0 %v5042_v10  ;;  %2306 = vmatpush.bf16.msrb.mxu3 %v5045_v31 }
 0x583   :  { %2290 = vmatpush.bf16.msrb.mxu2 %v5044_v23 }
 0x586   :  { %2265 = vmatpush.bf16.msrb.mxu0 %v5046_v36 }
 0x587   :  { %2291 = vmatpush.bf16.msrb.mxu2 %v5047_v46 }
 0x58a   :  { %2266 = vmatpush.bf16.msrb.mxu0 %v5048_v48 }
 0x58b   :  { %2292 = vmatpush.bf16.msrb.mxu2 %v5049_v47 }
 0x58e   :  { %2267 = vmatpush.bf16.msrb.mxu0 %v5050_v12 }
 0x58f   :  { %2293 = vmatpush.bf16.msrb.mxu2 %v5051_v30 }
 0x5a0   :  { %v2023_v54 = vpop.f32.mrf.mxu1 }
 0x5a6   :  { %v2049_v29 = vpop.f32.mrf.mxu3 }
 0x5a8   :  { %v2025_v6 = vpop.f32.mrf.mxu1 }
 0x5ad   :  { %v2010_v58 = vpop.f32.mrf.mxu0 }
 0x5ae   :  { %v2051_v40 = vpop.f32.mrf.mxu3  ;;  %v2011_v35 = vadd.f32 %v2010_v58, %v4709_v14 }
 0x5b0   :  { %v2075_v42 = vpop.f32.mrf.mxu1  ;;  %v2024_v9 = vadd.f32 %v2023_v54, %v2011_v35 }
 0x5b3   :  { %v2036_v22 = vpop.f32.mrf.mxu2 }
 0x5b4   :  { %v2037_v57 = vadd.f32 %v2036_v22, %v5052_v7 }
 0x5b5   :  { %v2012_v41 = vpop.f32.mrf.mxu0 }
 0x5b6   :  { %v2101_v32 = vpop.f32.mrf.mxu3  ;;  %v2050_v51 = vadd.f32 %v2049_v29, %v2037_v57 }
 0x5b8   :  { %v2077_v17 = vpop.f32.mrf.mxu1  ;;  %2973 = vtanh.f32 %v2050_v51 }
 0x5b9   :  { %2975 = vtanh.f32 %v2024_v9 }
 0x5bb   :  { %v2038_v59 = vpop.f32.mrf.mxu2 }
 0x5bd   :  { %v2062_v3 = vpop.f32.mrf.mxu0 }
 0x5be   :  { %v2103_v39 = vpop.f32.mrf.mxu3  ;;  %v2063_v61 = vadd.f32 %v2062_v3, %v5054_v44  ;;  %v2974_v4 = vpop.eup %2973 }
 0x5bf   :  { %v2976_v62 = vpop.eup %2975  ;;  %v2109_v16 = vmul.f32 0.5, %v2974_v4 }
 0x5c0   :  { %v2076_v28 = vadd.f32 %v2075_v42, %v2063_v61  ;;  %v2108_v45 = vmul.f32 0.5, %v2976_v62 }
 0x5c1   :  { %v2157_v55 = vpop.f32.mrf.mxu1  ;;  %v2112_v63 = vadd.f32 0.5, %v2109_v16 }
 0x5c2   :  { %v2188_v26 = vadd.f32 %v2157_v55, %v2132_v43  ;;  %v2111_v8 = vadd.f32 0.5, %v2108_v45 }
 0x5c3   :  { %v2088_v53 = vpop.f32.mrf.mxu2  ;;  %v2115_v31 = vmul.f32 %v2112_v63, %v4165_v33 }
 0x5c4   :  { %v2089_v52 = vadd.f32 %v2088_v53, %v5055_v15 }
 0x5c5   :  { %v2064_v34 = vpop.f32.mrf.mxu0 }
 0x5c6   :  { %v2102_v25 = vadd.f32 %v2101_v32, %v2089_v52 }
 0x5c8   :  { %2977 = vtanh.f32 %v2102_v25  ;;  %v2183_v21 = vpop.f32.mrf.mxu3 }
 0x5c9   :  { %v2159_v38 = vpop.f32.mrf.mxu1  ;;  %2979 = vtanh.f32 %v2188_v26  ;;  %v2190_v48 = vadd.f32 %v2183_v21, %v2134_v18 }
 0x5ca   :  { %2981 = vtanh.f32 %v2076_v28 }
 0x5cb   :  { %v2090_v37 = vpop.f32.mrf.mxu2 }
 0x5ce   :  { %v2144_v5 = vpop.f32.mrf.mxu0  ;;  %v2978_v10 = vpop.eup %2977 }
 0x5cf   :  { %v2187_v23 = vadd.f32 %v2144_v5, %v2131_v56  ;;  %v2116_v36 = vmul.f32 %v2978_v10, %v2111_v8  ;;  %v2980_v46 = vpop.eup %2979 }
 0x5d0   :  { %v2185_v60 = vpop.f32.mrf.mxu3  ;;  %v2982_v47 = vpop.eup %2981  ;;  %v2195_v30 = vmul.f32 0.5, %v2980_v46 }
 0x5d1   :  { %2983 = vtanh.f32 %v2187_v23  ;;  %v4281_v12 = vadd.f32 %v2116_v36, %v2115_v31  ;;  %v2110_v54 = vmul.f32 0.5, %v2982_v47  ;;  %v2841_v47 = vld [vmem:[%s4303_s6] ss:$0 sm:$0xff] }
 0x5d2   :  { %v2198_v33 = vadd.f32 0.5, %v2195_v30 }
 0x5d3   :  { %2985 = vtanh.f32 %v4281_v12  ;;  %v2113_v40 = vadd.f32 0.5, %v2110_v54 }
 0x5d4   :  { %2987 = vtanh.f32 %v2190_v48  ;;  %v2201_v32 = vmul.f32 %v2198_v33, %v4170_v19 }
 0x5d6   :  { %v2146_v2 = vpop.f32.mrf.mxu0 }
 0x5d7   :  { %v2170_v20 = vpop.f32.mrf.mxu2  ;;  %v2984_v6 = vpop.eup %2983 }
 0x5d8   :  { %v2189_v29 = vadd.f32 %v2170_v20, %v2133_v1  ;;  %v2194_v58 = vmul.f32 0.5, %v2984_v6  ;;  %v2842_v20 = vld [vmem:[#allocation2] ss:$0 sm:$0xff] }
 0x5d9   :  { %v2986_v42 = vpop.eup %2985 }
 0x5da   :  { %2989 = vtanh.f32 %v2189_v29  ;;  %v2197_v22 = vadd.f32 0.5, %v2194_v58  ;;  %v2988_v41 = vpop.eup %2987  ;;  %v2119_v57 = vmul.f32 %v2986_v42, %v2113_v40 }
 0x5dc   :  { %v2202_v35 = vmul.f32 %v2988_v41, %v2197_v22  ;;  %v2207_v51 = vpack.c.bf16 %v2119_v57, %v2119_v57 }
 0x5de   :  { %v2203_v59 = vadd.f32 %v2202_v35, %v2201_v32  ;;  %2229 = vmatmul.bf16.vlgmr.msra.gmra.mxu1 %v2207_v51  ;;  %2255 = vmatmul.bf16.vlgmr.msra.gmra.mxu3 %v2207_v51 }
 0x5df   :  { %v2172_v17 = vpop.f32.mrf.mxu2 }
 0x5e0   :  { %v2990_v27 = vpop.eup %2989  ;;  %2991 = vtanh.f32 %v2203_v59 }
 0x5e1   :  { %v2196_v9 = vmul.f32 0.5, %v2990_v27 }
 0x5e3   :  { %v2199_v24 = vadd.f32 0.5, %v2196_v9 }
 0x5e6   :  { %v2992_v3 = vpop.eup %2991 }
 0x5e7   :  { %v2205_v39 = vmul.f32 %v2992_v3, %v2199_v24 }
 0x5e9   :  { %v2206_v50 = vpack.c.bf16 %v2205_v39, %v2205_v39 }
 0x5eb   :  { %2216 = vmatmul.bf16.vlgmr.msra.gmra.mxu0 %v2206_v50  ;;  %2242 = vmatmul.bf16.vlgmr.msra.gmra.mxu2 %v2206_v50 }
 0x5ee   :  { %2281 = vmatmul.bf16.vlgmr.msrb.gmra.mxu1 %v2207_v51  ;;  %2307 = vmatmul.bf16.vlgmr.msrb.gmra.mxu3 %v2207_v51 }
 0x5fb   :  { %2268 = vmatmul.bf16.vlgmr.msrb.gmra.mxu0 %v2206_v50  ;;  %2294 = vmatmul.bf16.vlgmr.msrb.gmra.mxu2 %v2206_v50 }
 0x65b   :  { %v2230_v19 = vpop.f32.mrf.mxu1 }
 0x661   :  { %v2256_v0 = vpop.f32.mrf.mxu3 }
 0x663   :  { %v2232_v55 = vpop.f32.mrf.mxu1 }
 0x668   :  { %v2217_v61 = vpop.f32.mrf.mxu0 }
 0x669   :  { %v2258_v53 = vpop.f32.mrf.mxu3  ;;  %v2218_v26 = vadd.f32 %v2217_v61, %v4709_v14 }
 0x66b   :  { %v2282_v4 = vpop.f32.mrf.mxu1  ;;  %v2231_v13 = vadd.f32 %v2230_v19, %v2218_v26 }
 0x66e   :  { %v2243_v43 = vpop.f32.mrf.mxu2 }
 0x66f   :  { %v2244_v34 = vadd.f32 %v2243_v43, %v5052_v7 }
 0x670   :  { %v2219_v52 = vpop.f32.mrf.mxu0 }
 0x671   :  { %v2308_v62 = vpop.f32.mrf.mxu3  ;;  %v2257_v16 = vadd.f32 %v2256_v0, %v2244_v34 }
 0x673   :  { %v2284_v25 = vpop.f32.mrf.mxu1  ;;  %2993 = vtanh.f32 %v2257_v16 }
 0x674   :  { %2995 = vtanh.f32 %v2231_v13 }
 0x676   :  { %v2245_v28 = vpop.f32.mrf.mxu2 }
 0x678   :  { %v2269_v21 = vpop.f32.mrf.mxu0 }
 0x679   :  { %v2310_v45 = vpop.f32.mrf.mxu3  ;;  %v2270_v38 = vadd.f32 %v2269_v21, %v5054_v44  ;;  %v2994_v63 = vpop.eup %2993 }
 0x67a   :  { %v2996_v8 = vpop.eup %2995  ;;  %v2316_v5 = vmul.f32 0.5, %v2994_v63 }
 0x67b   :  { %v2283_v10 = vadd.f32 %v2282_v4, %v2270_v38  ;;  %v2315_v14 = vmul.f32 0.5, %v2996_v8 }
 0x67c   :  { %v2319_v18 = vadd.f32 0.5, %v2316_v5 }
 0x67d   :  { %v2318_v11 = vadd.f32 0.5, %v2315_v14 }
 0x67e   :  { %v2295_v49 = vpop.f32.mrf.mxu2  ;;  %v2322_v36 = vmul.f32 %v2319_v18, %v4281_v12 }
 0x67f   :  { %v2296_v37 = vadd.f32 %v2295_v49, %v5055_v15 }
 0x680   :  { %v2271_v56 = vpop.f32.mrf.mxu0 }
 0x681   :  { %v2309_v7 = vadd.f32 %v2308_v62, %v2296_v37 }
 0x683   :  { %2997 = vtanh.f32 %v2309_v7 }
 0x684   :  { %2999 = vtanh.f32 %v2283_v10 }
 0x686   :  { %v2297_v23 = vpop.f32.mrf.mxu2 }
 0x689   :  { %v2998_v31 = vpop.eup %2997 }
 0x68a   :  { %v2323_v46 = vmul.f32 %v2998_v31, %v2318_v11  ;;  %v3000_v44 = vpop.eup %2999 }
 0x68b   :  { %v2317_v60 = vmul.f32 0.5, %v3000_v44 }
 0x68c   :  { %v2324_v48 = vadd.f32 %v2323_v46, %v2322_v36 }
 0x68d   :  { %v2320_v15 = vadd.f32 0.5, %v2317_v60 }
 0x68e   :  { %3001 = vtanh.f32 %v2324_v48 }
 0x694   :  { %v3002_v30 = vpop.eup %3001 }
 0x695   :  { %v2326_v1 = vmul.f32 %v3002_v30, %v2320_v15 }
 0x697   :  { %v2330_v54 = vmul.f32 %v2841_v47, %v2326_v1 }
 0x699   :  { %2331 = vadd.xlane.f32.xlu2 %v2330_v54 }
 0x70c   :  { %v2332_v29 = vpop.xlane.xlu2 %2331 }
 0x70d   :  { %v2336_v2 = vadd.f32 %v2842_v20, %v2332_v29 }
 0x70f   :  { %2338 = vst.msk [vmem:[%s4305_s8] sm:$0xff] %vm2337_vm0, %v2336_v2 }
 0x710   :  { %2343 = vsyncpa [#allocation4], 1 }
 0x711   :  { %2344 = vsyncpa [#allocation6], 1 }

</bundles_post_ra>
